<compile_context>
chip_gen: v6e
topology: v6e:2x2x1
jax: 0.10.0
libtpu: 0.0.40
codegen_flags: <defaults>
</compile_context>

<pallas_src>
import functools

import jax
import jax.numpy as jnp
from jax.experimental import pallas as pl
from jax.experimental.pallas import tpu as pltpu


_LN_EPS = 1e-5
_NEG_INF = -1.0e12
_LEAKY_SLOPE = 0.2
_INV_SQRT2 = 0.7071067811865476


def _erf_f32(x):
    # Abramowitz & Stegun 7.1.26 rational approximation, max abs err ~1.5e-7,
    # i.e. float32-exact stand-in for erf (torch nn.GELU() uses exact erf GELU).
    a1 = 0.254829592
    a2 = -0.284496736
    a3 = 1.421413741
    a4 = -1.453152027
    a5 = 1.061405429
    p = 0.3275911
    ax = jnp.abs(x)
    t = 1.0 / (1.0 + p * ax)
    poly = ((((a5 * t + a4) * t + a3) * t + a2) * t + a1) * t
    y = 1.0 - poly * jnp.exp(-ax * ax)
    return jnp.where(x >= 0.0, y, -y)


def _gelu_exact(x):
    return 0.5 * x * (1.0 + _erf_f32(x * _INV_SQRT2))


def _layer_norm(x, gamma, beta):
    mu = jnp.mean(x, axis=-1, keepdims=True)
    xc = x - mu
    var = jnp.mean(xc * xc, axis=-1, keepdims=True)
    return xc * jax.lax.rsqrt(var + _LN_EPS) * gamma + beta


def _gat_all_heads_kernel(mask_ref, x_ref, ef_ref, rij_ref, rit_ref,
                          w1eff_ref, wattn_ref, vec_ref, out_ref,
                          *, num_heads, p, e_dim):
    n = mask_ref.shape[0]
    hp = num_heads * p
    d = 2 * p + e_dim
    hd = num_heads * d

    # packed per-head vectors (single DMA); rows:
    #   0: fused (LN1-beta @ W^T + lin bias)   1: attn b1   2: attn w2 row
    #   3: attn b2 (one scalar per head)       4: LN2 gamma 5: LN2 beta
    vecs = vec_ref[...]
    beff = vecs[0:1, :hp]
    ab1 = vecs[1:2, :hd]
    aw2 = vecs[2:3, :hd]
    ab2 = vecs[3:4, :num_heads]
    ln2_g = vecs[4:5, :hp]
    ln2_b = vecs[5:6, :hp]

    # ---- 1. shared LayerNorm normalization + all-head node Linear
    #         (per-head gamma/beta folded into w1eff/beff in the wrapper) ----
    x = x_ref[...]                                              # (N, F_in)
    mu = jnp.mean(x, axis=-1, keepdims=True)
    xc = x - mu
    var = jnp.mean(xc * xc, axis=-1, keepdims=True)
    xn = xc * jax.lax.rsqrt(var + _LN_EPS)
    nf = jnp.dot(xn, w1eff_ref[...],
                 preferred_element_type=jnp.float32) + beff     # (N, H*p)

    # ---- 2. attention MLP; first Linear split over [nf_i | nf_j | edge_ij],
    #         heads batched along lanes via block-diag / concatenated weights ----
    wi = wattn_ref[0:hp, :]                                     # (H*p, H*D)
    wj = wattn_ref[hp:2 * hp, :]                                # (H*p, H*D)
    we = wattn_ref[2 * hp:2 * hp + e_dim, :]                    # (E,   H*D)
    p_i = jnp.dot(nf, wi, preferred_element_type=jnp.float32)   # (N,   H*D)
    p_j = jnp.dot(nf, wj, preferred_element_type=jnp.float32)   # (N,   H*D)
    p_e = jnp.dot(ef_ref[...], we,
                  preferred_element_type=jnp.float32)           # (N^2, H*D)

    rij = rij_ref[...]
    ri = rij[:, :n]                # (N^2, N) one-hot on i = pair // N
    rj = rij[:, n:2 * n]           # (N^2, N) one-hot on j = pair %  N
    hidden = (p_e
              + jnp.dot(ri, p_i, preferred_element_type=jnp.float32)
              + jnp.dot(rj, p_j, preferred_element_type=jnp.float32)
              + ab1)                                            # (N^2, H*D)
    g = _gelu_exact(hidden)

    msk = mask_ref[...] > 0.5
    rit = rit_ref[...]                                          # (N, N^2)

    # ---- 3. per-head (tiny, N x N) score / softmax / aggregate / LayerNorm ----
    outs = []
    for h in range(num_heads):
        g_h = g[:, h * d:(h + 1) * d]
        s_h = jnp.sum(g_h * aw2[:, h * d:(h + 1) * d],
                      axis=-1, keepdims=True)                   # (N^2, 1)
        score = jnp.dot(rit, s_h * rj,
                        preferred_element_type=jnp.float32)     # (N, N)
        score = score + ab2[:, h:h + 1]
        score = jnp.maximum(score, _LEAKY_SLOPE * score)        # leaky relu
        score = jnp.where(msk, score, _NEG_INF)
        mx = jnp.max(score, axis=-1, keepdims=True)
        e = jnp.exp(score - mx)
        denom = jnp.sum(e, axis=-1, keepdims=True)              # (N, 1)
        nf_h = nf[:, h * p:(h + 1) * p]
        agg = jnp.dot(e, nf_h, preferred_element_type=jnp.float32)
        agg = agg * pl.reciprocal(denom, approx=True)           # deferred softmax
        outs.append(_layer_norm(agg,
                                ln2_g[:, h * p:(h + 1) * p],
                                ln2_b[:, h * p:(h + 1) * p]))
    y = outs[0] if num_heads == 1 else jnp.concatenate(outs, axis=-1)
    out_ref[...] = y.astype(out_ref.dtype)                      # (N, H*p) dense


def gat_layer_pallas(node_features, edge_features, node_adjacent, params):
    """node_features (N, F_in), edge_features (N, N, E), node_adjacent (N, N).
    params hold torch-layout weights stacked over heads (see init_params)."""
    N, F_in = node_features.shape
    E = edge_features.shape[-1]
    H, p, _ = params["lin_w"].shape
    D = 2 * p + E
    HP, HD = H * p, H * D
    f32 = jnp.float32

    x = node_features.astype(f32)
    ef = edge_features.reshape(N * N, E).astype(f32)

    # head-independent adjacency mask (normalize_adjacent_matrix(A) > 0),
    # hoisted out of the kernel so it is computed once rather than per head.
    adj = node_adjacent.astype(f32)
    a = adj + jnp.eye(N, dtype=f32)
    deg = 1.0 / jnp.sqrt(jnp.sum(a, axis=-1))
    deg = jnp.where(jnp.isnan(deg), 0.0, deg)
    a_norm = deg[:, None] * a * deg[None, :]
    mask01 = (a_norm > 0).astype(f32)

    # 0/1 selector matrices mapping node index -> flattened (i, j) pair index
    r = jnp.arange(N * N)
    c = jnp.arange(N)
    ri = (r[:, None] // N == c[None, :]).astype(f32)     # picks nf[i]
    rj = (r[:, None] % N == c[None, :]).astype(f32)      # picks nf[j]
    rij = jnp.concatenate([ri, rj], axis=-1)             # (N^2, 2N)
    rit = ri.T                                           # (N, N^2)

    # ---- weight packing: fold LN1 gamma/beta into the node Linear; stack
    #      heads along lanes (block-diagonal i/j blocks of attention W1) ----
    ln1_g = params["ln1_w"].astype(f32)                   # (H, F_in)
    ln1_b = params["ln1_b"].astype(f32)
    lin_w = params["lin_w"].astype(f32)                   # (H, p, F_in)
    lin_b = params["lin_b"].astype(f32)                   # (H, p)
    w1eff = jnp.concatenate(
        [ln1_g[h][:, None] * lin_w[h].T for h in range(H)], axis=-1)  # (F_in, H*p)
    beff = jnp.concatenate(
        [ln1_b[h] @ lin_w[h].T + lin_b[h] for h in range(H)], axis=-1)  # (H*p,)

    wa_t = jnp.transpose(params["att_w1"], (0, 2, 1)).astype(f32)  # (H, D, D)
    wi_bd = jnp.zeros((HP, HD), f32)
    wj_bd = jnp.zeros((HP, HD), f32)
    we_cat = jnp.zeros((E, HD), f32)
    for h in range(H):
        wi_bd = wi_bd.at[h * p:(h + 1) * p, h * D:(h + 1) * D].set(wa_t[h, :p, :])
        wj_bd = wj_bd.at[h * p:(h + 1) * p, h * D:(h + 1) * D].set(wa_t[h, p:2 * p, :])
        we_cat = we_cat.at[:, h * D:(h + 1) * D].set(wa_t[h, 2 * p:, :])
    # single weight DMA, sliced at static 8-aligned row offsets in-kernel
    w_attn = jnp.concatenate([wi_bd, wj_bd, we_cat], axis=0)      # (2*H*p+E, H*D)

    ab1 = params["att_b1"].astype(f32).reshape(HD)
    aw2 = params["att_w2"].astype(f32).reshape(HD)
    ab2 = params["att_b2"].astype(f32).reshape(H)
    ln2_g = params["ln2_w"].astype(f32).reshape(HP)
    ln2_b = params["ln2_b"].astype(f32).reshape(HP)

    vec_w = max(128, ((max(HP, HD, H) + 127) // 128) * 128)
    vecs = jnp.zeros((8, vec_w), f32)
    vecs = vecs.at[0, :HP].set(beff)
    vecs = vecs.at[1, :HD].set(ab1)
    vecs = vecs.at[2, :HD].set(aw2)
    vecs = vecs.at[3, :H].set(ab2)
    vecs = vecs.at[4, :HP].set(ln2_g)
    vecs = vecs.at[5, :HP].set(ln2_b)

    kernel = functools.partial(_gat_all_heads_kernel,
                               num_heads=H, p=p, e_dim=E)

    def full(shape):
        return pl.BlockSpec(shape, lambda i: (0, 0))

    out = pl.pallas_call(
        kernel,
        out_shape=jax.ShapeDtypeStruct((N, HP), f32),
        grid_spec=pltpu.PrefetchScalarGridSpec(
            num_scalar_prefetch=0,
            grid=(1,),
            in_specs=[
                full((N, N)),            # precomputed A_norm > 0 mask
                full((N, F_in)),         # node features
                full((N * N, E)),        # edge features (flattened pairs)
                full((N * N, 2 * N)),    # [Ri | Rj] pair selectors
                full((N, N * N)),        # Ri^T
                full((F_in, HP)),        # fused LN1*Linear weight, heads on lanes
                full((2 * HP + E, HD)),  # attn W1 blocks (i/j block-diag, e cat)
                full((8, vec_w)),        # packed per-head bias / w2 / LN2 vectors
            ],
            out_specs=pl.BlockSpec((N, HP), lambda i: (0, 0)),
        ),
        compiler_params=pltpu.CompilerParams(
            dimension_semantics=("arbitrary",)),
    )(mask01, x, ef, rij, rit, w1eff, w_attn, vecs)

    # already the torch.concat(head outputs, dim=-1) layout
    return out


def init_params(key, f_in, f_out, e_dim, num_heads):
    """Synthetic per-head parameters (torch layouts), stacked over heads."""
    assert f_out % num_heads == 0
    p = f_out // num_heads
    d = 2 * p + e_dim
    keys = jax.random.split(key, 10)

    def rnd(k, shape, scale=0.1):
        return scale * jax.random.normal(k, shape, dtype=jnp.float32)

    return {
        "ln1_w": 1.0 + rnd(keys[0], (num_heads, f_in)),
        "ln1_b": rnd(keys[1], (num_heads, f_in)),
        "lin_w": rnd(keys[2], (num_heads, p, f_in)),      # torch Linear (out,in)
        "lin_b": rnd(keys[3], (num_heads, p)),
        "att_w1": rnd(keys[4], (num_heads, d, d)),
        "att_b1": rnd(keys[5], (num_heads, d)),
        "att_w2": rnd(keys[6], (num_heads, 1, d)),
        "att_b2": rnd(keys[7], (num_heads, 1)),
        "ln2_w": 1.0 + rnd(keys[8], (num_heads, p)),
        "ln2_b": rnd(keys[9], (num_heads, p)),
    }


def gat_layer_reference(node_features, edge_features, node_adjacent, params):
    """Pure-JAX mirror of the torch GAT_layer forward."""
    num_heads = params["ln1_w"].shape[0]
    n = node_features.shape[0]
    e_dim = edge_features.shape[-1]

    a = node_adjacent + jnp.eye(n, dtype=node_adjacent.dtype)
    deg = 1.0 / jnp.sqrt(jnp.sum(a, axis=-1))
    deg = jnp.where(jnp.isnan(deg), 0.0, deg)
    a_norm = deg[:, None] * a * deg[None, :]

    def ln(x, g, b):
        mu = x.mean(-1, keepdims=True)
        var = ((x - mu) ** 2).mean(-1, keepdims=True)
        return (x - mu) / jnp.sqrt(var + _LN_EPS) * g + b

    ef = edge_features.reshape(n * n, e_dim)
    outs = []
    for h in range(num_heads):
        xln = ln(node_features, params["ln1_w"][h], params["ln1_b"][h])
        nf = xln @ params["lin_w"][h].T + params["lin_b"][h]
        nf_i = jnp.repeat(nf, n, axis=0)        # row r = nf[r // n]
        nf_j = jnp.tile(nf, (n, 1))             # row r = nf[r %  n]
        feat = jnp.concatenate([nf_i, nf_j, ef], axis=-1)
        hid = feat @ params["att_w1"][h].T + params["att_b1"][h]
        hid = jax.nn.gelu(hid, approximate=False)
        score = (hid @ params["att_w2"][h].T + params["att_b2"][h]).reshape(n, n)
        score = jnp.where(score > 0, score, _LEAKY_SLOPE * score)
        score = jnp.where(a_norm > 0, score, _NEG_INF)
        att = jax.nn.softmax(score, axis=-1)
        hout = att @ nf
        outs.append(ln(hout, params["ln2_w"][h], params["ln2_b"][h]))
    return jnp.concatenate(outs, axis=-1)


if __name__ == "__main__":
    key = jax.random.PRNGKey(0)
    k_feat, k_adj, k_edge, k_par = jax.random.split(key, 4)
    k_adj_mask, k_adj_val = jax.random.split(k_adj)

    N = 16        # nodes per graph
    F_IN = 32     # ndim_node_in
    F_OUT = 32    # ndim_node_out (after concat over heads)
    E = 8         # ndim_edge
    H = 2         # num_heads  -> per-head p = 16

    node_features = jax.random.normal(k_feat, (N, F_IN), dtype=jnp.float32)
    adj_mask = (jax.random.uniform(k_adj_mask, (N, N)) > 0.5).astype(jnp.float32)
    node_adjacent = adj_mask * jnp.abs(
        jax.random.normal(k_adj_val, (N, N), dtype=jnp.float32))
    edge_features = jax.random.normal(k_edge, (N, N, E), dtype=jnp.float32)
    params = init_params(k_par, F_IN, F_OUT, E, H)

    out = gat_layer_pallas(node_features, edge_features, node_adjacent, params)
    out = jax.block_until_ready(out)

    ref = gat_layer_reference(node_features, edge_features, node_adjacent, params)
    assert out.shape == (N, F_OUT)
    assert jnp.allclose(out, ref, atol=1e-3, rtol=1e-3), (
        f"mismatch vs reference, max abs err {jnp.max(jnp.abs(out - ref))}")

    print("KERNEL_OK")
</pallas_src>

<mosaic_0001>
module attributes {stable_mosaic.version = 11 : i64} {
  func.func @_gat_all_heads_kernel(%arg0: i32, %arg1: memref<16x16xf32, #tpu.memory_space<vmem>>, %arg2: memref<16x32xf32, #tpu.memory_space<vmem>>, %arg3: memref<256x8xf32, #tpu.memory_space<vmem>>, %arg4: memref<256x32xf32, #tpu.memory_space<vmem>>, %arg5: memref<16x256xf32, #tpu.memory_space<vmem>>, %arg6: memref<32x32xf32, #tpu.memory_space<vmem>>, %arg7: memref<72x80xf32, #tpu.memory_space<vmem>>, %arg8: memref<8x128xf32, #tpu.memory_space<vmem>>, %arg9: memref<16x32xf32, #tpu.memory_space<vmem>>) attributes {dimension_semantics = [#tpu.dimension_semantics<arbitrary>], iteration_bounds = array<i64: 1>, scalar_prefetch = 0 : i64, scratch_operands = 0 : i64, tpu.core_type = #tpu.core_type<tc>, window_params = [{pipeline_mode = #tpu.pipeline_mode<synchronous>, transform_indices = @transform_0, window_bounds = array<i64: 16, 16>}, {pipeline_mode = #tpu.pipeline_mode<synchronous>, transform_indices = @transform_1, window_bounds = array<i64: 16, 32>}, {pipeline_mode = #tpu.pipeline_mode<synchronous>, transform_indices = @transform_2, window_bounds = array<i64: 256, 8>}, {pipeline_mode = #tpu.pipeline_mode<synchronous>, transform_indices = @transform_3, window_bounds = array<i64: 256, 32>}, {pipeline_mode = #tpu.pipeline_mode<synchronous>, transform_indices = @transform_4, window_bounds = array<i64: 16, 256>}, {pipeline_mode = #tpu.pipeline_mode<synchronous>, transform_indices = @transform_5, window_bounds = array<i64: 32, 32>}, {pipeline_mode = #tpu.pipeline_mode<synchronous>, transform_indices = @transform_6, window_bounds = array<i64: 72, 80>}, {pipeline_mode = #tpu.pipeline_mode<synchronous>, transform_indices = @transform_7, window_bounds = array<i64: 8, 128>}, {pipeline_mode = #tpu.pipeline_mode<synchronous>, transform_indices = @transform_8, window_bounds = array<i64: 16, 32>}]} {
    %c0 = arith.constant 0 : index
    %c0_0 = arith.constant 0 : index
    %0 = vector.load %arg8[%c0, %c0_0] : memref<8x128xf32, #tpu.memory_space<vmem>>, vector<8x128xf32>
    %1 = vector.extract_strided_slice %0 {offsets = [0, 0], sizes = [1, 32], strides = [1, 1]} : vector<8x128xf32> to vector<1x32xf32>
    %2 = vector.extract_strided_slice %0 {offsets = [1, 0], sizes = [1, 80], strides = [1, 1]} : vector<8x128xf32> to vector<1x80xf32>
    %3 = vector.extract_strided_slice %0 {offsets = [2, 0], sizes = [1, 80], strides = [1, 1]} : vector<8x128xf32> to vector<1x80xf32>
    %4 = vector.extract_strided_slice %0 {offsets = [3, 0], sizes = [1, 2], strides = [1, 1]} : vector<8x128xf32> to vector<1x2xf32>
    %5 = vector.extract_strided_slice %0 {offsets = [4, 0], sizes = [1, 32], strides = [1, 1]} : vector<8x128xf32> to vector<1x32xf32>
    %6 = vector.extract_strided_slice %0 {offsets = [5, 0], sizes = [1, 32], strides = [1, 1]} : vector<8x128xf32> to vector<1x32xf32>
    %c0_1 = arith.constant 0 : index
    %c0_2 = arith.constant 0 : index
    %7 = vector.load %arg2[%c0_1, %c0_2] : memref<16x32xf32, #tpu.memory_space<vmem>>, vector<16x32xf32>
    %cst = arith.constant dense<0.000000e+00> : vector<16xf32>
    %8 = vector.multi_reduction <add>, %7, %cst [1] : vector<16x32xf32> to vector<16xf32>
    %9 = vector.shape_cast %8 : vector<16xf32> to vector<16x1xf32>
    %cst_3 = arith.constant 3.200000e+01 : f32
    %10 = vector.broadcast %cst_3 : f32 to vector<16x1xf32>
    %11 = arith.divf %9, %10 : vector<16x1xf32>
    %12 = vector.broadcast %11 : vector<16x1xf32> to vector<16x32xf32>
    %13 = arith.subf %7, %12 : vector<16x32xf32>
    %14 = arith.mulf %13, %13 : vector<16x32xf32>
    %cst_4 = arith.constant dense<0.000000e+00> : vector<16xf32>
    %15 = vector.multi_reduction <add>, %14, %cst_4 [1] : vector<16x32xf32> to vector<16xf32>
    %16 = vector.shape_cast %15 : vector<16xf32> to vector<16x1xf32>
    %cst_5 = arith.constant 3.200000e+01 : f32
    %17 = vector.broadcast %cst_5 : f32 to vector<16x1xf32>
    %18 = arith.divf %16, %17 : vector<16x1xf32>
    %cst_6 = arith.constant 9.99999974E-6 : f32
    %19 = vector.broadcast %cst_6 : f32 to vector<16x1xf32>
    %20 = arith.addf %18, %19 : vector<16x1xf32>
    %21 = math.rsqrt %20 : vector<16x1xf32>
    %22 = vector.broadcast %21 : vector<16x1xf32> to vector<16x32xf32>
    %23 = arith.mulf %13, %22 : vector<16x32xf32>
    %c0_7 = arith.constant 0 : index
    %c0_8 = arith.constant 0 : index
    %24 = vector.load %arg6[%c0_7, %c0_8] : memref<32x32xf32, #tpu.memory_space<vmem>>, vector<32x32xf32>
    %cst_9 = arith.constant dense<0.000000e+00> : vector<16x32xf32>
    %25 = tpu.matmul %23, %24, %cst_9 {dimension_numbers = #tpu.dot_dimension_numbers<[1], [0], [0], [1], [0, 0, 1, 1], [], []>} : vector<16x32xf32>, vector<32x32xf32>, vector<16x32xf32> -> vector<16x32xf32>
    %26 = vector.broadcast %1 : vector<1x32xf32> to vector<16x32xf32>
    %27 = arith.addf %25, %26 : vector<16x32xf32>
    %c0_10 = arith.constant 0 : index
    %c0_11 = arith.constant 0 : index
    %28 = vector.load %arg7[%c0_10, %c0_11] : memref<72x80xf32, #tpu.memory_space<vmem>>, vector<32x80xf32>
    %c32 = arith.constant 32 : index
    %c0_12 = arith.constant 0 : index
    %29 = vector.load %arg7[%c32, %c0_12] : memref<72x80xf32, #tpu.memory_space<vmem>>, vector<32x80xf32>
    %c64 = arith.constant 64 : index
    %c0_13 = arith.constant 0 : index
    %30 = vector.load %arg7[%c64, %c0_13] : memref<72x80xf32, #tpu.memory_space<vmem>>, vector<8x80xf32>
    %cst_14 = arith.constant dense<0.000000e+00> : vector<16x80xf32>
    %31 = tpu.matmul %27, %28, %cst_14 {dimension_numbers = #tpu.dot_dimension_numbers<[1], [0], [0], [1], [0, 0, 1, 1], [], []>} : vector<16x32xf32>, vector<32x80xf32>, vector<16x80xf32> -> vector<16x80xf32>
    %cst_15 = arith.constant dense<0.000000e+00> : vector<16x80xf32>
    %32 = tpu.matmul %27, %29, %cst_15 {dimension_numbers = #tpu.dot_dimension_numbers<[1], [0], [0], [1], [0, 0, 1, 1], [], []>} : vector<16x32xf32>, vector<32x80xf32>, vector<16x80xf32> -> vector<16x80xf32>
    %c0_16 = arith.constant 0 : index
    %c0_17 = arith.constant 0 : index
    %33 = vector.load %arg3[%c0_16, %c0_17] : memref<256x8xf32, #tpu.memory_space<vmem>>, vector<256x8xf32>
    %cst_18 = arith.constant dense<0.000000e+00> : vector<256x80xf32>
    %34 = tpu.matmul %33, %30, %cst_18 {dimension_numbers = #tpu.dot_dimension_numbers<[1], [0], [0], [1], [0, 0, 1, 1], [], []>} : vector<256x8xf32>, vector<8x80xf32>, vector<256x80xf32> -> vector<256x80xf32>
    %c0_19 = arith.constant 0 : index
    %c0_20 = arith.constant 0 : index
    %35 = vector.load %arg4[%c0_19, %c0_20] : memref<256x32xf32, #tpu.memory_space<vmem>>, vector<256x32xf32>
    %36 = vector.extract_strided_slice %35 {offsets = [0, 0], sizes = [256, 16], strides = [1, 1]} : vector<256x32xf32> to vector<256x16xf32>
    %37 = vector.extract_strided_slice %35 {offsets = [0, 16], sizes = [256, 16], strides = [1, 1]} : vector<256x32xf32> to vector<256x16xf32>
    %cst_21 = arith.constant dense<0.000000e+00> : vector<256x80xf32>
    %38 = tpu.matmul %36, %31, %cst_21 {dimension_numbers = #tpu.dot_dimension_numbers<[1], [0], [0], [1], [0, 0, 1, 1], [], []>} : vector<256x16xf32>, vector<16x80xf32>, vector<256x80xf32> -> vector<256x80xf32>
    %39 = arith.addf %34, %38 : vector<256x80xf32>
    %cst_22 = arith.constant dense<0.000000e+00> : vector<256x80xf32>
    %40 = tpu.matmul %37, %32, %cst_22 {dimension_numbers = #tpu.dot_dimension_numbers<[1], [0], [0], [1], [0, 0, 1, 1], [], []>} : vector<256x16xf32>, vector<16x80xf32>, vector<256x80xf32> -> vector<256x80xf32>
    %41 = arith.addf %39, %40 : vector<256x80xf32>
    %42 = vector.broadcast %2 : vector<1x80xf32> to vector<256x80xf32>
    %43 = arith.addf %41, %42 : vector<256x80xf32>
    %cst_23 = arith.constant 5.000000e-01 : f32
    %44 = vector.broadcast %cst_23 : f32 to vector<256x80xf32>
    %45 = arith.mulf %44, %43 : vector<256x80xf32>
    %cst_24 = arith.constant 0.707106769 : f32
    %46 = vector.broadcast %cst_24 : f32 to vector<256x80xf32>
    %47 = arith.mulf %43, %46 : vector<256x80xf32>
    %48 = math.absf %47 : vector<256x80xf32>
    %cst_25 = arith.constant 0.327591091 : f32
    %49 = vector.broadcast %cst_25 : f32 to vector<256x80xf32>
    %50 = arith.mulf %49, %48 : vector<256x80xf32>
    %cst_26 = arith.constant 1.000000e+00 : f32
    %51 = vector.broadcast %cst_26 : f32 to vector<256x80xf32>
    %52 = arith.addf %51, %50 : vector<256x80xf32>
    %cst_27 = arith.constant 1.000000e+00 : f32
    %53 = vector.broadcast %cst_27 : f32 to vector<256x80xf32>
    %54 = arith.divf %53, %52 : vector<256x80xf32>
    %cst_28 = arith.constant 1.06140542 : f32
    %55 = vector.broadcast %cst_28 : f32 to vector<256x80xf32>
    %56 = arith.mulf %55, %54 : vector<256x80xf32>
    %cst_29 = arith.constant -1.45315206 : f32
    %57 = vector.broadcast %cst_29 : f32 to vector<256x80xf32>
    %58 = arith.addf %56, %57 : vector<256x80xf32>
    %59 = arith.mulf %58, %54 : vector<256x80xf32>
    %cst_30 = arith.constant 1.42141378 : f32
    %60 = vector.broadcast %cst_30 : f32 to vector<256x80xf32>
    %61 = arith.addf %59, %60 : vector<256x80xf32>
    %62 = arith.mulf %61, %54 : vector<256x80xf32>
    %cst_31 = arith.constant -0.284496725 : f32
    %63 = vector.broadcast %cst_31 : f32 to vector<256x80xf32>
    %64 = arith.addf %62, %63 : vector<256x80xf32>
    %65 = arith.mulf %64, %54 : vector<256x80xf32>
    %cst_32 = arith.constant 0.254829586 : f32
    %66 = vector.broadcast %cst_32 : f32 to vector<256x80xf32>
    %67 = arith.addf %65, %66 : vector<256x80xf32>
    %68 = arith.mulf %67, %54 : vector<256x80xf32>
    %cst_33 = arith.constant 0.000000e+00 : f32
    %69 = vector.broadcast %cst_33 : f32 to vector<256x80xf32>
    %70 = arith.subf %69, %48 : vector<256x80xf32>
    %71 = arith.mulf %70, %48 : vector<256x80xf32>
    %72 = math.exp %71 : vector<256x80xf32>
    %73 = arith.mulf %68, %72 : vector<256x80xf32>
    %cst_34 = arith.constant 1.000000e+00 : f32
    %74 = vector.broadcast %cst_34 : f32 to vector<256x80xf32>
    %75 = arith.subf %74, %73 : vector<256x80xf32>
    %cst_35 = arith.constant 0.000000e+00 : f32
    %76 = vector.broadcast %cst_35 : f32 to vector<256x80xf32>
    %77 = arith.cmpf oge, %47, %76 : vector<256x80xf32>
    %cst_36 = arith.constant 0.000000e+00 : f32
    %78 = vector.broadcast %cst_36 : f32 to vector<256x80xf32>
    %79 = arith.subf %78, %75 : vector<256x80xf32>
    %80 = arith.select %77, %75, %79 : vector<256x80xi1>, vector<256x80xf32>
    %cst_37 = arith.constant 1.000000e+00 : f32
    %81 = vector.broadcast %cst_37 : f32 to vector<256x80xf32>
    %82 = arith.addf %81, %80 : vector<256x80xf32>
    %83 = arith.mulf %45, %82 : vector<256x80xf32>
    %c0_38 = arith.constant 0 : index
    %c0_39 = arith.constant 0 : index
    %84 = vector.load %arg1[%c0_38, %c0_39] : memref<16x16xf32, #tpu.memory_space<vmem>>, vector<16x16xf32>
    %cst_40 = arith.constant 5.000000e-01 : f32
    %85 = vector.broadcast %cst_40 : f32 to vector<16x16xf32>
    %86 = arith.cmpf ogt, %84, %85 : vector<16x16xf32>
    %c0_41 = arith.constant 0 : index
    %c0_42 = arith.constant 0 : index
    %87 = vector.load %arg5[%c0_41, %c0_42] : memref<16x256xf32, #tpu.memory_space<vmem>>, vector<16x256xf32>
    %88 = vector.extract_strided_slice %83 {offsets = [0, 0], sizes = [256, 40], strides = [1, 1]} : vector<256x80xf32> to vector<256x40xf32>
    %89 = vector.extract_strided_slice %3 {offsets = [0, 0], sizes = [1, 40], strides = [1, 1]} : vector<1x80xf32> to vector<1x40xf32>
    %90 = vector.broadcast %89 : vector<1x40xf32> to vector<256x40xf32>
    %91 = arith.mulf %88, %90 : vector<256x40xf32>
    %cst_43 = arith.constant dense<0.000000e+00> : vector<256xf32>
    %92 = vector.multi_reduction <add>, %91, %cst_43 [1] : vector<256x40xf32> to vector<256xf32>
    %93 = vector.shape_cast %92 : vector<256xf32> to vector<256x1xf32>
    %94 = vector.broadcast %93 : vector<256x1xf32> to vector<256x16xf32>
    %95 = arith.mulf %94, %37 : vector<256x16xf32>
    %cst_44 = arith.constant dense<0.000000e+00> : vector<16x16xf32>
    %96 = tpu.matmul %87, %95, %cst_44 {dimension_numbers = #tpu.dot_dimension_numbers<[1], [0], [0], [1], [0, 0, 1, 1], [], []>} : vector<16x256xf32>, vector<256x16xf32>, vector<16x16xf32> -> vector<16x16xf32>
    %97 = vector.extract_strided_slice %4 {offsets = [0, 0], sizes = [1, 1], strides = [1, 1]} : vector<1x2xf32> to vector<1x1xf32>
    %98 = vector.broadcast %97 : vector<1x1xf32> to vector<16x16xf32>
    %99 = arith.addf %96, %98 : vector<16x16xf32>
    %cst_45 = arith.constant 2.000000e-01 : f32
    %100 = vector.broadcast %cst_45 : f32 to vector<16x16xf32>
    %101 = arith.mulf %100, %99 : vector<16x16xf32>
    %102 = arith.maximumf %99, %101 : vector<16x16xf32>
    %cst_46 = arith.constant -9.99999995E+11 : f32
    %103 = vector.broadcast %cst_46 : f32 to vector<16x16xf32>
    %104 = arith.select %86, %102, %103 : vector<16x16xi1>, vector<16x16xf32>
    %cst_47 = arith.constant dense<0xFF800000> : vector<16xf32>
    %105 = vector.multi_reduction <maximumf>, %104, %cst_47 [1] : vector<16x16xf32> to vector<16xf32>
    %106 = vector.shape_cast %105 : vector<16xf32> to vector<16x1xf32>
    %107 = vector.broadcast %106 : vector<16x1xf32> to vector<16x16xf32>
    %108 = arith.subf %104, %107 : vector<16x16xf32>
    %109 = math.exp %108 : vector<16x16xf32>
    %cst_48 = arith.constant dense<0.000000e+00> : vector<16xf32>
    %110 = vector.multi_reduction <add>, %109, %cst_48 [1] : vector<16x16xf32> to vector<16xf32>
    %111 = vector.shape_cast %110 : vector<16xf32> to vector<16x1xf32>
    %112 = vector.extract_strided_slice %27 {offsets = [0, 0], sizes = [16, 16], strides = [1, 1]} : vector<16x32xf32> to vector<16x16xf32>
    %cst_49 = arith.constant dense<0.000000e+00> : vector<16x16xf32>
    %113 = tpu.matmul %109, %112, %cst_49 {dimension_numbers = #tpu.dot_dimension_numbers<[1], [0], [0], [1], [0, 0, 1, 1], [], []>} : vector<16x16xf32>, vector<16x16xf32>, vector<16x16xf32> -> vector<16x16xf32>
    %114 = tpu.reciprocal %111 {approx = true} : vector<16x1xf32> -> vector<16x1xf32>
    %115 = vector.broadcast %114 : vector<16x1xf32> to vector<16x16xf32>
    %116 = arith.mulf %113, %115 : vector<16x16xf32>
    %117 = vector.extract_strided_slice %5 {offsets = [0, 0], sizes = [1, 16], strides = [1, 1]} : vector<1x32xf32> to vector<1x16xf32>
    %118 = vector.extract_strided_slice %6 {offsets = [0, 0], sizes = [1, 16], strides = [1, 1]} : vector<1x32xf32> to vector<1x16xf32>
    %cst_50 = arith.constant dense<0.000000e+00> : vector<16xf32>
    %119 = vector.multi_reduction <add>, %116, %cst_50 [1] : vector<16x16xf32> to vector<16xf32>
    %120 = vector.shape_cast %119 : vector<16xf32> to vector<16x1xf32>
    %cst_51 = arith.constant 1.600000e+01 : f32
    %121 = vector.broadcast %cst_51 : f32 to vector<16x1xf32>
    %122 = arith.divf %120, %121 : vector<16x1xf32>
    %123 = vector.broadcast %122 : vector<16x1xf32> to vector<16x16xf32>
    %124 = arith.subf %116, %123 : vector<16x16xf32>
    %125 = arith.mulf %124, %124 : vector<16x16xf32>
    %cst_52 = arith.constant dense<0.000000e+00> : vector<16xf32>
    %126 = vector.multi_reduction <add>, %125, %cst_52 [1] : vector<16x16xf32> to vector<16xf32>
    %127 = vector.shape_cast %126 : vector<16xf32> to vector<16x1xf32>
    %cst_53 = arith.constant 1.600000e+01 : f32
    %128 = vector.broadcast %cst_53 : f32 to vector<16x1xf32>
    %129 = arith.divf %127, %128 : vector<16x1xf32>
    %cst_54 = arith.constant 9.99999974E-6 : f32
    %130 = vector.broadcast %cst_54 : f32 to vector<16x1xf32>
    %131 = arith.addf %129, %130 : vector<16x1xf32>
    %132 = math.rsqrt %131 : vector<16x1xf32>
    %133 = vector.broadcast %132 : vector<16x1xf32> to vector<16x16xf32>
    %134 = arith.mulf %124, %133 : vector<16x16xf32>
    %135 = vector.broadcast %117 : vector<1x16xf32> to vector<16x16xf32>
    %136 = arith.mulf %134, %135 : vector<16x16xf32>
    %137 = vector.broadcast %118 : vector<1x16xf32> to vector<16x16xf32>
    %138 = arith.addf %136, %137 : vector<16x16xf32>
    %139 = vector.extract_strided_slice %83 {offsets = [0, 40], sizes = [256, 40], strides = [1, 1]} : vector<256x80xf32> to vector<256x40xf32>
    %140 = vector.extract_strided_slice %3 {offsets = [0, 40], sizes = [1, 40], strides = [1, 1]} : vector<1x80xf32> to vector<1x40xf32>
    %141 = vector.broadcast %140 : vector<1x40xf32> to vector<256x40xf32>
    %142 = arith.mulf %139, %141 : vector<256x40xf32>
    %cst_55 = arith.constant dense<0.000000e+00> : vector<256xf32>
    %143 = vector.multi_reduction <add>, %142, %cst_55 [1] : vector<256x40xf32> to vector<256xf32>
    %144 = vector.shape_cast %143 : vector<256xf32> to vector<256x1xf32>
    %145 = vector.broadcast %144 : vector<256x1xf32> to vector<256x16xf32>
    %146 = arith.mulf %145, %37 : vector<256x16xf32>
    %cst_56 = arith.constant dense<0.000000e+00> : vector<16x16xf32>
    %147 = tpu.matmul %87, %146, %cst_56 {dimension_numbers = #tpu.dot_dimension_numbers<[1], [0], [0], [1], [0, 0, 1, 1], [], []>} : vector<16x256xf32>, vector<256x16xf32>, vector<16x16xf32> -> vector<16x16xf32>
    %148 = vector.extract_strided_slice %4 {offsets = [0, 1], sizes = [1, 1], strides = [1, 1]} : vector<1x2xf32> to vector<1x1xf32>
    %149 = vector.broadcast %148 : vector<1x1xf32> to vector<16x16xf32>
    %150 = arith.addf %147, %149 : vector<16x16xf32>
    %cst_57 = arith.constant 2.000000e-01 : f32
    %151 = vector.broadcast %cst_57 : f32 to vector<16x16xf32>
    %152 = arith.mulf %151, %150 : vector<16x16xf32>
    %153 = arith.maximumf %150, %152 : vector<16x16xf32>
    %cst_58 = arith.constant -9.99999995E+11 : f32
    %154 = vector.broadcast %cst_58 : f32 to vector<16x16xf32>
    %155 = arith.select %86, %153, %154 : vector<16x16xi1>, vector<16x16xf32>
    %cst_59 = arith.constant dense<0xFF800000> : vector<16xf32>
    %156 = vector.multi_reduction <maximumf>, %155, %cst_59 [1] : vector<16x16xf32> to vector<16xf32>
    %157 = vector.shape_cast %156 : vector<16xf32> to vector<16x1xf32>
    %158 = vector.broadcast %157 : vector<16x1xf32> to vector<16x16xf32>
    %159 = arith.subf %155, %158 : vector<16x16xf32>
    %160 = math.exp %159 : vector<16x16xf32>
    %cst_60 = arith.constant dense<0.000000e+00> : vector<16xf32>
    %161 = vector.multi_reduction <add>, %160, %cst_60 [1] : vector<16x16xf32> to vector<16xf32>
    %162 = vector.shape_cast %161 : vector<16xf32> to vector<16x1xf32>
    %163 = vector.extract_strided_slice %27 {offsets = [0, 16], sizes = [16, 16], strides = [1, 1]} : vector<16x32xf32> to vector<16x16xf32>
    %cst_61 = arith.constant dense<0.000000e+00> : vector<16x16xf32>
    %164 = tpu.matmul %160, %163, %cst_61 {dimension_numbers = #tpu.dot_dimension_numbers<[1], [0], [0], [1], [0, 0, 1, 1], [], []>} : vector<16x16xf32>, vector<16x16xf32>, vector<16x16xf32> -> vector<16x16xf32>
    %165 = tpu.reciprocal %162 {approx = true} : vector<16x1xf32> -> vector<16x1xf32>
    %166 = vector.broadcast %165 : vector<16x1xf32> to vector<16x16xf32>
    %167 = arith.mulf %164, %166 : vector<16x16xf32>
    %168 = vector.extract_strided_slice %5 {offsets = [0, 16], sizes = [1, 16], strides = [1, 1]} : vector<1x32xf32> to vector<1x16xf32>
    %169 = vector.extract_strided_slice %6 {offsets = [0, 16], sizes = [1, 16], strides = [1, 1]} : vector<1x32xf32> to vector<1x16xf32>
    %cst_62 = arith.constant dense<0.000000e+00> : vector<16xf32>
    %170 = vector.multi_reduction <add>, %167, %cst_62 [1] : vector<16x16xf32> to vector<16xf32>
    %171 = vector.shape_cast %170 : vector<16xf32> to vector<16x1xf32>
    %cst_63 = arith.constant 1.600000e+01 : f32
    %172 = vector.broadcast %cst_63 : f32 to vector<16x1xf32>
    %173 = arith.divf %171, %172 : vector<16x1xf32>
    %174 = vector.broadcast %173 : vector<16x1xf32> to vector<16x16xf32>
    %175 = arith.subf %167, %174 : vector<16x16xf32>
    %176 = arith.mulf %175, %175 : vector<16x16xf32>
    %cst_64 = arith.constant dense<0.000000e+00> : vector<16xf32>
    %177 = vector.multi_reduction <add>, %176, %cst_64 [1] : vector<16x16xf32> to vector<16xf32>
    %178 = vector.shape_cast %177 : vector<16xf32> to vector<16x1xf32>
    %cst_65 = arith.constant 1.600000e+01 : f32
    %179 = vector.broadcast %cst_65 : f32 to vector<16x1xf32>
    %180 = arith.divf %178, %179 : vector<16x1xf32>
    %cst_66 = arith.constant 9.99999974E-6 : f32
    %181 = vector.broadcast %cst_66 : f32 to vector<16x1xf32>
    %182 = arith.addf %180, %181 : vector<16x1xf32>
    %183 = math.rsqrt %182 : vector<16x1xf32>
    %184 = vector.broadcast %183 : vector<16x1xf32> to vector<16x16xf32>
    %185 = arith.mulf %175, %184 : vector<16x16xf32>
    %186 = vector.broadcast %168 : vector<1x16xf32> to vector<16x16xf32>
    %187 = arith.mulf %185, %186 : vector<16x16xf32>
    %188 = vector.broadcast %169 : vector<1x16xf32> to vector<16x16xf32>
    %189 = arith.addf %187, %188 : vector<16x16xf32>
    %190 = tpu.concatenate %138, %189 in 1 : vector<16x16xf32>, vector<16x16xf32> -> vector<16x32xf32>
    %c0_67 = arith.constant 0 : index
    %c0_68 = arith.constant 0 : index
    %191 = vector.load %arg9[%c0_67, %c0_68] : memref<16x32xf32, #tpu.memory_space<vmem>>, vector<16x32xf32>
    tpu.vector_store %arg9[%c0_67, %c0_68], %190 {strides = array<i32>} : memref<16x32xf32, #tpu.memory_space<vmem>>, vector<16x32xf32>,
    return
  }
  func.func @transform_0(%arg0: i32) -> (i32, i32) {
    %c0_i32 = arith.constant 0 : i32
    %c0_i32_0 = arith.constant 0 : i32
    %c0_i32_1 = arith.constant 0 : i32
    return %c0_i32, %c0_i32_0 : i32, i32
  }
  func.func @transform_1(%arg0: i32) -> (i32, i32) {
    %c0_i32 = arith.constant 0 : i32
    %c0_i32_0 = arith.constant 0 : i32
    %c0_i32_1 = arith.constant 0 : i32
    return %c0_i32, %c0_i32_0 : i32, i32
  }
  func.func @transform_2(%arg0: i32) -> (i32, i32) {
    %c0_i32 = arith.constant 0 : i32
    %c0_i32_0 = arith.constant 0 : i32
    %c0_i32_1 = arith.constant 0 : i32
    return %c0_i32, %c0_i32_0 : i32, i32
  }
  func.func @transform_3(%arg0: i32) -> (i32, i32) {
    %c0_i32 = arith.constant 0 : i32
    %c0_i32_0 = arith.constant 0 : i32
    %c0_i32_1 = arith.constant 0 : i32
    return %c0_i32, %c0_i32_0 : i32, i32
  }
  func.func @transform_4(%arg0: i32) -> (i32, i32) {
    %c0_i32 = arith.constant 0 : i32
    %c0_i32_0 = arith.constant 0 : i32
    %c0_i32_1 = arith.constant 0 : i32
    return %c0_i32, %c0_i32_0 : i32, i32
  }
  func.func @transform_5(%arg0: i32) -> (i32, i32) {
    %c0_i32 = arith.constant 0 : i32
    %c0_i32_0 = arith.constant 0 : i32
    %c0_i32_1 = arith.constant 0 : i32
    return %c0_i32, %c0_i32_0 : i32, i32
  }
  func.func @transform_6(%arg0: i32) -> (i32, i32) {
    %c0_i32 = arith.constant 0 : i32
    %c0_i32_0 = arith.constant 0 : i32
    %c0_i32_1 = arith.constant 0 : i32
    return %c0_i32, %c0_i32_0 : i32, i32
  }
  func.func @transform_7(%arg0: i32) -> (i32, i32) {
    %c0_i32 = arith.constant 0 : i32
    %c0_i32_0 = arith.constant 0 : i32
    %c0_i32_1 = arith.constant 0 : i32
    return %c0_i32, %c0_i32_0 : i32, i32
  }
  func.func @transform_8(%arg0: i32) -> (i32, i32) {
    %c0_i32 = arith.constant 0 : i32
    %c0_i32_0 = arith.constant 0 : i32
    %c0_i32_1 = arith.constant 0 : i32
    return %c0_i32, %c0_i32_0 : i32, i32
  }
}

</mosaic_0001>

<bundles_post_ra>
// kernel: tpu_custom_call.1
= control target key start
LH: loop header
LB: loop body
LE: loop exit
PB: predicated region body
PF: predicated region fallthrough
CT: control target
= control target key end

     0   :  { %vm33_vm0 = vcmask 261120   ;;  %s6441_s0 = inlined_call_operand.vmem [shape: f32[16,16], index: 0, kind: input, shape index: {}]   ;;  %s6442_s1 = inlined_call_operand.vmem [shape: f32[16,32], index: 1, kind: input, shape index: {}]   ;;  %s6443_s2 = inlined_call_operand.vmem [shape: f32[256,8], index: 2, kind: input, shape index: {}]   ;;  %s6444_s3 = inlined_call_operand.vmem [shape: f32[256,32], index: 3, kind: input, shape index: {}]   ;;  %s6445_s4 = inlined_call_operand.vmem [shape: f32[16,256], index: 4, kind: input, shape index: {}]   ;;  %s6446_s5 = inlined_call_operand.vmem [shape: f32[32,32], index: 5, kind: input, shape index: {}]   ;;  %s6447_s6 = inlined_call_operand.vmem [shape: f32[72,80], index: 6, kind: input, shape index: {}]   ;;  %s6448_s7 = inlined_call_operand.vmem [shape: f32[8,128], index: 7, kind: input, shape index: {}]   ;;  %s6449_s8 = inlined_call_operand.hbm [shape: f32[16,32], index: 8, kind: output, shape index: {}]  }
   0x1   :  { %v31_v0 = vld [vmem:[%s6442_s1] sm:$0xff]  ;;  %v32_v1 = vld [vmem:[%s6442_s1 + $0x8] sm:$0xff] }
   0x2   :  { %13 = vsyncpa [#allocation3], 0  ;;  %v34_v2 = vsel %vm33_vm0, %v31_v0, 0.0  ;;  %v37_v3 = vsel %vm33_vm0, %v32_v1, 0.0  ;;  %v64_v14 = vld [vmem:[%s6446_s5 + $0x18] sm:$0xff]  ;;  %v63_v15 = vld [vmem:[%s6446_s5 + $0x10] sm:$0xff]  ;;  %v65_v60 = vlaneseq }
   0x3   :  { %35 = vadd.xlane.f32.xlu0 %v34_v2  ;;  %3791 = vmatprep.subr.mxu0 %v64_v14  ;;  %v62_v16 = vld [vmem:[%s6446_s5 + $0x8] sm:$0xff]  ;;  %v61_v17 = vld [vmem:[%s6446_s5] sm:$0xff]  ;;  %v153_v18 = vld [vmem:[%s6447_s6 + $0x18] sm:$0xff]  ;;  %s4214_s12 = smov 112   ;;  %vm379_vm1 = vcmask 130048   ;;  %vm701_vm2 = vcmask 64512  }
   0x4   :  { %3792 = vmatpush3.msra.mxu0 %v64_v14  ;;  %v157_v19 = vld [vmem:[%s6447_s6 + $0x38] sm:$0xff]  ;;  %3802 = vmatprep.subr.mxu1 %v153_v18  ;;  %v152_v30 = vld [vmem:[%s6447_s6 + $0x10] sm:$0xff]  ;;  %v151_v32 = vld [vmem:[%s6447_s6 + $0x8] sm:$0xff]  ;;  %v4482_v61 = vshrl.u32 %v65_v60, 7  ;;  %vm2352_vm7 = vcmask 326656   ;;  %s4215_s14 = smov 88  }
   0x5   :  { %3793 = vmatprep.subr.mxu0 %v63_v15  ;;  %3803 = vmatpush3.msra.mxu1 %v153_v18  ;;  %v156_v31 = vld [vmem:[%s6447_s6 + $0x30] sm:$0xff]  ;;  %v155_v33 = vld [vmem:[%s6447_s6 + $0x28] sm:$0xff]  ;;  %v150_v34 = vld [vmem:[%s6447_s6] sm:$0xff] }
   0x6   :  { %3794 = vmatpush3.msra.mxu0 %v63_v15  ;;  %3804 = vmatprep.subr.mxu1 %v152_v30  ;;  %v154_v35 = vld [vmem:[%s6447_s6 + $0x20] sm:$0xff]  ;;  %v4317_v36 = vld [vmem:[%s6444_s3 + $0x8] sm:$0xff]  ;;  %v4331_v38 = vld [vmem:[%s6444_s3 + $0x10] sm:$0xff]  ;;  %6527 = vst [vmem:[#allocation5_spill] sm:$0xff] %v4482_v61  ;;  %v67_v62 = vsub.s32 0, %v4482_v61 }
   0x7   :  { %38 = vadd.xlane.f32.xlu0 %v37_v3  ;;  %3795 = vmatprep.subr.mxu0 %v62_v16  ;;  %v4322_v37 = vld [vmem:[%s6444_s3] sm:$0xff]  ;;  %v4345_v40 = vld [vmem:[%s6444_s3 + $0x18] sm:$0xff]  ;;  %v4350_v41 = vld [vmem:[%s6444_s3 + $0x30] sm:$0xff] }
   0x8   :  { %3796 = vmatpush3.msra.mxu0 %v62_v16  ;;  %3805 = vmatpush3.msra.mxu1 %v152_v30  ;;  %v4336_v39 = vld [vmem:[%s6444_s3 + $0x20] sm:$0xff]  ;;  %v4359_v42 = vld [vmem:[%s6444_s3 + $0x28] sm:$0xff]  ;;  %v4373_v44 = vld [vmem:[%s6444_s3 + $0x38] sm:$0xff] }
   0x9   :  { %3797 = vmatprep.subr.mxu0 %v61_v17  ;;  %3806 = vmatprep.subr.mxu1 %v151_v32  ;;  %v4364_v43 = vld [vmem:[%s6444_s3 + $0x40] sm:$0xff]  ;;  %v4378_v45 = vld [vmem:[%s6444_s3 + $0x50] sm:$0xff]  ;;  %v4387_v46 = vld [vmem:[%s6444_s3 + $0x48] sm:$0xff] }
   0xa   :  { %3798 = vmatpush3.msra.mxu0 %v61_v17  ;;  %3807 = vmatpush3.msra.mxu1 %v151_v32  ;;  %v4392_v47 = vld [vmem:[%s6444_s3 + $0x60] sm:$0xff]  ;;  %v4401_v48 = vld [vmem:[%s6444_s3 + $0x58] sm:$0xff]  ;;  %v4406_v49 = vld [vmem:[%s6444_s3 + $0x70] sm:$0xff] }
   0xb   :  { %3813 = vmatprep.subr.mxu0 %v157_v19  ;;  %3808 = vmatprep.subr.mxu1 %v150_v34  ;;  %v4415_v50 = vld [vmem:[%s6444_s3 + $0x68] sm:$0xff]  ;;  %v4420_v51 = vld [vmem:[%s6444_s3 + $0x80] sm:$0xff]  ;;  %v4429_v52 = vld [vmem:[%s6444_s3 + $0x78] sm:$0xff] }
   0xc   :  { %3809 = vmatpush3.msra.mxu1 %v150_v34  ;;  %v4434_v53 = vld [vmem:[%s6444_s3 + $0x90] sm:$0xff]  ;;  %v4443_v54 = vld [vmem:[%s6444_s3 + $0x88] sm:$0xff]  ;;  %v4448_v55 = vld [vmem:[%s6444_s3 + $0xa0] sm:$0xff] }
   0xd   :  { %v4457_v56 = vld [vmem:[%s6444_s3 + $0x98] sm:$0xff]  ;;  %v4462_v57 = vld [vmem:[%s6444_s3 + $0xb0] sm:$0xff]  ;;  %v4471_v58 = vld [vmem:[%s6444_s3 + $0xa8] sm:$0xff] }
   0xe   :  { %v4478_v59 = vld [vmem:[%s6444_s3 + $0xb8] sm:$0xff]  ;;  %v4488_v63 = vld [vmem:[%s6448_s7] sm:$0xff]  ;;  %v4561_v15 = vld [vmem:[%s6444_s3 + $0xe8] sm:$0xff] }
   0xf   :  { %v318_v14 = vld [vmem:[%s6443_s2 + $0x18] sm:$0xff]  ;;  %v319_v16 = vld [vmem:[%s6443_s2 + $0x20] sm:$0xff]  ;;  %v4572_v17 = vld [vmem:[%s6444_s3 + $0xf0] sm:$0xff] }
  0x10   :  { %v320_v18 = vld [vmem:[%s6443_s2 + $0x28] sm:$0xff]  ;;  %v331_v30 = vld [vmem:[%s6443_s2 + $0x80] sm:$0xff]  ;;  %v333_v32 = vld [vmem:[%s6443_s2 + $0x90] sm:$0xff] }
  0x11   :  { %v335_v34 = vld [vmem:[%s6443_s2 + $0xa0] sm:$0xff]  ;;  %v338_v60 = vld [vmem:[%s6443_s2 + $0xb8] sm:$0xff] }
  0x1d   :  { %1023 = vrot.lane.b32.xlu0 %v4322_v37, %s4214_s12 }
  0x21   :  { %1031 = vrot.lane.b32.xlu0 %v4336_v39, %s4214_s12 }
  0x25   :  { %1035 = vrot.lane.b32.xlu0 %v4350_v41, %s4214_s12 }
  0x29   :  { %1039 = vrot.lane.b32.xlu0 %v4364_v43, %s4214_s12 }
  0x2d   :  { %1043 = vrot.lane.b32.xlu0 %v4378_v45, %s4214_s12 }
  0x31   :  { %1047 = vrot.lane.b32.xlu0 %v4392_v47, %s4214_s12 }
  0x35   :  { %1051 = vrot.lane.b32.xlu0 %v4406_v49, %s4214_s12 }
  0x39   :  { %1055 = vrot.lane.b32.xlu0 %v4420_v51, %s4214_s12 }
  0x3d   :  { %1059 = vrot.lane.b32.xlu0 %v4434_v53, %s4214_s12 }
  0x41   :  { %1063 = vrot.lane.b32.xlu0 %v4448_v55, %s4214_s12 }
  0x45   :  { %1067 = vrot.lane.b32.xlu0 %v4462_v57, %s4214_s12 }
  0x8c   :  { %v36_v4 = vpop.xlane.xlu0 %35 }
  0x8d   :  { %v41_v5 = vmul.f32 0.03125, %v36_v4 }
  0x8f   :  { %v43_v6 = vsub.f32 %v31_v0, %v41_v5  ;;  %v68_v0 = vrot.slane %v4488_v63, %v67_v62  ;;  %v4506_v5 = vld [vmem:[%s6444_s3 + $0xc0] sm:$0xff] }
  0x90   :  { %v39_v7 = vpop.xlane.xlu0 %38  ;;  %1071 = vrot.lane.b32.xlu0 %v4506_v5, %s4214_s12  ;;  %v339_v62 = vld [vmem:[%s6443_s2 + $0xc0] sm:$0xff] }
  0x91   :  { %v42_v8 = vmul.f32 0.03125, %v39_v7  ;;  %v45_v9 = vmul.f32 %v43_v6, %v43_v6  ;;  %v158_v7 = vld [vmem:[%s6447_s6 + $0x40] sm:$0xff]  ;;  %s4218_s6 = smov [#allocation2]  }
  0x92   :  { %s3471_s24 = sshll.u32 %s4218_s6, 4  ;;  %s3472_s24 = int_to_ptr.vmem [resolvable:$true] %s3471_s24 }
  0x93   :  { %v44_v10 = vsub.f32 %v32_v1, %v42_v8  ;;  %v47_v11 = vsel %vm33_vm0, %v45_v9, 0.0  ;;  %v315_v8 = vld [vmem:[%s6443_s2] sm:$0xff]  ;;  %v4528_v9 = vld [vmem:[%s6444_s3 + $0xd0] sm:$0xff]  ;;  %s4192_s25 = scalar_lea.vmem %s3472_s24, 256  ;;  %p4197_p1 = scmp.lt.s32.totalorder %s3472_s24, %s3472_s24 }
  0x94   :  { %48 = vadd.xlane.f32.xlu1 %v47_v11  ;;  %1075 = vrot.lane.b32.xlu0 %v4528_v9, %s4214_s12  ;;  %v4539_v11 = vld [vmem:[%s6444_s3 + $0xd8] sm:$0xff]  ;;  %p4193_p0 = scmp.ne.s32.totalorder %s3472_s24, %s4192_s25  ;;  %p4198_p2 = scmp.lt.s32.totalorder %s4192_s25, %s4192_s25 }
  0x95   :  { %v46_v12 = vmul.f32 %v44_v10, %v44_v10 }
  0x96   :  { %p4199_p3 = por %p4198_p2, %p4197_p1 }
  0x97   :  { %v50_v13 = vsel %vm33_vm0, %v46_v12, 0.0  ;;  %v317_v12 = vld [vmem:[%s6443_s2 + $0x10] sm:$0xff] }
  0x98   :  { %51 = vadd.xlane.f32.xlu1 %v50_v13  ;;  %v4551_v13 = vld [vmem:[%s6444_s3 + $0xe0] sm:$0xff]  ;;  %p4200_p4 = pnand %p4199_p3, %p4193_p0 }
  0x99   :  { %1079 = vrot.lane.b32.xlu0 %v4551_v13, %s4214_s12 }
  0x9d   :  { %1083 = vrot.lane.b32.xlu0 %v4572_v17, %s4214_s12 }
  0xa9   :  { %1025 = vrot.lane.b32.xlu1 %v4317_v36, %s4214_s12 }
  0xad   :  { %1027 = vrot.lane.b32.xlu1 %v4331_v38, %s4214_s12 }
  0xb1   :  { %1029 = vrot.lane.b32.xlu1 %v4345_v40, %s4214_s12 }
  0xb5   :  { %1033 = vrot.lane.b32.xlu1 %v4359_v42, %s4214_s12 }
  0xb9   :  { %1037 = vrot.lane.b32.xlu1 %v4373_v44, %s4214_s12 }
  0xbd   :  { %1041 = vrot.lane.b32.xlu1 %v4387_v46, %s4214_s12 }
  0xc1   :  { %1045 = vrot.lane.b32.xlu1 %v4401_v48, %s4214_s12 }
  0xc5   :  { %1049 = vrot.lane.b32.xlu1 %v4415_v50, %s4214_s12 }
  0xc9   :  { %1053 = vrot.lane.b32.xlu1 %v4429_v52, %s4214_s12 }
  0xcd   :  { %1057 = vrot.lane.b32.xlu1 %v4443_v54, %s4214_s12 }
  0xd1   :  { %1061 = vrot.lane.b32.xlu1 %v4457_v56, %s4214_s12 }
  0xd5   :  { %1065 = vrot.lane.b32.xlu1 %v4471_v58, %s4214_s12 }
  0xd9   :  { %1069 = vrot.lane.b32.xlu1 %v4478_v59, %s4214_s12 }
 0x11d   :  { %v49_v20 = vpop.xlane.xlu1 %48 }
 0x11e   :  { %v53_v21 = vmul.f32 0.03125, %v49_v20  ;;  %v321_v20 = vld [vmem:[%s6443_s2 + $0x30] sm:$0xff] }
 0x120   :  { %v55_v22 = vadd.f32 1e-05, %v53_v21  ;;  %v322_v21 = vld [vmem:[%s6443_s2 + $0x38] sm:$0xff] }
 0x121   :  { %v52_v23 = vpop.xlane.xlu1 %51 }
 0x122   :  { %4003 = vrsqrt.f32 %v55_v22  ;;  %v54_v24 = vmul.f32 0.03125, %v52_v23  ;;  %v323_v22 = vld [vmem:[%s6443_s2 + $0x40] sm:$0xff]  ;;  %v324_v23 = vld [vmem:[%s6443_s2 + $0x48] sm:$0xff] }
 0x124   :  { %v56_v25 = vadd.f32 1e-05, %v54_v24  ;;  %v325_v24 = vld [vmem:[%s6443_s2 + $0x50] sm:$0xff] }
 0x126   :  { %4005 = vrsqrt.f32 %v56_v25  ;;  %v326_v25 = vld [vmem:[%s6443_s2 + $0x58] sm:$0xff] }
 0x12f   :  { %v4004_v26 = vpop.eup %4003 }
 0x130   :  { %v59_v27 = vmul.f32 %v4004_v26, %v43_v6  ;;  %v4513_v6 = vld [vmem:[%s6444_s3 + $0xc8] sm:$0xff]  ;;  %v327_v26 = vld [vmem:[%s6443_s2 + $0x60] sm:$0xff] }
 0x131   :  { %1073 = vrot.lane.b32.xlu1 %v4513_v6, %s4214_s12 }
 0x132   :  { %3799 = vmatprep.mubr.msk.f32.mxu0 %vm33_vm0, %v59_v27  ;;  %v328_v27 = vld [vmem:[%s6443_s2 + $0x68] sm:$0xff] }
 0x133   :  { %v4006_v28 = vpop.eup %4005 }
 0x134   :  { %v60_v29 = vmul.f32 %v4006_v28, %v44_v10  ;;  %v316_v10 = vld [vmem:[%s6443_s2 + $0x8] sm:$0xff]  ;;  %v329_v28 = vld [vmem:[%s6443_s2 + $0x70] sm:$0xff] }
 0x135   :  { %1077 = vrot.lane.b32.xlu1 %v4539_v11, %s4214_s12 }
 0x136   :  { %3800 = vmatmul.mubr.msk.f32.vlgmr.msra.gmra.mxu0 %vm33_vm0, %v60_v29  ;;  %v330_v29 = vld [vmem:[%s6443_s2 + $0x78] sm:$0xff] }
 0x137   :  { %3814 = vmatpush3.msra.mxu0 %v157_v19  ;;  %v4583_v19 = vld [vmem:[%s6444_s3 + $0xf8] sm:$0xff] }
 0x138   :  { %3815 = vmatprep.subr.mxu0 %v156_v31 }
 0x139   :  { %3816 = vmatpush3.msra.mxu0 %v156_v31  ;;  %1081 = vrot.lane.b32.xlu1 %v4561_v15, %s4214_s12  ;;  %v332_v31 = vld [vmem:[%s6443_s2 + $0x88] sm:$0xff] }
 0x13a   :  { %3817 = vmatprep.subr.mxu0 %v155_v33 }
 0x13b   :  { %3818 = vmatpush3.msra.mxu0 %v155_v33  ;;  %v334_v33 = vld [vmem:[%s6443_s2 + $0x98] sm:$0xff] }
 0x13c   :  { %3819 = vmatprep.subr.mxu0 %v154_v35 }
 0x13d   :  { %3820 = vmatpush3.msra.mxu0 %v154_v35  ;;  %1085 = vrot.lane.b32.xlu1 %v4583_v19, %s4214_s12  ;;  %v336_v35 = vld [vmem:[%s6443_s2 + $0xa8] sm:$0xff] }
 0x13e   :  { %3876 = vmatprep.subr.mxu0 %v158_v7 }
 0x1f6   :  { %v3801_v1 = vpop.f32.mrf.mxu0 }
 0x1f7   :  { %v4493_v4 = vadd.f32 %v3801_v1, %v68_v0  ;;  %v341_v1 = vld [vmem:[%s6443_s2 + $0xd0] sm:$0xff] }
 0x1f8   :  { %v141_v2 = vpop.f32.mrf.mxu0 }
 0x1f9   :  { %v4491_v3 = vadd.f32 %v141_v2, %v68_v0  ;;  %6529 = vst [vmem:[#allocation7_spill] sm:$0xff] %v4493_v4  ;;  %v340_v0 = vld [vmem:[%s6443_s2 + $0xc8] sm:$0xff]  ;;  %v342_v2 = vld [vmem:[%s6443_s2 + $0xd8] sm:$0xff] }
 0x1fb   :  { %6528 = vst [vmem:[#allocation6_spill] sm:$0xff] %v4491_v3  ;;  %3810 = vmatprep.mubr.msk.f32.mxu1 %vm33_vm0, %v4491_v3  ;;  %3821 = vmatprep.mubr.msk.f32.mxu0 %vm33_vm0, %v4491_v3 }
 0x1fc   :  { %3811 = vmatmul.mubr.msk.f32.vlgmr.msra.gmra.mxu1 %vm33_vm0, %v4493_v4  ;;  %3822 = vmatmul.mubr.msk.f32.vlgmr.msra.gmra.mxu0 %vm33_vm0, %v4493_v4 }
 0x1fd   :  { %3828 = vmatprep.mubr.msk.f32.mxu1 %vm379_vm1, %v4322_v37  ;;  %3877 = vmatpush3.msra.mxu0 %v158_v7  ;;  %v337_v37 = vld [vmem:[%s6443_s2 + $0xb0] sm:$0xff]  ;;  %v343_v7 = vld [vmem:[%s6443_s2 + $0xe0] sm:$0xff] }
 0x1fe   :  { %3878 = vmatprep.mubr.msk.f32.mxu0 %vm701_vm2, %v315_v8  ;;  %v344_v8 = vld [vmem:[%s6443_s2 + $0xe8] sm:$0xff] }
 0x200   :  { %3879 = vmatmul.mubr.msk.f32.vlgmr.msra.gmra.mxu0 %vm701_vm2, %v316_v10  ;;  %v345_v10 = vld [vmem:[%s6443_s2 + $0xf0] sm:$0xff] }
 0x201   :  { %3881 = vmatprep.mubr.msk.f32.mxu0 %vm701_vm2, %v317_v12  ;;  %v346_v12 = vld [vmem:[%s6443_s2 + $0xf8] sm:$0xff] }
 0x204   :  { %3882 = vmatmul.mubr.msk.f32.gmra.mxu0 %vm701_vm2, %v318_v14 }
 0x205   :  { %3884 = vmatprep.mubr.msk.f32.mxu0 %vm701_vm2, %v319_v16 }
 0x208   :  { %3885 = vmatmul.mubr.msk.f32.gmra.mxu0 %vm701_vm2, %v320_v18 }
 0x209   :  { %3887 = vmatprep.mubr.msk.f32.mxu0 %vm701_vm2, %v321_v20 }
 0x20c   :  { %3888 = vmatmul.mubr.msk.f32.gmra.mxu0 %vm701_vm2, %v322_v21 }
 0x20d   :  { %3890 = vmatprep.mubr.msk.f32.mxu0 %vm701_vm2, %v323_v22 }
 0x210   :  { %3891 = vmatmul.mubr.msk.f32.gmra.mxu0 %vm701_vm2, %v324_v23 }
 0x211   :  { %3893 = vmatprep.mubr.msk.f32.mxu0 %vm701_vm2, %v325_v24 }
 0x214   :  { %3894 = vmatmul.mubr.msk.f32.gmra.mxu0 %vm701_vm2, %v326_v25 }
 0x215   :  { %3896 = vmatprep.mubr.msk.f32.mxu0 %vm701_vm2, %v327_v26 }
 0x218   :  { %3897 = vmatmul.mubr.msk.f32.gmra.mxu0 %vm701_vm2, %v328_v27 }
 0x219   :  { %3899 = vmatprep.mubr.msk.f32.mxu0 %vm701_vm2, %v329_v28 }
 0x21c   :  { %3900 = vmatmul.mubr.msk.f32.gmra.mxu0 %vm701_vm2, %v330_v29 }
 0x21d   :  { %3902 = vmatprep.mubr.msk.f32.mxu0 %vm701_vm2, %v331_v30 }
 0x220   :  { %3903 = vmatmul.mubr.msk.f32.gmra.mxu0 %vm701_vm2, %v332_v31 }
 0x221   :  { %3905 = vmatprep.mubr.msk.f32.mxu0 %vm701_vm2, %v333_v32 }
 0x224   :  { %3906 = vmatmul.mubr.msk.f32.gmra.mxu0 %vm701_vm2, %v334_v33 }
 0x225   :  { %3908 = vmatprep.mubr.msk.f32.mxu0 %vm701_vm2, %v335_v34 }
 0x228   :  { %3909 = vmatmul.mubr.msk.f32.gmra.mxu0 %vm701_vm2, %v336_v35 }
 0x229   :  { %3911 = vmatprep.mubr.msk.f32.mxu0 %vm701_vm2, %v337_v37 }
 0x22c   :  { %3912 = vmatmul.mubr.msk.f32.gmra.mxu0 %vm701_vm2, %v338_v60 }
 0x22d   :  { %3914 = vmatprep.mubr.msk.f32.mxu0 %vm701_vm2, %v339_v62 }
 0x230   :  { %3915 = vmatmul.mubr.msk.f32.gmra.mxu0 %vm701_vm2, %v340_v0 }
 0x231   :  { %3917 = vmatprep.mubr.msk.f32.mxu0 %vm701_vm2, %v341_v1 }
 0x234   :  { %3918 = vmatmul.mubr.msk.f32.gmra.mxu0 %vm701_vm2, %v342_v2 }
 0x235   :  { %3920 = vmatprep.mubr.msk.f32.mxu0 %vm701_vm2, %v343_v7 }
 0x238   :  { %3921 = vmatmul.mubr.msk.f32.gmra.mxu0 %vm701_vm2, %v344_v8 }
 0x239   :  { %3923 = vmatprep.mubr.msk.f32.mxu0 %vm701_vm2, %v345_v10 }
 0x23c   :  { %3924 = vmatmul.mubr.msk.f32.gmra.mxu0 %vm701_vm2, %v346_v12 }
 0x2bc   :  { %v3812_v14 = vpop.f32.mrf.mxu1  ;;  %v3823_v16 = vpop.f32.mrf.mxu0 }
 0x2bd   :  { %3824 = vmatprep.subr.mxu1 %v3812_v14 }
 0x2be   :  { %v231_v18 = vpop.f32.mrf.mxu1  ;;  %3825 = vmatpush3.msra.mxu1 %v3812_v14  ;;  %v306_v20 = vpop.f32.mrf.mxu0 }
 0x2bf   :  { %3826 = vmatprep.subr.mxu1 %v231_v18 }
 0x2c0   :  { %3827 = vmatpush3.msra.mxu1 %v231_v18  ;;  %v3880_v22 = vpop.f32.mrf.mxu0 }
 0x2c1   :  { %3829 = vmatmul.mubr.msk.f32.vlgmr.msra.gmra.mxu1 %vm379_vm1, %v4317_v36  ;;  %3926 = vmatprep.subr.mxu1 %v3823_v16  ;;  %v1026_v36 = vpop.permute.xlu1 %1025 }
 0x2c2   :  { %3927 = vmatpush3.msra.mxu1 %v3823_v16  ;;  %3831 = vmatprep.mubr.msk.f32.mxu1 %vm379_vm1, %v4331_v38  ;;  %v864_v23 = vpop.f32.mrf.mxu0 }
 0x2c3   :  { %3928 = vmatprep.subr.mxu1 %v306_v20 }
 0x2c4   :  { %3929 = vmatpush3.msra.mxu1 %v306_v20  ;;  %v3883_v24 = vpop.f32.mrf.mxu0 }
 0x2c5   :  { %3832 = vmatmul.mubr.msk.f32.gmra.mxu1 %vm379_vm1, %v4345_v40  ;;  %v1028_v38 = vpop.permute.xlu1 %1027 }
 0x2c6   :  { %3834 = vmatprep.mubr.msk.f32.mxu1 %vm379_vm1, %v4336_v39  ;;  %v1024_v39 = vpop.permute.xlu0 %1023  ;;  %v4786_v25 = vpop.f32.mrf.mxu0 }
 0x2c8   :  { %v4788_v26 = vpop.f32.mrf.mxu0 }
 0x2c9   :  { %3835 = vmatmul.mubr.msk.f32.gmra.mxu1 %vm379_vm1, %v4359_v42  ;;  %v1030_v40 = vpop.permute.xlu1 %1029 }
 0x2ca   :  { %3837 = vmatprep.mubr.msk.f32.mxu1 %vm379_vm1, %v4350_v41  ;;  %v1032_v41 = vpop.permute.xlu0 %1031  ;;  %v4790_v27 = vpop.f32.mrf.mxu0 }
 0x2cc   :  { %v4792_v28 = vpop.f32.mrf.mxu0 }
 0x2cd   :  { %3838 = vmatmul.mubr.msk.f32.gmra.mxu1 %vm379_vm1, %v4373_v44  ;;  %v1034_v42 = vpop.permute.xlu1 %1033 }
 0x2ce   :  { %3840 = vmatprep.mubr.msk.f32.mxu1 %vm379_vm1, %v4364_v43  ;;  %v1036_v43 = vpop.permute.xlu0 %1035  ;;  %v4794_v29 = vpop.f32.mrf.mxu0 }
 0x2d0   :  { %v4796_v30 = vpop.f32.mrf.mxu0 }
 0x2d1   :  { %3841 = vmatmul.mubr.msk.f32.gmra.mxu1 %vm379_vm1, %v4387_v46  ;;  %v1038_v44 = vpop.permute.xlu1 %1037 }
 0x2d2   :  { %3843 = vmatprep.mubr.msk.f32.mxu1 %vm379_vm1, %v4378_v45  ;;  %v1040_v45 = vpop.permute.xlu0 %1039  ;;  %v4798_v33 = vpop.f32.mrf.mxu0 }
 0x2d4   :  { %v4800_v37 = vpop.f32.mrf.mxu0 }
 0x2d5   :  { %3844 = vmatmul.mubr.msk.f32.gmra.mxu1 %vm379_vm1, %v4401_v48  ;;  %v1042_v46 = vpop.permute.xlu1 %1041 }
 0x2d6   :  { %3846 = vmatprep.mubr.msk.f32.mxu1 %vm379_vm1, %v4392_v47  ;;  %v1044_v47 = vpop.permute.xlu0 %1043  ;;  %v4806_v0 = vpop.f32.mrf.mxu0 }
 0x2d8   :  { %v4812_v7 = vpop.f32.mrf.mxu0 }
 0x2d9   :  { %3847 = vmatmul.mubr.msk.f32.gmra.mxu1 %vm379_vm1, %v4415_v50  ;;  %v1046_v48 = vpop.permute.xlu1 %1045 }
 0x2da   :  { %3849 = vmatprep.mubr.msk.f32.mxu1 %vm379_vm1, %v4406_v49  ;;  %v1048_v49 = vpop.permute.xlu0 %1047  ;;  %v4818_v12 = vpop.f32.mrf.mxu0 }
 0x2dc   :  { %v4824_v18 = vpop.f32.mrf.mxu0 }
 0x2dd   :  { %3850 = vmatmul.mubr.msk.f32.gmra.mxu1 %vm379_vm1, %v4429_v52  ;;  %v1050_v50 = vpop.permute.xlu1 %1049 }
 0x2de   :  { %3852 = vmatprep.mubr.msk.f32.mxu1 %vm379_vm1, %v4420_v51  ;;  %v1052_v51 = vpop.permute.xlu0 %1051 }
 0x2e1   :  { %3853 = vmatmul.mubr.msk.f32.gmra.mxu1 %vm379_vm1, %v4443_v54  ;;  %v1054_v52 = vpop.permute.xlu1 %1053 }
 0x2e2   :  { %3855 = vmatprep.mubr.msk.f32.mxu1 %vm379_vm1, %v4434_v53  ;;  %v1056_v53 = vpop.permute.xlu0 %1055 }
 0x2e5   :  { %3856 = vmatmul.mubr.msk.f32.gmra.mxu1 %vm379_vm1, %v4457_v56  ;;  %v1058_v54 = vpop.permute.xlu1 %1057 }
 0x2e6   :  { %3858 = vmatprep.mubr.msk.f32.mxu1 %vm379_vm1, %v4448_v55  ;;  %v1060_v55 = vpop.permute.xlu0 %1059 }
 0x2e9   :  { %3859 = vmatmul.mubr.msk.f32.gmra.mxu1 %vm379_vm1, %v4471_v58  ;;  %v1062_v56 = vpop.permute.xlu1 %1061 }
 0x2ea   :  { %3861 = vmatprep.mubr.msk.f32.mxu1 %vm379_vm1, %v4462_v57  ;;  %v1064_v57 = vpop.permute.xlu0 %1063 }
 0x2ed   :  { %3862 = vmatmul.mubr.msk.f32.gmra.mxu1 %vm379_vm1, %v4478_v59  ;;  %v1066_v58 = vpop.permute.xlu1 %1065 }
 0x2ee   :  { %3864 = vmatprep.mubr.msk.f32.mxu1 %vm379_vm1, %v4506_v5  ;;  %v1068_v59 = vpop.permute.xlu0 %1067 }
 0x2f1   :  { %3865 = vmatmul.mubr.msk.f32.gmra.mxu1 %vm379_vm1, %v4513_v6  ;;  %v1070_v5 = vpop.permute.xlu1 %1069 }
 0x2f2   :  { %3867 = vmatprep.mubr.msk.f32.mxu1 %vm379_vm1, %v4528_v9  ;;  %v1072_v6 = vpop.permute.xlu0 %1071 }
 0x2f5   :  { %3868 = vmatmul.mubr.msk.f32.gmra.mxu1 %vm379_vm1, %v4539_v11  ;;  %v1074_v9 = vpop.permute.xlu1 %1073 }
 0x2f6   :  { %3870 = vmatprep.mubr.msk.f32.mxu1 %vm379_vm1, %v4551_v13  ;;  %v1076_v11 = vpop.permute.xlu0 %1075 }
 0x2f9   :  { %3871 = vmatmul.mubr.msk.f32.gmra.mxu1 %vm379_vm1, %v4561_v15  ;;  %v1078_v13 = vpop.permute.xlu1 %1077 }
 0x2fa   :  { %3873 = vmatprep.mubr.msk.f32.mxu1 %vm379_vm1, %v4572_v17  ;;  %v1080_v15 = vpop.permute.xlu0 %1079 }
 0x2fd   :  { %3874 = vmatmul.mubr.msk.f32.gmra.mxu1 %vm379_vm1, %v4583_v19  ;;  %v1082_v17 = vpop.permute.xlu1 %1081 }
 0x2fe   :  { %3930 = vmatprep.mubr.msk.f32.mxu1 %vm379_vm1, %v1024_v39  ;;  %v1084_v19 = vpop.permute.xlu0 %1083 }
 0x301   :  { %3931 = vmatmul.mubr.msk.f32.vlgmr.msra.gmra.mxu1 %vm379_vm1, %v1026_v36  ;;  %v1086_v21 = vpop.permute.xlu1 %1085 }
 0x302   :  { %3933 = vmatprep.mubr.msk.f32.mxu1 %vm379_vm1, %v1028_v38  ;;  %v4830_v38 = vpop.f32.mrf.mxu0 }
 0x305   :  { %3934 = vmatmul.mubr.msk.f32.gmra.mxu1 %vm379_vm1, %v1030_v40 }
 0x306   :  { %3936 = vmatprep.mubr.msk.f32.mxu1 %vm379_vm1, %v1032_v41  ;;  %v4836_v41 = vpop.f32.mrf.mxu0 }
 0x309   :  { %3937 = vmatmul.mubr.msk.f32.gmra.mxu1 %vm379_vm1, %v1034_v42 }
 0x30a   :  { %3939 = vmatprep.mubr.msk.f32.mxu1 %vm379_vm1, %v1036_v43 }
 0x30d   :  { %3940 = vmatmul.mubr.msk.f32.gmra.mxu1 %vm379_vm1, %v1038_v44  ;;  %v4842_v44 = vpop.f32.mrf.mxu0 }
 0x30e   :  { %3942 = vmatprep.mubr.msk.f32.mxu1 %vm379_vm1, %v1040_v45 }
 0x311   :  { %3943 = vmatmul.mubr.msk.f32.gmra.mxu1 %vm379_vm1, %v1042_v46 }
 0x312   :  { %3945 = vmatprep.mubr.msk.f32.mxu1 %vm379_vm1, %v1044_v47  ;;  %v4848_v47 = vpop.f32.mrf.mxu0 }
 0x315   :  { %3946 = vmatmul.mubr.msk.f32.gmra.mxu1 %vm379_vm1, %v1046_v48 }
 0x316   :  { %3948 = vmatprep.mubr.msk.f32.mxu1 %vm379_vm1, %v1048_v49 }
 0x319   :  { %3949 = vmatmul.mubr.msk.f32.gmra.mxu1 %vm379_vm1, %v1050_v50  ;;  %v4854_v50 = vpop.f32.mrf.mxu0 }
 0x31a   :  { %3951 = vmatprep.mubr.msk.f32.mxu1 %vm379_vm1, %v1052_v51 }
 0x31d   :  { %3952 = vmatmul.mubr.msk.f32.gmra.mxu1 %vm379_vm1, %v1054_v52 }
 0x31e   :  { %3954 = vmatprep.mubr.msk.f32.mxu1 %vm379_vm1, %v1056_v53  ;;  %v4860_v53 = vpop.f32.mrf.mxu0 }
 0x321   :  { %3955 = vmatmul.mubr.msk.f32.gmra.mxu1 %vm379_vm1, %v1058_v54 }
 0x322   :  { %3957 = vmatprep.mubr.msk.f32.mxu1 %vm379_vm1, %v1060_v55 }
 0x325   :  { %3958 = vmatmul.mubr.msk.f32.gmra.mxu1 %vm379_vm1, %v1062_v56  ;;  %v4866_v56 = vpop.f32.mrf.mxu0 }
 0x326   :  { %3960 = vmatprep.mubr.msk.f32.mxu1 %vm379_vm1, %v1064_v57 }
 0x329   :  { %3961 = vmatmul.mubr.msk.f32.gmra.mxu1 %vm379_vm1, %v1066_v58 }
 0x32a   :  { %3963 = vmatprep.mubr.msk.f32.mxu1 %vm379_vm1, %v1068_v59  ;;  %v4872_v59 = vpop.f32.mrf.mxu0 }
 0x32d   :  { %3964 = vmatmul.mubr.msk.f32.gmra.mxu1 %vm379_vm1, %v1070_v5 }
 0x32e   :  { %3966 = vmatprep.mubr.msk.f32.mxu1 %vm379_vm1, %v1072_v6 }
 0x331   :  { %3967 = vmatmul.mubr.msk.f32.gmra.mxu1 %vm379_vm1, %v1074_v9  ;;  %v1410_v9 = vsub.s32 1, %v4482_v61 }
 0x332   :  { %3969 = vmatprep.mubr.msk.f32.mxu1 %vm379_vm1, %v1076_v11  ;;  %v4879_v11 = vpop.f32.mrf.mxu0 }
 0x335   :  { %3970 = vmatmul.mubr.msk.f32.gmra.mxu1 %vm379_vm1, %v1078_v13 }
 0x336   :  { %3972 = vmatprep.mubr.msk.f32.mxu1 %vm379_vm1, %v1080_v15 }
 0x339   :  { %3973 = vmatmul.mubr.msk.f32.gmra.mxu1 %vm379_vm1, %v1082_v17  ;;  %v4886_v17 = vrot.slane %v4488_v63, %v1410_v9 }
 0x33a   :  { %3975 = vmatprep.mubr.msk.f32.mxu1 %vm379_vm1, %v1084_v19 }
 0x33d   :  { %3976 = vmatmul.mubr.msk.f32.gmra.mxu1 %vm379_vm1, %v1086_v21  ;;  %v4888_v21 = vpop.f32.mrf.mxu0 }
 0x381   :  { %v3830_v31 = vpop.f32.mrf.mxu1 }
 0x382   :  { %v870_v19 = vadd.f32 %v3880_v22, %v3830_v31 }
 0x383   :  { %v542_v32 = vpop.f32.mrf.mxu1 }
 0x384   :  { %v865_v4 = vadd.f32 %v864_v23, %v542_v32 }
 0x385   :  { %v3833_v34 = vpop.f32.mrf.mxu1 }
 0x387   :  { %v552_v35 = vpop.f32.mrf.mxu1 }
 0x388   :  { %v875_v22 = vadd.f32 %v4786_v25, %v552_v35 }
 0x389   :  { %v4802_v60 = vpop.f32.mrf.mxu1 }
 0x38b   :  { %v4804_v62 = vpop.f32.mrf.mxu1 }
 0x38d   :  { %v4808_v1 = vpop.f32.mrf.mxu1 }
 0x38f   :  { %v4810_v2 = vpop.f32.mrf.mxu1 }
 0x391   :  { %v4814_v8 = vpop.f32.mrf.mxu1 }
 0x393   :  { %v4816_v10 = vpop.f32.mrf.mxu1 }
 0x395   :  { %v4820_v14 = vpop.f32.mrf.mxu1 }
 0x397   :  { %v4822_v16 = vpop.f32.mrf.mxu1 }
 0x399   :  { %v4826_v20 = vpop.f32.mrf.mxu1 }
 0x39b   :  { %v4828_v36 = vpop.f32.mrf.mxu1 }
 0x39d   :  { %v4832_v39 = vpop.f32.mrf.mxu1 }
 0x39f   :  { %v4834_v40 = vpop.f32.mrf.mxu1 }
 0x3a1   :  { %v4838_v42 = vpop.f32.mrf.mxu1 }
 0x3a3   :  { %v4840_v43 = vpop.f32.mrf.mxu1 }
 0x3a5   :  { %v4844_v45 = vpop.f32.mrf.mxu1 }
 0x3a7   :  { %v4846_v46 = vpop.f32.mrf.mxu1 }
 0x3a9   :  { %v4850_v48 = vpop.f32.mrf.mxu1 }
 0x3ab   :  { %v4852_v49 = vpop.f32.mrf.mxu1 }
 0x3ad   :  { %v4856_v51 = vpop.f32.mrf.mxu1 }
 0x3af   :  { %v4858_v52 = vpop.f32.mrf.mxu1 }
 0x3b1   :  { %v4862_v54 = vpop.f32.mrf.mxu1 }
 0x3b2   :  { %6530 = vst [vmem:[#allocation8_spill] sm:$0xff] %v4862_v54 }
 0x3b3   :  { %v4864_v55 = vpop.f32.mrf.mxu1 }
 0x3b4   :  { %6531 = vst [vmem:[#allocation9_spill] sm:$0xff] %v4864_v55 }
 0x3b5   :  { %v4868_v57 = vpop.f32.mrf.mxu1 }
 0x3b6   :  { %6532 = vst [vmem:[#allocation10_spill] sm:$0xff] %v4868_v57  ;;  %v880_v57 = vadd.f32 %v3883_v24, %v3833_v34 }
 0x3b7   :  { %v4870_v58 = vpop.f32.mrf.mxu1 }
 0x3b8   :  { %6533 = vst [vmem:[#allocation11_spill] sm:$0xff] %v4870_v58 }
 0x3b9   :  { %v4874_v5 = vpop.f32.mrf.mxu1 }
 0x3ba   :  { %6534 = vst [vmem:[#allocation12_spill] sm:$0xff] %v4874_v5 }
 0x3bb   :  { %v4876_v6 = vpop.f32.mrf.mxu1 }
 0x3bc   :  { %6535 = vst [vmem:[#allocation13_spill] sm:$0xff] %v4876_v6  ;;  %v4890_v6 = vpop.f32.mrf.mxu0 }
 0x3bd   :  { %v4881_v13 = vpop.f32.mrf.mxu1 }
 0x3be   :  { %6536 = vst [vmem:[#allocation14_spill] sm:$0xff] %v4881_v13  ;;  %v4903_v24 = vpop.f32.mrf.mxu0 }
 0x3bf   :  { %v4883_v15 = vpop.f32.mrf.mxu1 }
 0x3c0   :  { %6537 = vst [vmem:[#allocation15_spill] sm:$0xff] %v4883_v15 }
 0x3c1   :  { %v3932_v3 = vpop.f32.mrf.mxu1 }
 0x3c2   :  { %v1377_v58 = vadd.f32 %v3932_v3, %v870_v19  ;;  %v2318_v3 = vsub.s32 2, %v4482_v61  ;;  %v994_v19 = vpop.f32.mrf.mxu0 }
 0x3c3   :  { %v1217_v5 = vpop.f32.mrf.mxu1 }
 0x3c4   :  { %v4893_v55 = vadd.f32 %v4886_v17, %v1377_v58  ;;  %v1376_v54 = vadd.f32 %v1217_v5, %v865_v4  ;;  %v4918_v5 = vrot.slane %v4488_v63, %v2318_v3  ;;  %v4933_v63 = vadd.f32 %v4798_v33, %v4816_v10 }
 0x3c5   :  { %v3935_v13 = vpop.f32.mrf.mxu1  ;;  %v4953_v33 = vadd.f32 %v4818_v12, %v4828_v36  ;;  %v4969_v12 = vadd.f32 %v4836_v41, %v4838_v42  ;;  %v4990_v42 = vadd.f32 %v4866_v56, %v4852_v49  ;;  %v6543_v56 = vld [vmem:[#allocation8_spill] sm:$0xff] }
 0x3c6   :  { %v4896_v15 = vadd.f32 %v4886_v17, %v1376_v54  ;;  %v1379_v9 = vadd.f32 %v3935_v13, %v880_v57  ;;  %v4900_v31 = vmul.f32 0.70710677, %v4893_v55  ;;  %v890_v54 = vadd.f32 %v4788_v26, %v4802_v60  ;;  %6540 = vst [vmem:[#allocation18_spill] sm:$0xff] %v4918_v5 }
 0x3c7   :  { %v1227_v23 = vpop.f32.mrf.mxu1  ;;  %v885_v13 = vadd.f32 %v4790_v27, %v4804_v62  ;;  %v900_v60 = vadd.f32 %v4792_v28, %v4808_v1  ;;  %v4937_v27 = vadd.f32 %v4800_v37, %v4820_v14  ;;  %v4941_v62 = vadd.f32 %v4806_v0, %v4822_v16 }
 0x3c8   :  { %6538 = vst [vmem:[#allocation16_spill] sm:$0xff] %v4900_v31  ;;  %v4906_v32 = vadd.f32 %v4886_v17, %v1379_v9  ;;  %v1378_v34 = vadd.f32 %v1227_v23, %v875_v22  ;;  %v4911_v57 = vmul.f32 0.70710677, %v4896_v15  ;;  %v1509_v25 = vand.u32 2147483647, %v4900_v31 }
 0x3c9   :  { %v3938_v4 = vpop.f32.mrf.mxu1  ;;  %v895_v22 = vadd.f32 %v4794_v29, %v4810_v2  ;;  %v910_v23 = vadd.f32 %v4796_v30, %v4814_v8  ;;  %v4949_v30 = vadd.f32 %v4812_v7, %v4826_v20  ;;  %v4957_v37 = vadd.f32 %v4824_v18, %v4832_v39  ;;  %v3922_v8 = vpop.f32.mrf.mxu0 }
 0x3ca   :  { %6539 = vst [vmem:[#allocation17_spill] sm:$0xff] %v4911_v57  ;;  %v4915_v35 = vadd.f32 %v4886_v17, %v1378_v34  ;;  %v4923_v9 = vmul.f32 0.70710677, %v4906_v32  ;;  %v1381_v26 = vadd.f32 %v3938_v4, %v890_v54  ;;  %v1508_v28 = vand.u32 2147483647, %v4911_v57 }
 0x3cb   :  { %v1237_v58 = vpop.f32.mrf.mxu1  ;;  %v1957_v1 = vsub.f32 0.0, %v1509_v25  ;;  %v4961_v2 = vadd.f32 %v4830_v38, %v4834_v40  ;;  %v4973_v16 = vadd.f32 %v4842_v44, %v4840_v43  ;;  %v4977_v18 = vadd.f32 %v4848_v47, %v4844_v45 }
 0x3cc   :  { %6541 = vst [vmem:[#allocation19_spill] sm:$0xff] %v4923_v9  ;;  %v4945_v29 = vmul.f32 0.70710677, %v4915_v35  ;;  %v1511_v10 = vand.u32 2147483647, %v4923_v9  ;;  %v4965_v7 = vadd.f32 %v4886_v17, %v1381_v26  ;;  %v1380_v14 = vadd.f32 %v1237_v58, %v885_v13  ;;  %v6544_v13 = vld [vmem:[#allocation9_spill] sm:$0xff] }
 0x3cd   :  { %v3941_v3 = vpop.f32.mrf.mxu1  ;;  %v1541_v20 = vmul.f32 0.3275911, %v1509_v25  ;;  %v4981_v38 = vadd.f32 %v4854_v50, %v4846_v46  ;;  %v4985_v39 = vadd.f32 %v4860_v53, %v4850_v48  ;;  %v1956_v40 = vsub.f32 0.0, %v1508_v28  ;;  %v1004_v50 = vpop.f32.mrf.mxu0  ;;  %v6550_v9 = vld [vmem:[#allocation15_spill] sm:$0xff] }
 0x3ce   :  { %6542 = vst [vmem:[#allocation20_spill] sm:$0xff] %v4945_v29  ;;  %v1510_v41 = vand.u32 2147483647, %v4945_v29  ;;  %v1989_v43 = vmul.f32 %v1957_v1, %v1509_v25  ;;  %v4993_v44 = vmul.f32 0.70710677, %v4965_v7  ;;  %v4996_v45 = vadd.f32 %v4886_v17, %v1380_v14  ;;  %v6545_v14 = vld [vmem:[#allocation10_spill] sm:$0xff] }
 0x3cf   :  { %v1247_v0 = vpop.f32.mrf.mxu1  ;;  %v5000_v47 = vadd.f32 %v4872_v59, %v4856_v51  ;;  %v5004_v48 = vadd.f32 %v4879_v11, %v4858_v52  ;;  %v1959_v53 = vsub.f32 0.0, %v1511_v10  ;;  %v1383_v49 = vadd.f32 %v3941_v3, %v900_v60 }
 0x3d0   :  { %v5008_v34 = vadd.f32 %v4888_v21, %v6543_v56  ;;  %v1573_v4 = vadd.f32 1.0, %v1541_v20  ;;  %v1540_v54 = vmul.f32 0.3275911, %v1508_v28  ;;  %v1382_v25 = vadd.f32 %v1247_v0, %v895_v22  ;;  %v3925_v0 = vpop.f32.mrf.mxu0 }
 0x3d1   :  { %v3944_v36 = vpop.f32.mrf.mxu1  ;;  %v5012_v26 = vadd.f32 %v4890_v6, %v6544_v13  ;;  %v1988_v51 = vmul.f32 %v1956_v40, %v1508_v28  ;;  %v1958_v59 = vsub.f32 0.0, %v1510_v41  ;;  %v5015_v52 = vmul.f32 0.70710677, %v4996_v45  ;;  %v6546_v40 = vld [vmem:[#allocation11_spill] sm:$0xff] }
 0x3d2   :  { %v2022_v11 = vmul.f32 1.442695, %v1989_v43  ;;  %v1543_v1 = vmul.f32 0.3275911, %v1511_v10  ;;  %v1513_v60 = vand.u32 2147483647, %v4993_v44  ;;  %v5019_v21 = vadd.f32 %v4886_v17, %v1383_v49 }
 0x3d3   :  { %v1257_v46 = vpop.f32.mrf.mxu1  ;;  %v5023_v22 = vadd.f32 %v4903_v24, %v6545_v14  ;;  %v1991_v6 = vmul.f32 %v1959_v53, %v1511_v10  ;;  %v5026_v28 = vadd.f32 %v4886_v17, %v1382_v25  ;;  %v1385_v20 = vadd.f32 %v3944_v36, %v910_v23  ;;  %v6547_v14 = vld [vmem:[#allocation12_spill] sm:$0xff] }
 0x3d4   :  { %v5029_v56 = vadd.f32 %v994_v19, %v6546_v40  ;;  %4007 = vrcp.f32 %v1573_v4  ;;  %v1572_v43 = vadd.f32 1.0, %v1540_v54  ;;  %v1542_v13 = vmul.f32 0.3275911, %v1510_v41  ;;  %v1014_v19 = vpop.f32.mrf.mxu0  ;;  %v6549_v40 = vld [vmem:[#allocation14_spill] sm:$0xff] }
 0x3d5   :  { %v3947_v58 = vpop.f32.mrf.mxu1  ;;  %v2020_v49 = vmul.f32 1.442695, %v1988_v51  ;;  %v1990_v57 = vmul.f32 %v1958_v59, %v1510_v41  ;;  %v1512_v31 = vand.u32 2147483647, %v5015_v52  ;;  %v5033_v24 = vmul.f32 0.70710677, %v5019_v21 }
 0x3d6   :  { %v5036_v10 = vadd.f32 %v3922_v8, %v6547_v14  ;;  %4009 = vpow2.f32 %v2022_v11  ;;  %v1575_v53 = vadd.f32 1.0, %v1543_v1  ;;  %v1961_v23 = vsub.f32 0.0, %v1513_v60  ;;  %v6548_v51 = vld [vmem:[#allocation13_spill] sm:$0xff] }
 0x3d7   :  { %v1267_v3 = vpop.f32.mrf.mxu1  ;;  %v2026_v4 = vmul.f32 1.442695, %v1991_v6  ;;  %v1545_v54 = vmul.f32 0.3275911, %v1513_v60  ;;  %v5041_v25 = vmul.f32 0.70710677, %v5026_v28  ;;  %v5044_v41 = vadd.f32 %v4886_v17, %v1385_v20 }
 0x3d8   :  { %v5047_v59 = vadd.f32 %v1004_v50, %v6548_v51  ;;  %v5050_v8 = vadd.f32 %v3925_v0, %v6549_v40  ;;  %4011 = vrcp.f32 %v1572_v43  ;;  %v1574_v11 = vadd.f32 1.0, %v1542_v13 }
 0x3d9   :  { %v3950_v61 = vpop.f32.mrf.mxu1  ;;  %4013 = vpow2.f32 %v2020_v49  ;;  %v2024_v14 = vmul.f32 1.442695, %v1990_v57  ;;  %v1960_v6 = vsub.f32 0.0, %v1512_v31  ;;  %v1515_v29 = vand.u32 2147483647, %v5033_v24 }
 0x3da   :  { %v5056_v5 = vadd.f32 %v1014_v19, %v6550_v9  ;;  %4015 = vrcp.f32 %v1575_v53  ;;  %v1993_v20 = vmul.f32 %v1961_v23, %v1513_v60  ;;  %v1384_v50 = vadd.f32 %v1257_v46, %v4933_v63 }
 0x3db   :  { %v5038_v36 = vpop.f32.mrf.mxu1  ;;  %4017 = vpow2.f32 %v2026_v4  ;;  %v1577_v51 = vadd.f32 1.0, %v1545_v54  ;;  %v1514_v0 = vand.u32 2147483647, %v5041_v25  ;;  %v5061_v43 = vmul.f32 0.70710677, %v5044_v41 }
 0x3dc   :  { %4019 = vrcp.f32 %v1574_v11  ;;  %v1544_v57 = vmul.f32 0.3275911, %v1512_v31  ;;  %v5066_v49 = vadd.f32 %v4886_v17, %v1384_v50  ;;  %v1387_v9 = vadd.f32 %v3947_v58, %v4937_v27 }
 0x3dd   :  { %v5052_v1 = vpop.f32.mrf.mxu1  ;;  %6551 = vst [vmem:[#allocation8_spill] sm:$0xff] %v5061_v43  ;;  %v5070_v60 = vmul.f32 0.5, %v4893_v55  ;;  %4021 = vpow2.f32 %v2024_v14  ;;  %v1992_v63 = vmul.f32 %v1960_v6, %v1512_v31  ;;  %v1963_v46 = vsub.f32 0.0, %v1515_v29 }
 0x3de   :  { %v2030_v53 = vmul.f32 1.442695, %v1993_v20  ;;  %v1547_v23 = vmul.f32 0.3275911, %v1515_v29  ;;  %v5073_v19 = vmul.f32 0.70710677, %v5066_v49  ;;  %v5076_v4 = vadd.f32 %v4886_v17, %v1387_v9 }
 0x3df   :  { %v5063_v13 = vpop.f32.mrf.mxu1  ;;  %6552 = vst [vmem:[#allocation9_spill] sm:$0xff] %v5070_v60  ;;  %4023 = vrcp.f32 %v1577_v51  ;;  %v1546_v54 = vmul.f32 0.3275911, %v1514_v0  ;;  %v1517_v40 = vand.u32 2147483647, %v5061_v43  ;;  %v1386_v27 = vadd.f32 %v1267_v3, %v4941_v62 }
 0x3e0   :  { %6553 = vst [vmem:[#allocation10_spill] sm:$0xff] %v5073_v19  ;;  %v1576_v55 = vadd.f32 1.0, %v1544_v57  ;;  %v1962_v11 = vsub.f32 0.0, %v1514_v0  ;;  %v1516_v31 = vand.u32 2147483647, %v5073_v19  ;;  %v1995_v50 = vmul.f32 %v1963_v46, %v1515_v29 }
 0x3e1   :  { %v5080_v58 = vpop.f32.mrf.mxu1  ;;  %v5084_v14 = vmul.f32 0.70710677, %v5076_v4  ;;  %v5086_v6 = vpop.eup %4007  ;;  %v2028_v20 = vmul.f32 1.442695, %v1992_v63  ;;  %v5089_v51 = vadd.f32 %v4886_v17, %v1386_v27  ;;  %v1389_v9 = vadd.f32 %v3950_v61, %v4949_v30 }
 0x3e2   :  { %6554 = vst [vmem:[#allocation11_spill] sm:$0xff] %v5086_v6  ;;  %v5093_v62 = vmul.f32 0.5, %v4896_v15  ;;  %4025 = vpow2.f32 %v2030_v53  ;;  %v1579_v3 = vadd.f32 1.0, %v1547_v23  ;;  %v1578_v19 = vadd.f32 1.0, %v1546_v54 }
 0x3e3   :  { %v1519_v57 = vand.u32 2147483647, %v5084_v14  ;;  %v5096_v60 = vpop.eup %4009  ;;  %v1965_v43 = vsub.f32 0.0, %v1517_v40  ;;  %v5099_v6 = vmul.f32 0.70710677, %v5089_v51  ;;  %v5102_v29 = vadd.f32 %v4886_v17, %v1389_v9  ;;  %v5104_v63 = vpop.f32.mrf.mxu1 }
 0x3e4   :  { %6555 = vst [vmem:[#allocation12_spill] sm:$0xff] %v5093_v62  ;;  %6556 = vst [vmem:[#allocation13_spill] sm:$0xff] %v5096_v60  ;;  %v5107_v61 = vmul.f32 0.5, %v4906_v32  ;;  %4027 = vrcp.f32 %v1576_v55  ;;  %v1994_v15 = vmul.f32 %v1962_v11, %v1514_v0  ;;  %v1964_v30 = vsub.f32 0.0, %v1516_v31 }
 0x3e5   :  { %6557 = vst [vmem:[#allocation14_spill] sm:$0xff] %v5099_v6  ;;  %v5109_v46 = vpop.eup %4011  ;;  %4029 = vpow2.f32 %v2028_v20  ;;  %v2034_v53 = vmul.f32 1.442695, %v1995_v50  ;;  %v1549_v23 = vmul.f32 0.3275911, %v1517_v40  ;;  %v5115_v9 = vmul.f32 0.5, %v4915_v35  ;;  %v5125_v50 = vpop.f32.mrf.mxu1 }
 0x3e6   :  { %6558 = vst [vmem:[#allocation15_spill] sm:$0xff] %v5107_v61  ;;  %6559 = vst [vmem:[#allocation21_spill] sm:$0xff] %v5109_v46  ;;  %v1518_v54 = vand.u32 2147483647, %v5099_v6  ;;  %v5112_v27 = vpop.eup %4013  ;;  %v5118_v62 = vmul.f32 0.5, %v4965_v7  ;;  %4031 = vrcp.f32 %v1579_v3  ;;  %v1967_v32 = vsub.f32 0.0, %v1519_v57 }
 0x3e7   :  { %6560 = vst [vmem:[#allocation22_spill] sm:$0xff] %v5112_v27  ;;  %6561 = vst [vmem:[#allocation23_spill] sm:$0xff] %v5115_v9  ;;  %v5120_v55 = vpop.eup %4015  ;;  %4033 = vrcp.f32 %v1578_v19  ;;  %v1997_v0 = vmul.f32 %v1965_v43, %v1517_v40  ;;  %v1548_v11 = vmul.f32 0.3275911, %v1516_v31  ;;  %v5123_v20 = vmul.f32 0.70710677, %v5102_v29 }
 0x3e8   :  { %6562 = vst [vmem:[#allocation24_spill] sm:$0xff] %v5120_v55  ;;  %v5127_v60 = vpop.eup %4017  ;;  %v2032_v27 = vmul.f32 1.442695, %v1994_v15  ;;  %v1996_v35 = vmul.f32 %v1964_v30, %v1516_v31  ;;  %v1388_v7 = vadd.f32 %v5038_v36, %v4953_v33  ;;  %v1391_v3 = vadd.f32 %v5052_v1, %v4957_v37  ;;  %v1307_v15 = vpop.f32.mrf.mxu1 }
 0x3e9   :  { %6563 = vst [vmem:[#allocation25_spill] sm:$0xff] %v5123_v20  ;;  %6564 = vst [vmem:[#allocation26_spill] sm:$0xff] %v5127_v60  ;;  %v5133_v9 = vpop.eup %4019  ;;  %v5136_v43 = vmul.f32 0.5, %v4996_v45  ;;  %4035 = vpow2.f32 %v2034_v53  ;;  %v1581_v19 = vadd.f32 1.0, %v1549_v23  ;;  %v1966_v40 = vsub.f32 0.0, %v1518_v54 }
 0x3ea   :  { %6565 = vst [vmem:[#allocation27_spill] sm:$0xff] %v5133_v9  ;;  %v5138_v46 = vpop.eup %4021  ;;  %v1551_v61 = vmul.f32 0.3275911, %v1519_v57  ;;  %v1999_v60 = vmul.f32 %v1967_v32, %v1519_v57  ;;  %v5141_v31 = vadd.f32 %v4886_v17, %v1388_v7  ;;  %v5144_v33 = vadd.f32 %v4886_v17, %v1391_v3 }
 0x3eb   :  { %6566 = vst [vmem:[#allocation28_spill] sm:$0xff] %v5138_v46  ;;  %v2038_v36 = vmul.f32 1.442695, %v1997_v0  ;;  %v1580_v37 = vadd.f32 1.0, %v1548_v11  ;;  %v1521_v1 = vand.u32 2147483647, %v5123_v20  ;;  %v1390_v45 = vadd.f32 %v5063_v13, %v4961_v2 }
 0x3ec   :  { %v5149_v30 = vpop.eup %4023  ;;  %4037 = vpow2.f32 %v2032_v27  ;;  %v2036_v53 = vmul.f32 1.442695, %v1996_v35  ;;  %v1550_v23 = vmul.f32 0.3275911, %v1518_v54  ;;  %v5152_v57 = vmul.f32 0.70710677, %v5141_v31 }
 0x3ed   :  { %v1998_v32 = vmul.f32 %v1966_v40, %v1518_v54  ;;  %v5155_v7 = vmul.f32 0.70710677, %v5144_v33  ;;  %v5158_v0 = vadd.f32 %v4886_v17, %v1390_v45  ;;  %v1393_v11 = vadd.f32 %v5080_v58, %v4969_v12  ;;  %v3962_v40 = vpop.f32.mrf.mxu1 }
 0x3ee   :  { %6567 = vst [vmem:[#allocation29_spill] sm:$0xff] %v5152_v57  ;;  %4039 = vrcp.f32 %v1581_v19  ;;  %v1583_v2 = vadd.f32 1.0, %v1551_v61  ;;  %v2042_v13 = vmul.f32 1.442695, %v1999_v60  ;;  %v1520_v27 = vand.u32 2147483647, %v5152_v57 }
 0x3ef   :  { %6568 = vst [vmem:[#allocation30_spill] sm:$0xff] %v5155_v7  ;;  %v5163_v35 = vpop.eup %4025  ;;  %4041 = vpow2.f32 %v2038_v36  ;;  %v1553_v3 = vmul.f32 0.3275911, %v1521_v1  ;;  %v1969_v46 = vsub.f32 0.0, %v1521_v1  ;;  %v5166_v54 = vmul.f32 0.70710677, %v5158_v0  ;;  %v5191_v20 = vpop.f32.mrf.mxu1 }
 0x3f0   :  { %4043 = vrcp.f32 %v1580_v37  ;;  %v1582_v45 = vadd.f32 1.0, %v1550_v23  ;;  %v1523_v9 = vand.u32 2147483647, %v5155_v7  ;;  %v5170_v12 = vadd.f32 %v4886_v17, %v1393_v11 }
 0x3f1   :  { %v5172_v58 = vpop.eup %4027  ;;  %v5175_v60 = vmul.f32 0.5, %v5019_v21  ;;  %v5178_v61 = vmul.f32 0.5, %v5026_v28  ;;  %4045 = vpow2.f32 %v2036_v53  ;;  %v2040_v19 = vmul.f32 1.442695, %v1998_v32 }
 0x3f2   :  { %6569 = vst [vmem:[#allocation31_spill] sm:$0xff] %v5170_v12  ;;  %v5180_v36 = vpop.eup %4029  ;;  %4047 = vrcp.f32 %v1583_v2  ;;  %v1968_v37 = vsub.f32 0.0, %v1520_v27  ;;  %v1522_v23 = vand.u32 2147483647, %v5166_v54  ;;  %v5184_v7 = vmul.f32 0.70710677, %v5170_v12 }
 0x3f3   :  { %6570 = vst [vmem:[#allocation32_spill] sm:$0xff] %v5178_v61  ;;  %v5186_v11 = vpop.eup %4031  ;;  %v5189_v57 = vmul.f32 0.5, %v5044_v41  ;;  %4049 = vpow2.f32 %v2042_v13  ;;  %v1585_v21 = vadd.f32 1.0, %v1553_v3  ;;  %v2001_v28 = vmul.f32 %v1969_v46, %v1521_v1 }
 0x3f4   :  { %6571 = vst [vmem:[#allocation33_spill] sm:$0xff] %v5184_v7  ;;  %v5193_v53 = vpop.eup %4033  ;;  %4051 = vrcp.f32 %v1582_v45  ;;  %v1552_v32 = vmul.f32 0.3275911, %v1520_v27  ;;  %v1555_v2 = vmul.f32 0.3275911, %v1523_v9  ;;  %v1971_v6 = vsub.f32 0.0, %v1523_v9 }
 0x3f5   :  { %6572 = vst [vmem:[#allocation34_spill] sm:$0xff] %v5189_v57  ;;  %v5196_v55 = vmul.f32 0.5, %v5066_v49  ;;  %v5199_v12 = vmul.f32 0.5, %v5076_v4  ;;  %v5202_v41 = vmul.f32 0.5, %v5089_v51  ;;  %4053 = vpow2.f32 %v2040_v19 }
 0x3f6   :  { %v5204_v13 = vpop.eup %4035  ;;  %v2000_v46 = vmul.f32 %v1968_v37, %v1520_v27  ;;  %v1970_v1 = vsub.f32 0.0, %v1522_v23  ;;  %v1525_v3 = vand.u32 2147483647, %v5184_v7  ;;  %v1392_v45 = vadd.f32 %v5104_v63, %v4973_v16 }
 0x3f7   :  { %6573 = vst [vmem:[#allocation35_spill] sm:$0xff] %v5196_v55  ;;  %6574 = vst [vmem:[#allocation36_spill] sm:$0xff] %v5199_v12  ;;  %4055 = vrcp.f32 %v1585_v21  ;;  %v2046_v57 = vmul.f32 1.442695, %v2001_v28  ;;  %v1395_v49 = vadd.f32 %v5125_v50, %v4977_v18  ;;  %v1394_v4 = vadd.f32 %v1307_v15, %v4981_v38  ;;  %v5212_v12 = vpop.f32.mrf.mxu1 }
 0x3f8   :  { %6575 = vst [vmem:[#allocation37_spill] sm:$0xff] %v5202_v41  ;;  %v1584_v51 = vadd.f32 1.0, %v1552_v32  ;;  %v1587_v19 = vadd.f32 1.0, %v1555_v2  ;;  %v2003_v41 = vmul.f32 %v1971_v6, %v1523_v9  ;;  %v5215_v27 = vadd.f32 %v4886_v17, %v1392_v45 }
 0x3f9   :  { %v5217_v37 = vpop.eup %4037  ;;  %v1554_v7 = vmul.f32 0.3275911, %v1522_v23  ;;  %v5220_v16 = vadd.f32 %v4886_v17, %v1395_v49  ;;  %v5223_v63 = vadd.f32 %v4886_v17, %v1394_v4  ;;  %v1397_v18 = vadd.f32 %v3962_v40, %v4985_v39  ;;  %v1327_v2 = vpop.f32.mrf.mxu1 }
 0x3fa   :  { %6576 = vst [vmem:[#allocation38_spill] sm:$0xff] %v5215_v27  ;;  %v2044_v38 = vmul.f32 1.442695, %v2000_v46  ;;  %v2002_v50 = vmul.f32 %v1970_v1, %v1522_v23  ;;  %v1973_v15 = vsub.f32 0.0, %v1525_v3  ;;  %v5227_v21 = vmul.f32 0.70710677, %v5215_v27 }
 0x3fb   :  { %6577 = vst [vmem:[#allocation39_spill] sm:$0xff] %v5220_v16  ;;  %6578 = vst [vmem:[#allocation40_spill] sm:$0xff] %v5223_v63  ;;  %v5229_v6 = vpop.eup %4039  ;;  %4057 = vpow2.f32 %v2046_v57  ;;  %v1557_v9 = vmul.f32 0.3275911, %v1525_v3  ;;  %v5232_v28 = vmul.f32 0.70710677, %v5220_v16  ;;  %v1433_v23 = vadd.f32 %v4886_v17, %v1397_v18 }
 0x3fc   :  { %6579 = vst [vmem:[#allocation41_spill] sm:$0xff] %v5227_v21  ;;  %v5235_v32 = vmul.f32 0.70710677, %v5223_v63  ;;  %v5237_v45 = vpop.eup %4041  ;;  %4059 = vrcp.f32 %v1584_v51  ;;  %v2050_v39 = vmul.f32 1.442695, %v2003_v41  ;;  %v1586_v57 = vadd.f32 1.0, %v1554_v7  ;;  %v3968_v7 = vpop.f32.mrf.mxu1 }
 0x3fd   :  { %6580 = vst [vmem:[#allocation42_spill] sm:$0xff] %v5232_v28  ;;  %v1524_v40 = vand.u32 2147483647, %v5227_v21  ;;  %v5241_v46 = vpop.eup %4043  ;;  %4061 = vrcp.f32 %v1587_v19  ;;  %v1527_v1 = vand.u32 2147483647, %v5232_v28  ;;  %v2005_v63 = vmul.f32 %v1973_v15, %v1525_v3 }
 0x3fe   :  { %6581 = vst [vmem:[#allocation43_spill] sm:$0xff] %v5235_v32  ;;  %v1526_v49 = vand.u32 2147483647, %v5235_v32  ;;  %v5245_v4 = vpop.eup %4045  ;;  %v2048_v27 = vmul.f32 1.442695, %v2002_v50  ;;  %v5252_v51 = vmul.f32 0.5, %v5102_v29  ;;  %4063 = vpow2.f32 %v2044_v38 }
 0x3ff   :  { %v1972_v16 = vsub.f32 0.0, %v1524_v40  ;;  %v5247_v55 = vmul.f32 0.70710677, %v1433_v23  ;;  %v5249_v41 = vpop.eup %4047  ;;  %v1589_v18 = vadd.f32 1.0, %v1557_v9  ;;  %v1556_v19 = vmul.f32 0.3275911, %v1524_v40 }
 0x400   :  { %6583 = vst [vmem:[#allocation45_spill] sm:$0xff] %v5252_v51  ;;  %v5254_v21 = vpop.eup %4049  ;;  %4065 = vpow2.f32 %v2050_v39  ;;  %v1559_v32 = vmul.f32 0.3275911, %v1527_v1  ;;  %v1975_v28 = vsub.f32 0.0, %v1527_v1  ;;  %v1974_v61 = vsub.f32 0.0, %v1526_v49 }
 0x401   :  { %6582 = vst [vmem:[#allocation44_spill] sm:$0xff] %v5247_v55  ;;  %6584 = vst [vmem:[#allocation46_spill] sm:$0xff] %v5254_v21  ;;  %v5256_v50 = vpop.eup %4051  ;;  %v5259_v3 = vmul.f32 0.5, %v5141_v31  ;;  %v5262_v15 = vmul.f32 0.5, %v5144_v33  ;;  %4067 = vrcp.f32 %v1586_v57  ;;  %v1529_v29 = vand.u32 2147483647, %v5247_v55 }
 0x402   :  { %6585 = vst [vmem:[#allocation47_spill] sm:$0xff] %v5256_v50  ;;  %v5265_v38 = vpop.eup %4053  ;;  %v5268_v9 = vmul.f32 0.5, %v5158_v0  ;;  %4069 = vpow2.f32 %v2048_v27  ;;  %v2054_v39 = vmul.f32 1.442695, %v2005_v63  ;;  %v2004_v51 = vmul.f32 %v1972_v16, %v1524_v40 }
 0x403   :  { %6586 = vst [vmem:[#allocation48_spill] sm:$0xff] %v5259_v3  ;;  %6587 = vst [vmem:[#allocation49_spill] sm:$0xff] %v5262_v15  ;;  %4071 = vrcp.f32 %v1589_v18  ;;  %v1588_v21 = vadd.f32 1.0, %v1556_v19  ;;  %v1558_v50 = vmul.f32 0.3275911, %v1526_v49  ;;  %v1396_v31 = vadd.f32 %v5191_v20, %v4990_v42  ;;  %v1337_v3 = vpop.f32.mrf.mxu1 }
 0x404   :  { %6588 = vst [vmem:[#allocation50_spill] sm:$0xff] %v5265_v38  ;;  %v5272_v33 = vpop.eup %4055  ;;  %v1591_v57 = vadd.f32 1.0, %v1559_v32  ;;  %v2007_v15 = vmul.f32 %v1975_v28, %v1527_v1  ;;  %v2006_v55 = vmul.f32 %v1974_v61, %v1526_v49  ;;  %v1399_v38 = vadd.f32 %v5212_v12, %v5000_v47 }
 0x405   :  { %v1977_v0 = vsub.f32 0.0, %v1529_v29  ;;  %v1432_v27 = vadd.f32 %v4886_v17, %v1396_v31  ;;  %v1398_v16 = vadd.f32 %v1327_v2, %v5004_v48  ;;  %v1401_v63 = vadd.f32 %v3968_v7, %v5008_v34  ;;  %v3971_v47 = vpop.f32.mrf.mxu1 }
 0x406   :  { %4073 = vpow2.f32 %v2054_v39  ;;  %v2052_v40 = vmul.f32 1.442695, %v2004_v51  ;;  %v5279_v18 = vmul.f32 0.5, %v1433_v23  ;;  %v1435_v42 = vadd.f32 %v4886_v17, %v1399_v38 }
 0x407   :  { %v1590_v20 = vadd.f32 1.0, %v1558_v50  ;;  %v1561_v32 = vmul.f32 0.3275911, %v1529_v29  ;;  %v5282_v28 = vmul.f32 0.70710677, %v1432_v27  ;;  %v5285_v61 = vadd.f32 %v4886_v17, %v1398_v16 }
 0x408   :  { %6589 = vst [vmem:[#allocation51_spill] sm:$0xff] %v5279_v18  ;;  %v5287_v12 = vpop.eup %4057  ;;  %4075 = vrcp.f32 %v1588_v21  ;;  %v2058_v48 = vmul.f32 1.442695, %v2007_v15  ;;  %v5289_v2 = vmul.f32 0.70710677, %v1435_v42  ;;  %v5292_v34 = vadd.f32 %v4886_v17, %v1401_v63 }
 0x409   :  { %6590 = vst [vmem:[#allocation52_spill] sm:$0xff] %v5282_v28  ;;  %6591 = vst [vmem:[#allocation53_spill] sm:$0xff] %v5287_v12  ;;  %v5294_v23 = vpop.eup %4059  ;;  %4077 = vrcp.f32 %v1591_v57  ;;  %v2056_v1 = vmul.f32 1.442695, %v2006_v55  ;;  %v2009_v49 = vmul.f32 %v1977_v0, %v1529_v29  ;;  %v1528_v51 = vand.u32 2147483647, %v5282_v28  ;;  %v1347_v55 = vpop.f32.mrf.mxu1 }
 0x40a   :  { %6592 = vst [vmem:[#allocation54_spill] sm:$0xff] %v5289_v2  ;;  %v5297_v19 = vpop.eup %4061  ;;  %4079 = vpow2.f32 %v2052_v40  ;;  %v1531_v7 = vand.u32 2147483647, %v5289_v2  ;;  %v5301_v21 = vmul.f32 0.70710677, %v5285_v61  ;;  %v1400_v50 = vadd.f32 %v1337_v3, %v5012_v26 }
 0x40b   :  { %6593 = vst [vmem:[#allocation55_spill] sm:$0xff] %v5297_v19  ;;  %v1593_v15 = vadd.f32 1.0, %v1561_v32  ;;  %v1560_v38 = vmul.f32 0.3275911, %v1528_v51  ;;  %v1976_v39 = vsub.f32 0.0, %v1528_v51  ;;  %v5307_v29 = vpop.eup %4063  ;;  %4081 = vpow2.f32 %v2058_v48 }
 0x40c   :  { %6594 = vst [vmem:[#allocation56_spill] sm:$0xff] %v5301_v21  ;;  %v5305_v31 = vmul.f32 0.70710677, %v5292_v34  ;;  %6596 = vst [vmem:[#allocation58_spill] sm:$0xff] %v5307_v29  ;;  %v1563_v57 = vmul.f32 0.3275911, %v1531_v7  ;;  %4083 = vrcp.f32 %v1590_v20  ;;  %v5316_v12 = vadd.f32 %v4886_v17, %v1400_v50 }
 0x40d   :  { %v1979_v0 = vsub.f32 0.0, %v1531_v7  ;;  %v1530_v16 = vand.u32 2147483647, %v5301_v21  ;;  %v5310_v63 = vpop.eup %4065  ;;  %v2062_v40 = vmul.f32 1.442695, %v2009_v49  ;;  %v2008_v18 = vmul.f32 %v1976_v39, %v1528_v51 }
 0x40e   :  { %6595 = vst [vmem:[#allocation57_spill] sm:$0xff] %v5305_v31  ;;  %6597 = vst [vmem:[#allocation59_spill] sm:$0xff] %v5310_v63  ;;  %v1533_v26 = vand.u32 2147483647, %v5305_v31  ;;  %v5313_v3 = vpop.eup %4067  ;;  %v1592_v32 = vadd.f32 1.0, %v1560_v38  ;;  %4085 = vpow2.f32 %v2056_v1  ;;  %v1595_v29 = vadd.f32 1.0, %v1563_v57  ;;  %v3974_v63 = vpop.f32.mrf.mxu1 }
 0x40f   :  { %v2011_v2 = vmul.f32 %v1979_v0, %v1531_v7  ;;  %v1978_v28 = vsub.f32 0.0, %v1530_v16  ;;  %v5318_v48 = vpop.eup %4069  ;;  %v1562_v21 = vmul.f32 0.3275911, %v1530_v16  ;;  %4087 = vrcp.f32 %v1593_v15 }
 0x410   :  { %v1981_v19 = vsub.f32 0.0, %v1533_v26  ;;  %v5320_v20 = vpop.eup %4071  ;;  %v5322_v49 = vmul.f32 0.5, %v1432_v27  ;;  %v2060_v51 = vmul.f32 1.442695, %v2008_v18  ;;  %4089 = vpow2.f32 %v2062_v40 }
 0x411   :  { %6598 = vst [vmem:[#allocation60_spill] sm:$0xff] %v5320_v20  ;;  %v2010_v39 = vmul.f32 %v1978_v28, %v1530_v16  ;;  %v5324_v7 = vmul.f32 0.5, %v1435_v42  ;;  %v2066_v38 = vmul.f32 1.442695, %v2011_v2  ;;  %v1565_v50 = vmul.f32 0.3275911, %v1533_v26  ;;  %v1357_v28 = vpop.f32.mrf.mxu1 }
 0x412   :  { %4091 = vrcp.f32 %v1592_v32  ;;  %v2013_v0 = vmul.f32 %v1981_v19, %v1533_v26  ;;  %v5327_v1 = vmul.f32 0.70710677, %v5316_v12  ;;  %v1403_v57 = vadd.f32 %v3971_v47, %v5023_v22 }
 0x413   :  { %v5330_v31 = vpop.eup %4073  ;;  %4093 = vrcp.f32 %v1595_v29  ;;  %v1594_v15 = vadd.f32 1.0, %v1562_v21  ;;  %v1402_v27 = vadd.f32 %v1347_v55, %v5029_v56  ;;  %v1405_v18 = vadd.f32 %v3974_v63, %v5036_v10 }
 0x414   :  { %6599 = vst [vmem:[#allocation61_spill] sm:$0xff] %v5330_v31  ;;  %4095 = vpow2.f32 %v2060_v51  ;;  %v2064_v42 = vmul.f32 1.442695, %v2010_v39  ;;  %v1532_v2 = vand.u32 2147483647, %v5327_v1  ;;  %v1439_v19 = vadd.f32 %v4886_v17, %v1403_v57 }
 0x415   :  { %v5336_v16 = vpop.eup %4075  ;;  %4097 = vpow2.f32 %v2066_v38  ;;  %v1597_v40 = vadd.f32 1.0, %v1565_v50  ;;  %v5339_v22 = vadd.f32 %v4886_v17, %v1402_v27  ;;  %v5342_v47 = vadd.f32 %v4886_v17, %v1405_v18 }
 0x416   :  { %6600 = vst [vmem:[#allocation62_spill] sm:$0xff] %v5336_v16  ;;  %v5344_v56 = vpop.eup %4077  ;;  %v2070_v10 = vmul.f32 1.442695, %v2013_v0  ;;  %v1564_v21 = vmul.f32 0.3275911, %v1532_v2  ;;  %v1980_v55 = vsub.f32 0.0, %v1532_v2  ;;  %v1404_v29 = vadd.f32 %v1357_v28, %v5047_v59  ;;  %v3977_v0 = vpop.f32.mrf.mxu1 }
 0x417   :  { %6601 = vst [vmem:[#allocation63_spill] sm:$0xff] %v5344_v56  ;;  %v5347_v63 = vpop.eup %4079  ;;  %v5350_v26 = vmul.f32 0.5, %v5285_v61  ;;  %4099 = vrcp.f32 %v1594_v15  ;;  %v5352_v32 = vmul.f32 0.70710677, %v1439_v19  ;;  %v5355_v51 = vmul.f32 0.70710677, %v5339_v22 }
 0x418   :  { %6602 = vst [vmem:[#allocation64_spill] sm:$0xff] %v5347_v63  ;;  %4101 = vpow2.f32 %v2064_v42  ;;  %v1596_v39 = vadd.f32 1.0, %v1564_v21  ;;  %v2012_v38 = vmul.f32 %v1980_v55, %v1532_v2  ;;  %v5358_v50 = vmul.f32 0.70710677, %v5342_v47  ;;  %v5360_v57 = vpop.eup %4081  ;;  %v1367_v16 = vpop.f32.mrf.mxu1 }
 0x419   :  { %6603 = vst [vmem:[#allocation65_spill] sm:$0xff] %v5352_v32  ;;  %6604 = vst [vmem:[#allocation66_spill] sm:$0xff] %v5355_v51  ;;  %v5363_v59 = vmul.f32 0.5, %v5292_v34  ;;  %4103 = vrcp.f32 %v1597_v40  ;;  %v1535_v61 = vand.u32 2147483647, %v5352_v32  ;;  %v5367_v27 = vpop.eup %4083  ;;  %v1440_v42 = vadd.f32 %v4886_v17, %v1404_v29 }
 0x41a   :  { %6605 = vst [vmem:[#allocation67_spill] sm:$0xff] %v5358_v50  ;;  %6606 = vst [vmem:[#allocation68_spill] sm:$0xff] %v5360_v57  ;;  %v1534_v15 = vand.u32 2147483647, %v5355_v51  ;;  %4105 = vpow2.f32 %v2070_v10  ;;  %v2068_v18 = vmul.f32 1.442695, %v2012_v38  ;;  %v1406_v51 = vadd.f32 %v1367_v16, %v5056_v5 }
 0x41b   :  { %6607 = vst [vmem:[#allocation69_spill] sm:$0xff] %v5363_v59  ;;  %6608 = vst [vmem:[#allocation70_spill] sm:$0xff] %v5367_v27  ;;  %v1537_v28 = vand.u32 2147483647, %v5358_v50  ;;  %v1567_v2 = vmul.f32 0.3275911, %v1535_v61  ;;  %v5371_v31 = vpop.eup %4085  ;;  %4107 = vrcp.f32 %v1596_v39 }
 0x41c   :  { %v1983_v21 = vsub.f32 0.0, %v1535_v61  ;;  %v1566_v55 = vmul.f32 0.3275911, %v1534_v15  ;;  %v1982_v63 = vsub.f32 0.0, %v1534_v15  ;;  %6609 = vst [vmem:[#allocation71_spill] sm:$0xff] %v5371_v31  ;;  %v5374_v34 = vmul.f32 0.5, %v5316_v12  ;;  %v5376_v20 = vpop.eup %4087 }
 0x41d   :  { %v1569_v40 = vmul.f32 0.3275911, %v1537_v28  ;;  %v1985_v57 = vsub.f32 0.0, %v1537_v28  ;;  %v1599_v10 = vadd.f32 1.0, %v1567_v2  ;;  %v5378_v29 = vpop.eup %4089  ;;  %4109 = vpow2.f32 %v2068_v18 }
 0x41e   :  { %6610 = vst [vmem:[#allocation72_spill] sm:$0xff] %v5374_v34  ;;  %v2015_v38 = vmul.f32 %v1983_v21, %v1535_v61  ;;  %v1598_v50 = vadd.f32 1.0, %v1566_v55  ;;  %v2014_v27 = vmul.f32 %v1982_v63, %v1534_v15  ;;  %v5380_v59 = vmul.f32 0.70710677, %v1440_v42 }
 0x41f   :  { %v2017_v56 = vmul.f32 %v1985_v57, %v1537_v28  ;;  %v1407_v31 = vadd.f32 %v3977_v0, %v5050_v8  ;;  %v5383_v12 = vpop.eup %4091  ;;  %4111 = vrcp.f32 %v1599_v10  ;;  %v5388_v61 = vmul.f32 0.5, %v1439_v19 }
 0x420   :  { %6611 = vst [vmem:[#allocation73_spill] sm:$0xff] %v5380_v59  ;;  %v2074_v39 = vmul.f32 1.442695, %v2015_v38  ;;  %v2072_v34 = vmul.f32 1.442695, %v2014_v27  ;;  %v5386_v32 = vpop.eup %4093  ;;  %4113 = vrcp.f32 %v1598_v50  ;;  %v1601_v63 = vadd.f32 1.0, %v1569_v40 }
 0x421   :  { %6612 = vst [vmem:[#allocation74_spill] sm:$0xff] %v5388_v61  ;;  %v1536_v15 = vand.u32 2147483647, %v5380_v59  ;;  %v5391_v57 = vpop.eup %4095  ;;  %v2078_v18 = vmul.f32 1.442695, %v2017_v56  ;;  %v1443_v8 = vadd.f32 %v4886_v17, %v1407_v31  ;;  %v5395_v0 = vadd.f32 %v4886_v17, %v1406_v51 }
 0x422   :  { %v1673_v27 = vmul.f32 1.0614054, %v5149_v30  ;;  %v5398_v28 = vpop.eup %4097  ;;  %4115 = vpow2.f32 %v2074_v39  ;;  %v5401_v5 = vmul.f32 0.5, %v5339_v22  ;;  %v5404_v50 = vmul.f32 0.5, %v5342_v47 }
 0x423   :  { %6613 = vst [vmem:[#allocation75_spill] sm:$0xff] %v5395_v0  ;;  %v1568_v19 = vmul.f32 0.3275911, %v1536_v15  ;;  %v1984_v16 = vsub.f32 0.0, %v1536_v15  ;;  %4117 = vpow2.f32 %v2072_v34  ;;  %v5406_v56 = vmul.f32 0.70710677, %v1443_v8 }
 0x424   :  { %6614 = vst [vmem:[#allocation76_spill] sm:$0xff] %v5401_v5  ;;  %6615 = vst [vmem:[#allocation77_spill] sm:$0xff] %v5404_v50  ;;  %v1672_v31 = vmul.f32 1.0614054, %v5172_v58  ;;  %v5409_v17 = vpop.eup %4099  ;;  %4119 = vrcp.f32 %v1601_v63  ;;  %v5412_v21 = vmul.f32 0.70710677, %v5395_v0 }
 0x425   :  { %6616 = vst [vmem:[#allocation78_spill] sm:$0xff] %v5406_v56  ;;  %v1600_v51 = vadd.f32 1.0, %v1568_v19  ;;  %v2016_v2 = vmul.f32 %v1984_v16, %v1536_v15  ;;  %v5414_v22 = vpop.eup %4101  ;;  %4121 = vpow2.f32 %v2078_v18  ;;  %v5416_v55 = vmul.f32 0.5, %v1440_v42 }
 0x426   :  { %6617 = vst [vmem:[#allocation79_spill] sm:$0xff] %v5412_v21  ;;  %v1539_v47 = vand.u32 2147483647, %v5406_v56  ;;  %v1705_v34 = vadd.f32 -1.4531521, %v1673_v27  ;;  %v5419_v40 = vpop.eup %4103  ;;  %v5421_v38 = vmul.f32 0.5, %v1443_v8 }
 0x427   :  { %6618 = vst [vmem:[#allocation80_spill] sm:$0xff] %v5416_v55  ;;  %4123 = vrcp.f32 %v1600_v51  ;;  %v2076_v10 = vmul.f32 1.442695, %v2016_v2  ;;  %v1538_v39 = vand.u32 2147483647, %v5412_v21  ;;  %v5424_v63 = vpop.eup %4105  ;;  %vm2153_vm3 = vcmp.ge.f32.partialorder %v4993_v44, 0.0 }
 0x428   :  { %6619 = vst [vmem:[#allocation81_spill] sm:$0xff] %v5421_v38  ;;  %v1571_v15 = vmul.f32 0.3275911, %v1539_v47  ;;  %v1987_v19 = vsub.f32 0.0, %v1539_v47  ;;  %v1737_v16 = vmul.f32 %v5149_v30, %v1705_v34  ;;  %v1704_v18 = vadd.f32 -1.4531521, %v1672_v31  ;;  %v5428_v55 = vpop.eup %4107 }
 0x429   :  { %4125 = vpow2.f32 %v2076_v10  ;;  %v1570_v42 = vmul.f32 0.3275911, %v1538_v39  ;;  %v1986_v0 = vsub.f32 0.0, %v1538_v39  ;;  %v1675_v27 = vmul.f32 1.0614054, %v5186_v11 }
 0x42a   :  { %v1603_v51 = vadd.f32 1.0, %v1571_v15  ;;  %v2019_v2 = vmul.f32 %v1987_v19, %v1539_v47  ;;  %v1769_v8 = vadd.f32 1.4214138, %v1737_v16  ;;  %v1736_v38 = vmul.f32 %v5172_v58, %v1704_v18  ;;  %v5432_v5 = vpop.eup %4109 }
 0x42b   :  { %v1602_v50 = vadd.f32 1.0, %v1570_v42  ;;  %v2018_v21 = vmul.f32 %v1986_v0, %v1538_v39  ;;  %v1707_v56 = vadd.f32 -1.4531521, %v1675_v27  ;;  %v1674_v59 = vmul.f32 1.0614054, %v5193_v53  ;;  %6620 = vst [vmem:[#allocation82_spill] sm:$0xff] %v5432_v5 }
 0x42c   :  { %4127 = vrcp.f32 %v1603_v51  ;;  %v2082_v31 = vmul.f32 1.442695, %v2019_v2  ;;  %v1801_v34 = vmul.f32 %v5149_v30, %v1769_v8  ;;  %v1768_v10 = vadd.f32 1.4214138, %v1736_v38  ;;  %v5435_v61 = vpop.eup %4111 }
 0x42d   :  { %4129 = vrcp.f32 %v1602_v50  ;;  %v2080_v15 = vmul.f32 1.442695, %v2018_v21  ;;  %v1739_v47 = vmul.f32 %v5186_v11, %v1707_v56  ;;  %v1706_v19 = vadd.f32 -1.4531521, %v1674_v59  ;;  %v5438_v16 = vpop.eup %4113 }
 0x42e   :  { %4131 = vpow2.f32 %v2082_v31  ;;  %v1833_v0 = vadd.f32 -0.28449672, %v1801_v34  ;;  %v1800_v39 = vmul.f32 %v5172_v58, %v1768_v10  ;;  %v1677_v18 = vmul.f32 1.0614054, %v5229_v6 }
 0x42f   :  { %4133 = vpow2.f32 %v2080_v15  ;;  %v1771_v42 = vadd.f32 1.4214138, %v1739_v47  ;;  %v1738_v27 = vmul.f32 %v5193_v53, %v1706_v19  ;;  %v1676_v38 = vmul.f32 1.0614054, %v5241_v46  ;;  %v5444_v51 = vpop.eup %4115 }
 0x430   :  { %6621 = vst [vmem:[#allocation83_spill] sm:$0xff] %v5444_v51  ;;  %v1865_v50 = vmul.f32 %v5149_v30, %v1833_v0  ;;  %v1832_v56 = vadd.f32 -0.28449672, %v1800_v39  ;;  %v1709_v59 = vadd.f32 -1.4531521, %v1677_v18  ;;  %v5448_v2 = vpop.eup %4117  ;;  %vm2152_vm4 = vcmp.ge.f32.partialorder %v5015_v52, 0.0 }
 0x431   :  { %v1682_v21 = vmul.f32 1.0614054, %v5313_v3  ;;  %6622 = vst [vmem:[#allocation84_spill] sm:$0xff] %v5448_v2  ;;  %v1803_v8 = vmul.f32 %v5186_v11, %v1771_v42  ;;  %v1770_v31 = vadd.f32 1.4214138, %v1738_v27  ;;  %v5452_v15 = vpop.eup %4119  ;;  %vm2155_vm5 = vcmp.ge.f32.partialorder %v5033_v24, 0.0 }
 0x432   :  { %v1708_v34 = vadd.f32 -1.4531521, %v1676_v38  ;;  %v1679_v10 = vmul.f32 1.0614054, %v5249_v41  ;;  %6623 = vst [vmem:[#allocation85_spill] sm:$0xff] %v5452_v15  ;;  %v1864_v19 = vmul.f32 %v5172_v58, %v1832_v56  ;;  %v1741_v51 = vmul.f32 %v5229_v6, %v1709_v59  ;;  %v5456_v39 = vpop.eup %4121 }
 0x433   :  { %v1897_v47 = vadd.f32 0.2548296, %v1865_v50  ;;  %v1714_v0 = vadd.f32 -1.4531521, %v1682_v21  ;;  %6624 = vst [vmem:[#allocation86_spill] sm:$0xff] %v5456_v39  ;;  %v1802_v2 = vmul.f32 %v5193_v53, %v1770_v31  ;;  %vm2154_vm6 = vcmp.ge.f32.partialorder %v5041_v25, 0.0 }
 0x434   :  { %v1835_v18 = vadd.f32 -0.28449672, %v1803_v8  ;;  %v1740_v42 = vmul.f32 %v5241_v46, %v1708_v34  ;;  %v1711_v27 = vadd.f32 -1.4531521, %v1679_v10  ;;  %v5461_v38 = vpop.eup %4123  ;;  %v1896_v50 = vadd.f32 0.2548296, %v1864_v19 }
 0x435   :  { %6625 = vst [vmem:[#allocation87_spill] sm:$0xff] %v5461_v38  ;;  %v1929_v15 = vmul.f32 %v5149_v30, %v1897_v47  ;;  %v1773_v5 = vadd.f32 1.4214138, %v1741_v51  ;;  %v1746_v56 = vmul.f32 %v5313_v3, %v1714_v0  ;;  %v1834_v21 = vadd.f32 -0.28449672, %v1802_v2  ;;  %v6631_v25 = vld [vmem:[#allocation32_spill] sm:$0xff] }
 0x436   :  { %v1867_v59 = vmul.f32 %v5186_v11, %v1835_v18  ;;  %v1772_v39 = vadd.f32 1.4214138, %v1740_v42  ;;  %v1743_v8 = vmul.f32 %v5249_v41, %v1711_v27  ;;  %v5468_v31 = vpop.eup %4125  ;;  %v1928_v10 = vmul.f32 %v5172_v58, %v1896_v50 }
 0x437   :  { %v2089_v34 = vmul.f32 %v5163_v35, %v1929_v15  ;;  %v1805_v30 = vmul.f32 %v5229_v6, %v1773_v5  ;;  %v1778_v47 = vadd.f32 1.4214138, %v1746_v56  ;;  %v1866_v19 = vmul.f32 %v5193_v53, %v1834_v21 }
 0x438   :  { %v1899_v51 = vadd.f32 0.2548296, %v1867_v59  ;;  %v1804_v0 = vmul.f32 %v5241_v46, %v1772_v39  ;;  %v1775_v38 = vadd.f32 1.4214138, %v1743_v8  ;;  %v2088_v18 = vmul.f32 %v5180_v36, %v1928_v10 }
 0x439   :  { %v2121_v2 = vsub.f32 1.0, %v2089_v34  ;;  %v1837_v42 = vadd.f32 -0.28449672, %v1805_v30  ;;  %v1810_v27 = vmul.f32 %v5313_v3, %v1778_v47  ;;  %v5478_v35 = vpop.eup %4127  ;;  %v1898_v5 = vadd.f32 0.2548296, %v1866_v19 }
 0x43a   :  { %v1931_v58 = vmul.f32 %v5186_v11, %v1899_v51  ;;  %v1836_v15 = vadd.f32 -0.28449672, %v1804_v0  ;;  %v1807_v50 = vmul.f32 %v5249_v41, %v1775_v38  ;;  %v5482_v56 = vpop.eup %4129  ;;  %v2120_v59 = vsub.f32 1.0, %v2088_v18  ;;  %v6626_v18 = vld [vmem:[#allocation8_spill] sm:$0xff] }
 0x43b   :  { %v2185_v39 = vsub.f32 0.0, %v2121_v2  ;;  %v1869_v36 = vmul.f32 %v5229_v6, %v1837_v42  ;;  %v1842_v21 = vadd.f32 -0.28449672, %v1810_v27  ;;  %v5486_v8 = vpop.eup %4131  ;;  %v1930_v11 = vmul.f32 %v5193_v53, %v1898_v5 }
 0x43c   :  { %v2091_v34 = vmul.f32 %v5204_v13, %v1931_v58  ;;  %v1868_v10 = vmul.f32 %v5241_v46, %v1836_v15  ;;  %v1839_v30 = vadd.f32 -0.28449672, %v1807_v50  ;;  %v5491_v38 = vpop.eup %4133  ;;  %v2184_v51 = vsub.f32 0.0, %v2120_v59 }
 0x43d   :  { %v2217_v47 = vsel %vm2153_vm3, %v2121_v2, %v2185_v39  ;;  %v1901_v19 = vadd.f32 0.2548296, %v1869_v36  ;;  %v1874_v0 = vmul.f32 %v5313_v3, %v1842_v21  ;;  %vm2157_vm8 = vcmp.ge.f32.partialorder %v6626_v18, 0.0  ;;  %v6627_v2 = vld [vmem:[#allocation10_spill] sm:$0xff] }
 0x43e   :  { %v2249_v42 = vadd.f32 1.0, %v2217_v47  ;;  %v2123_v27 = vsub.f32 1.0, %v2091_v34  ;;  %v2090_v13 = vmul.f32 %v5217_v37, %v1930_v11  ;;  %v1900_v58 = vadd.f32 0.2548296, %v1868_v10 }
 0x43f   :  { %v2216_v53 = vsel %vm2152_vm4, %v2120_v59, %v2184_v51  ;;  %v1933_v5 = vmul.f32 %v5229_v6, %v1901_v19  ;;  %v1906_v15 = vadd.f32 0.2548296, %v1874_v0  ;;  %v1871_v44 = vmul.f32 %v5249_v41, %v1839_v30  ;;  %v6628_v6 = vld [vmem:[#allocation18_spill] sm:$0xff] }
 0x440   :  { %vm2156_vm9 = vcmp.ge.f32.partialorder %v6627_v2, 0.0  ;;  %v2281_v50 = vmul.f32 %v2249_v42, %v5118_v62  ;;  %v2248_v39 = vadd.f32 1.0, %v2216_v53  ;;  %v2187_v36 = vsub.f32 0.0, %v2123_v27  ;;  %v6633_v2 = vld [vmem:[#allocation35_spill] sm:$0xff] }
 0x441   :  { %v2122_v21 = vsub.f32 1.0, %v2090_v13  ;;  %vm2162_vm10 = vcmp.ge.f32.partialorder %v5166_v54, 0.0  ;;  %v2093_v37 = vmul.f32 %v5237_v45, %v1933_v5  ;;  %v1932_v34 = vmul.f32 %v5241_v46, %v1900_v58  ;;  %v6629_v58 = vld [vmem:[#allocation46_spill] sm:$0xff]  ;;  %v6630_v5 = vld [vmem:[#allocation47_spill] sm:$0xff] }
 0x442   :  { %v1938_v52 = vmul.f32 %v5313_v3, %v1906_v15  ;;  %v1903_v59 = vadd.f32 0.2548296, %v1871_v44  ;;  %v5509_v11 = vmul.f32 %v6628_v6, %v2281_v50  ;;  %v2280_v10 = vmul.f32 %v2248_v39, %v5136_v43 }
 0x443   :  { %v2219_v62 = vsel %vm2155_vm5, %v2123_v27, %v2187_v36  ;;  %v2186_v30 = vsub.f32 0.0, %v2122_v21  ;;  %vm2159_vm11 = vcmp.ge.f32.partialorder %v5084_v14, 0.0  ;;  %v2125_v51 = vsub.f32 1.0, %v2093_v37 }
 0x444   :  { %v2251_v47 = vadd.f32 1.0, %v2219_v62  ;;  %v2092_v45 = vmul.f32 %v5245_v4, %v1932_v34  ;;  %v2098_v46 = vmul.f32 %v5318_v48, %v1938_v52  ;;  %v2368_v3 = vsel %vm2352_vm7, %v5509_v11, 0.0  ;;  %v6632_v62 = vld [vmem:[#allocation34_spill] sm:$0xff] }
 0x445   :  { %v5520_v19 = vmul.f32 %v6628_v6, %v2280_v10  ;;  %v2218_v43 = vsel %vm2154_vm6, %v2122_v21, %v2186_v30  ;;  %v1935_v24 = vmul.f32 %v5249_v41, %v1903_v59  ;;  %2369 = vadd.xlane.f32.xlu1 %v2368_v3  ;;  %v2189_v27 = vsub.f32 0.0, %v2125_v51 }
 0x446   :  { %v2283_v0 = vmul.f32 %v2251_v47, %v5175_v60  ;;  %v2250_v42 = vadd.f32 1.0, %v2218_v43  ;;  %v2124_v13 = vsub.f32 1.0, %v2092_v45  ;;  %v2130_v48 = vsub.f32 1.0, %v2098_v46 }
 0x447   :  { %v2365_v4 = vsel %vm2352_vm7, %v5520_v19, 0.0  ;;  %v2095_v53 = vmul.f32 %v6629_v58, %v1935_v24  ;;  %v1678_v15 = vmul.f32 1.0614054, %v6630_v5  ;;  %v2221_v41 = vsel %vm2157_vm8, %v2125_v51, %v2189_v27 }
 0x448   :  { %v5531_v44 = vmul.f32 %v6628_v6, %v2283_v0  ;;  %v2282_v50 = vmul.f32 %v2250_v42, %v6631_v25  ;;  %v2188_v60 = vsub.f32 0.0, %v2124_v13  ;;  %v2253_v39 = vadd.f32 1.0, %v2221_v41 }
 0x449   :  { %v2194_v36 = vsub.f32 0.0, %v2130_v48  ;;  %v2127_v21 = vsub.f32 1.0, %v2095_v53  ;;  %v1710_v37 = vadd.f32 -1.4531521, %v1678_v15  ;;  %2366 = vadd.xlane.f32.xlu1 %v2365_v4  ;;  %v1681_v10 = vmul.f32 1.0614054, %v5272_v33 }
 0x44a   :  { %v2374_v34 = vsel %vm2352_vm7, %v5531_v44, 0.0  ;;  %v5539_v52 = vmul.f32 %v6628_v6, %v2282_v50  ;;  %v2220_v59 = vsel %vm2156_vm9, %v2124_v13, %v2188_v60  ;;  %v2285_v18 = vmul.f32 %v2253_v39, %v6632_v62  ;;  %v6634_v50 = vld [vmem:[#allocation36_spill] sm:$0xff] }
 0x44b   :  { %v2252_v30 = vadd.f32 1.0, %v2220_v59  ;;  %v2226_v47 = vsel %vm2162_vm10, %v2130_v48, %v2194_v36  ;;  %v2191_v51 = vsub.f32 0.0, %v2127_v21  ;;  %v1742_v3 = vmul.f32 %v6630_v5, %v1710_v37 }
 0x44c   :  { %v2371_v45 = vsel %vm2352_vm7, %v5539_v52, 0.0  ;;  %v2258_v46 = vadd.f32 1.0, %v2226_v47  ;;  %v1713_v43 = vadd.f32 -1.4531521, %v1681_v10  ;;  %v5551_v24 = vmul.f32 %v6628_v6, %v2285_v18 }
 0x44d   :  { %v2284_v0 = vmul.f32 %v2252_v30, %v6633_v2  ;;  %v2223_v42 = vsel %vm2159_vm11, %v2127_v21, %v2191_v51  ;;  %v1689_v27 = vmul.f32 1.0614054, %v5376_v20  ;;  %2375 = vadd.xlane.f32.xlu1 %v2374_v34  ;;  %v1774_v4 = vadd.f32 1.4214138, %v1742_v3  ;;  %v6635_v51 = vld [vmem:[#allocation55_spill] sm:$0xff] }
 0x44e   :  { %v2290_v54 = vmul.f32 %v2258_v46, %v5268_v9  ;;  %v2255_v13 = vadd.f32 1.0, %v2223_v42  ;;  %v1745_v48 = vmul.f32 %v5272_v33, %v1713_v43  ;;  %v2380_v58 = vsel %vm2352_vm7, %v5551_v24, 0.0 }
 0x44f   :  { %v5562_v53 = vmul.f32 %v6628_v6, %v2284_v0  ;;  %v1721_v15 = vadd.f32 -1.4531521, %v1689_v27  ;;  %v1680_v25 = vmul.f32 1.0614054, %v5294_v23  ;;  %v1806_v9 = vmul.f32 %v6630_v5, %v1774_v4 }
 0x450   :  { %v5566_v14 = vmul.f32 %v6628_v6, %v2290_v54  ;;  %v2287_v41 = vmul.f32 %v2255_v13, %v6634_v50  ;;  %v1777_v60 = vadd.f32 1.4214138, %v1745_v48  ;;  %v1688_v37 = vmul.f32 1.0614054, %v5383_v12  ;;  %v6637_v50 = vld [vmem:[#allocation14_spill] sm:$0xff] }
 0x451   :  { %v2377_v39 = vsel %vm2352_vm7, %v5562_v53, 0.0  ;;  %v1753_v36 = vmul.f32 %v5376_v20, %v1721_v15  ;;  %v1712_v21 = vadd.f32 -1.4531521, %v1680_v25  ;;  %2372 = vadd.xlane.f32.xlu1 %v2371_v45  ;;  %v1838_v10 = vadd.f32 -0.28449672, %v1806_v9  ;;  %v6636_v15 = vld [vmem:[#allocation24_spill] sm:$0xff] }
 0x452   :  { %v2395_v34 = vsel %vm2352_vm7, %v5566_v14, 0.0  ;;  %v5577_v59 = vmul.f32 %v6628_v6, %v2287_v41  ;;  %v1809_v62 = vmul.f32 %v5272_v33, %v1777_v60  ;;  %v1720_v47 = vadd.f32 -1.4531521, %v1688_v37 }
 0x453   :  { %2396 = vadd.xlane.f32.xlu0 %v2395_v34  ;;  %v1785_v18 = vadd.f32 1.4214138, %v1753_v36  ;;  %v1744_v30 = vmul.f32 %v5294_v23, %v1712_v21  ;;  %v1683_v46 = vmul.f32 1.0614054, %v6635_v51  ;;  %v1870_v45 = vmul.f32 %v6630_v5, %v1838_v10  ;;  %v6638_v10 = vld [vmem:[#allocation25_spill] sm:$0xff] }
 0x454   :  { %v2386_v3 = vsel %vm2352_vm7, %v5577_v59, 0.0  ;;  %v1841_v43 = vadd.f32 -0.28449672, %v1809_v62  ;;  %v1691_v2 = vmul.f32 1.0614054, %v5386_v32  ;;  %v1752_v27 = vmul.f32 %v5383_v12, %v1720_v47 }
 0x455   :  { %v1817_v0 = vmul.f32 %v5376_v20, %v1785_v18  ;;  %v1776_v42 = vadd.f32 1.4214138, %v1744_v30  ;;  %v1715_v54 = vadd.f32 -1.4531521, %v1683_v46  ;;  %2381 = vadd.xlane.f32.xlu1 %v2380_v58  ;;  %v1902_v13 = vadd.f32 0.2548296, %v1870_v45 }
 0x456   :  { %v1873_v4 = vmul.f32 %v5272_v33, %v1841_v43  ;;  %v1723_v48 = vadd.f32 -1.4531521, %v1691_v2  ;;  %v1671_v25 = vmul.f32 1.0614054, %v6636_v15  ;;  %vm2158_vm12 = vcmp.ge.f32.partialorder %v6637_v50, 0.0  ;;  %v6639_v46 = vld [vmem:[#allocation50_spill] sm:$0xff] }
 0x457   :  { %v1849_v41 = vadd.f32 -0.28449672, %v1817_v0  ;;  %v1808_v9 = vmul.f32 %v5294_v23, %v1776_v42  ;;  %v1784_v60 = vadd.f32 1.4214138, %v1752_v27  ;;  %v1747_v36 = vmul.f32 %v6635_v51, %v1715_v54 }
 0x458   :  { %v1934_v21 = vmul.f32 %v6630_v5, %v1902_v13  ;;  %v1905_v37 = vadd.f32 0.2548296, %v1873_v4  ;;  %v1755_v34 = vmul.f32 %v5386_v32, %v1723_v48  ;;  %v1703_v58 = vadd.f32 -1.4531521, %v1671_v25  ;;  %v6640_v13 = vld [vmem:[#allocation44_spill] sm:$0xff]  ;;  %v6641_v48 = vld [vmem:[#allocation53_spill] sm:$0xff] }
 0x459   :  { %vm2161_vm13 = vcmp.ge.f32.partialorder %v6638_v10, 0.0  ;;  %v1881_v62 = vmul.f32 %v5376_v20, %v1849_v41  ;;  %v1840_v18 = vadd.f32 -0.28449672, %v1808_v9  ;;  %v1816_v30 = vmul.f32 %v5383_v12, %v1784_v60  ;;  %2378 = vadd.xlane.f32.xlu1 %v2377_v39 }
 0x45a   :  { %v1779_v47 = vadd.f32 1.4214138, %v1747_v36  ;;  %v2094_v45 = vmul.f32 %v6639_v46, %v1934_v21  ;;  %v1937_v43 = vmul.f32 %v5272_v33, %v1905_v37  ;;  %v1787_v2 = vadd.f32 1.4214138, %v1755_v34  ;;  %v6642_v21 = vld [vmem:[#allocation29_spill] sm:$0xff] }
 0x45b   :  { %v1735_v5 = vmul.f32 %v6636_v15, %v1703_v58  ;;  %v1913_v0 = vadd.f32 0.2548296, %v1881_v62  ;;  %v1872_v42 = vmul.f32 %v5294_v23, %v1840_v18  ;;  %v1848_v27 = vadd.f32 -0.28449672, %v1816_v30 }
 0x45c   :  { %v1811_v54 = vmul.f32 %v6635_v51, %v1779_v47  ;;  %vm2169_vm14 = vcmp.ge.f32.partialorder %v6640_v13, 0.0  ;;  %v2126_v4 = vsub.f32 1.0, %v2094_v45  ;;  %v2097_v25 = vmul.f32 %v6641_v48, %v1937_v43 }
 0x45d   :  { %v1819_v39 = vmul.f32 %v5386_v32, %v1787_v2  ;;  %v1767_v41 = vadd.f32 1.4214138, %v1735_v5  ;;  %v1945_v9 = vmul.f32 %v5376_v20, %v1913_v0  ;;  %v1904_v33 = vadd.f32 0.2548296, %v1872_v42  ;;  %2387 = vadd.xlane.f32.xlu1 %v2386_v3  ;;  %v6643_v3 = vld [vmem:[#allocation52_spill] sm:$0xff]  ;;  %v6644_v42 = vld [vmem:[#allocation58_spill] sm:$0xff] }
 0x45e   :  { %v1880_v60 = vmul.f32 %v5383_v12, %v1848_v27  ;;  %v1843_v36 = vadd.f32 -0.28449672, %v1811_v54  ;;  %vm2160_vm15 = vcmp.ge.f32.partialorder %v6642_v21, 0.0  ;;  %v2190_v37 = vsub.f32 0.0, %v2126_v4  ;;  %v6653_v21 = vld [vmem:[#allocation48_spill] sm:$0xff] }
 0x45f   :  { %v2129_v34 = vsub.f32 1.0, %v2097_v25  ;;  %v1851_v58 = vadd.f32 -0.28449672, %v1819_v39  ;;  %v1799_v62 = vmul.f32 %v6636_v15, %v1767_v41  ;;  %v2105_v18 = vmul.f32 %v5378_v29, %v1945_v9  ;;  %v6646_v25 = vld [vmem:[#allocation37_spill] sm:$0xff] }
 0x460   :  { %v1936_v30 = vmul.f32 %v5294_v23, %v1904_v33  ;;  %v1912_v47 = vadd.f32 0.2548296, %v1880_v60  ;;  %v1875_v46 = vmul.f32 %v6635_v51, %v1843_v36  ;;  %v2222_v20 = vsel %vm2158_vm12, %v2126_v4, %v2190_v37  ;;  %v6645_v4 = vld [vmem:[#allocation30_spill] sm:$0xff] }
 0x461   :  { %v2193_v45 = vsub.f32 0.0, %v2129_v34  ;;  %v1883_v43 = vmul.f32 %v5386_v32, %v1851_v58  ;;  %v1831_v2 = vadd.f32 -0.28449672, %v1799_v62  ;;  %vm2168_vm2 = vcmp.ge.f32.partialorder %v6643_v3, 0.0  ;;  %v6647_v60 = vld [vmem:[#allocation54_spill] sm:$0xff]  ;;  %v6648_v58 = vld [vmem:[#allocation45_spill] sm:$0xff] }
 0x462   :  { %v2254_v5 = vadd.f32 1.0, %v2222_v20  ;;  %v2137_v0 = vsub.f32 1.0, %v2105_v18  ;;  %v2096_v27 = vmul.f32 %v6644_v42, %v1936_v30  ;;  %v1944_v29 = vmul.f32 %v5383_v12, %v1912_v47  ;;  %v6649_v47 = vld [vmem:[#allocation19_spill] sm:$0xff] }
 0x463   :  { %v2225_v23 = vsel %vm2161_vm13, %v2129_v34, %v2193_v45  ;;  %v1907_v54 = vadd.f32 0.2548296, %v1875_v46  ;;  %v1915_v48 = vadd.f32 0.2548296, %v1883_v43  ;;  %v1863_v50 = vmul.f32 %v6636_v15, %v1831_v2  ;;  %v6650_v45 = vld [vmem:[#allocation59_spill] sm:$0xff] }
 0x464   :  { %vm2163_vm3 = vcmp.ge.f32.partialorder %v6645_v4, 0.0  ;;  %v2286_v39 = vmul.f32 %v2254_v5, %v6646_v25  ;;  %v2257_v41 = vadd.f32 1.0, %v2225_v23  ;;  %v2201_v9 = vsub.f32 0.0, %v2137_v0  ;;  %v6651_v5 = vld [vmem:[#allocation51_spill] sm:$0xff] }
 0x465   :  { %v2128_v33 = vsub.f32 1.0, %v2096_v27  ;;  %vm2171_vm4 = vcmp.ge.f32.partialorder %v6647_v60, 0.0  ;;  %v2104_v36 = vmul.f32 %v5391_v57, %v1944_v29  ;;  %v1939_v12 = vmul.f32 %v6635_v51, %v1907_v54  ;;  %v6652_v54 = vld [vmem:[#allocation26_spill] sm:$0xff] }
 0x466   :  { %v1947_v10 = vmul.f32 %v5386_v32, %v1915_v48  ;;  %v1895_v37 = vadd.f32 0.2548296, %v1863_v50  ;;  %v5629_v34 = vmul.f32 %v6628_v6, %v2286_v39  ;;  %v2289_v62 = vmul.f32 %v2257_v41, %v6648_v58 }
 0x467   :  { %v2233_v18 = vsel %vm2169_vm14, %v2137_v0, %v2201_v9  ;;  %v2192_v30 = vsub.f32 0.0, %v2128_v33  ;;  %vm2151_vm5 = vcmp.ge.f32.partialorder %v6649_v47, 0.0  ;;  %v2136_v20 = vsub.f32 1.0, %v2104_v36 }
 0x468   :  { %v2265_v46 = vadd.f32 1.0, %v2233_v18  ;;  %v2099_v57 = vmul.f32 %v6650_v45, %v1939_v12  ;;  %v2107_v51 = vmul.f32 %v5398_v28, %v1947_v10  ;;  %v2383_v32 = vsel %vm2352_vm7, %v5629_v34, 0.0 }
 0x469   :  { %v5640_v43 = vmul.f32 %v6628_v6, %v2289_v62  ;;  %v2224_v2 = vsel %vm2160_vm15, %v2128_v33, %v2192_v30  ;;  %v1927_v13 = vmul.f32 %v6636_v15, %v1895_v37  ;;  %2384 = vadd.xlane.f32.xlu1 %v2383_v32  ;;  %v2200_v27 = vsub.f32 0.0, %v2136_v20  ;;  %v6654_v62 = vld [vmem:[#allocation27_spill] sm:$0xff] }
 0x46a   :  { %v2297_v0 = vmul.f32 %v2265_v46, %v6651_v5  ;;  %v2256_v42 = vadd.f32 1.0, %v2224_v2  ;;  %v2131_v29 = vsub.f32 1.0, %v2099_v57  ;;  %v2139_v23 = vsub.f32 1.0, %v2107_v51  ;;  %v6655_v2 = vld [vmem:[#allocation49_spill] sm:$0xff] }
 0x46b   :  { %v2392_v28 = vsel %vm2352_vm7, %v5640_v43, 0.0  ;;  %v2087_v48 = vmul.f32 %v6652_v54, %v1927_v13  ;;  %v1690_v50 = vmul.f32 1.0614054, %v5409_v17  ;;  %v2232_v15 = vsel %vm2168_vm2, %v2136_v20, %v2200_v27  ;;  %v6656_v54 = vld [vmem:[#allocation11_spill] sm:$0xff] }
 0x46c   :  { %v5651_v25 = vmul.f32 %v6628_v6, %v2297_v0  ;;  %v2288_v39 = vmul.f32 %v2256_v42, %v6653_v21  ;;  %v2195_v41 = vsub.f32 0.0, %v2131_v29  ;;  %v2264_v9 = vadd.f32 1.0, %v2232_v15 }
 0x46d   :  { %v2203_v33 = vsub.f32 0.0, %v2139_v23  ;;  %v2119_v36 = vsub.f32 1.0, %v2087_v48  ;;  %v1722_v12 = vadd.f32 -1.4531521, %v1690_v50  ;;  %2393 = vadd.xlane.f32.xlu1 %v2392_v28  ;;  %v1670_v18 = vmul.f32 1.0614054, %v6654_v62 }
 0x46e   :  { %v2416_v10 = vsel %vm2352_vm7, %v5651_v25, 0.0  ;;  %v5659_v37 = vmul.f32 %v6628_v6, %v2288_v39  ;;  %v2227_v58 = vsel %vm2163_vm3, %v2131_v29, %v2195_v41  ;;  %v2296_v3 = vmul.f32 %v2264_v9, %v5322_v49  ;;  %v6657_v50 = vld [vmem:[#allocation15_spill] sm:$0xff] }
 0x46f   :  { %2417 = vadd.xlane.f32.xlu0 %v2416_v10  ;;  %v2259_v30 = vadd.f32 1.0, %v2227_v58  ;;  %v2235_v46 = vsel %vm2171_vm4, %v2139_v23, %v2203_v33  ;;  %v2183_v20 = vsub.f32 0.0, %v2119_v36  ;;  %v1754_v51 = vmul.f32 %v5409_v17, %v1722_v12 }
 0x470   :  { %v2389_v45 = vsel %vm2352_vm7, %v5659_v37, 0.0  ;;  %v2267_v57 = vadd.f32 1.0, %v2235_v46  ;;  %v1702_v32 = vadd.f32 -1.4531521, %v1670_v18  ;;  %v5671_v4 = vmul.f32 %v6628_v6, %v2296_v3  ;;  %v6658_v46 = vld [vmem:[#allocation21_spill] sm:$0xff] }
 0x471   :  { %v2291_v13 = vmul.f32 %v2259_v30, %v6655_v2  ;;  %v2215_v49 = vsel %vm2151_vm5, %v2119_v36, %v2183_v20  ;;  %v1693_v5 = vmul.f32 1.0614054, %v5419_v40  ;;  %2390 = vadd.xlane.f32.xlu1 %v2389_v45  ;;  %v1786_v42 = vadd.f32 1.4214138, %v1754_v51 }
 0x472   :  { %v2299_v60 = vmul.f32 %v2267_v57, %v5324_v7  ;;  %v2247_v0 = vadd.f32 1.0, %v2215_v49  ;;  %v1734_v27 = vmul.f32 %v6654_v62, %v1702_v32  ;;  %v2413_v29 = vsel %vm2352_vm7, %v5671_v4, 0.0 }
 0x473   :  { %v5682_v28 = vmul.f32 %v6628_v6, %v2291_v13  ;;  %v1725_v23 = vadd.f32 -1.4531521, %v1693_v5  ;;  %v1669_v48 = vmul.f32 1.0614054, %v6656_v54  ;;  %2414 = vadd.xlane.f32.xlu0 %v2413_v29  ;;  %v1818_v7 = vmul.f32 %v5409_v17, %v1786_v42  ;;  %v6659_v29 = vld [vmem:[#allocation56_spill] sm:$0xff] }
 0x474   :  { %v5686_v47 = vmul.f32 %v6628_v6, %v2299_v60  ;;  %v2279_v21 = vmul.f32 %v2247_v0, %v6657_v50  ;;  %v1766_v39 = vadd.f32 1.4214138, %v1734_v27  ;;  %v1692_v33 = vmul.f32 1.0614054, %v5428_v55 }
 0x475   :  { %v2398_v15 = vsel %vm2352_vm7, %v5682_v28, 0.0  ;;  %v1757_v41 = vmul.f32 %v5419_v40, %v1725_v23  ;;  %v1701_v9 = vadd.f32 -1.4531521, %v1669_v48  ;;  %v1850_v10 = vadd.f32 -0.28449672, %v1818_v7 }
 0x476   :  { %2399 = vadd.xlane.f32.xlu1 %v2398_v15  ;;  %v2422_v36 = vsel %vm2352_vm7, %v5686_v47, 0.0  ;;  %v5697_v12 = vmul.f32 %v6628_v6, %v2279_v21  ;;  %v1798_v58 = vmul.f32 %v6654_v62, %v1766_v39  ;;  %v1724_v30 = vadd.f32 -1.4531521, %v1692_v33 }
 0x477   :  { %v1789_v18 = vadd.f32 1.4214138, %v1757_v41  ;;  %v1733_v3 = vmul.f32 %v6656_v54, %v1701_v9  ;;  %v1668_v20 = vmul.f32 1.0614054, %v6658_v46  ;;  %2423 = vadd.xlane.f32.xlu0 %v2422_v36  ;;  %v1882_v57 = vmul.f32 %v5409_v17, %v1850_v10  ;;  %v6660_v9 = vld [vmem:[#allocation20_spill] sm:$0xff] }
 0x478   :  { %v2362_v45 = vsel %vm2352_vm7, %v5697_v12, 0.0  ;;  %v1830_v51 = vadd.f32 -0.28449672, %v1798_v58  ;;  %v1695_v32 = vmul.f32 1.0614054, %v5435_v61  ;;  %v1756_v49 = vmul.f32 %v5428_v55, %v1724_v30 }
 0x479   :  { %v1821_v2 = vmul.f32 %v5419_v40, %v1789_v18  ;;  %v1765_v13 = vadd.f32 1.4214138, %v1733_v3  ;;  %v1700_v5 = vadd.f32 -1.4531521, %v1668_v20  ;;  %v1914_v60 = vadd.f32 0.2548296, %v1882_v57 }
 0x47a   :  { %2363 = vadd.xlane.f32.xlu1 %v2362_v45  ;;  %v1862_v0 = vmul.f32 %v6654_v62, %v1830_v51  ;;  %v1727_v42 = vadd.f32 -1.4531521, %v1695_v32  ;;  %v1694_v27 = vmul.f32 1.0614054, %v5438_v16  ;;  %vm2170_vm6 = vcmp.ge.f32.partialorder %v6659_v29, 0.0  ;;  %v6661_v32 = vld [vmem:[#allocation57_spill] sm:$0xff] }
 0x47b   :  { %v1853_v23 = vadd.f32 -0.28449672, %v1821_v2  ;;  %v1797_v48 = vmul.f32 %v6656_v54, %v1765_v13  ;;  %v1788_v50 = vadd.f32 1.4214138, %v1756_v49  ;;  %v1732_v21 = vmul.f32 %v6658_v46, %v1700_v5  ;;  %v6662_v13 = vld [vmem:[#allocation28_spill] sm:$0xff] }
 0x47c   :  { %v1946_v7 = vmul.f32 %v5409_v17, %v1914_v60  ;;  %v1894_v39 = vadd.f32 0.2548296, %v1862_v0  ;;  %v1759_v15 = vmul.f32 %v5435_v61, %v1727_v42  ;;  %v1726_v41 = vadd.f32 -1.4531521, %v1694_v27  ;;  %v6663_v27 = vld [vmem:[#allocation16_spill] sm:$0xff] }
 0x47d   :  { %vm2150_vm8 = vcmp.ge.f32.partialorder %v6660_v9, 0.0  ;;  %v1885_v33 = vmul.f32 %v5419_v40, %v1853_v23  ;;  %v1829_v36 = vadd.f32 -0.28449672, %v1797_v48  ;;  %v1820_v10 = vmul.f32 %v5428_v55, %v1788_v50 }
 0x47e   :  { %v1764_v58 = vadd.f32 1.4214138, %v1732_v21  ;;  %v2106_v18 = vmul.f32 %v5414_v22, %v1946_v7  ;;  %v1926_v3 = vmul.f32 %v6654_v62, %v1894_v39  ;;  %v1791_v30 = vadd.f32 1.4214138, %v1759_v15 }
 0x47f   :  { %v1758_v20 = vmul.f32 %v5438_v16, %v1726_v41  ;;  %v1917_v17 = vadd.f32 0.2548296, %v1885_v33  ;;  %v1861_v45 = vmul.f32 %v6656_v54, %v1829_v36  ;;  %v1852_v57 = vadd.f32 -0.28449672, %v1820_v10 }
 0x480   :  { %v1796_v51 = vmul.f32 %v6658_v46, %v1764_v58  ;;  %vm2173_vm9 = vcmp.ge.f32.partialorder %v6661_v32, 0.0  ;;  %v2138_v2 = vsub.f32 1.0, %v2106_v18  ;;  %v2086_v49 = vmul.f32 %v6662_v13, %v1926_v3  ;;  %v6664_v3 = vld [vmem:[#allocation13_spill] sm:$0xff] }
 0x481   :  { %v1823_v5 = vmul.f32 %v5435_v61, %v1791_v30  ;;  %v1790_v60 = vadd.f32 1.4214138, %v1758_v20  ;;  %v1949_v22 = vmul.f32 %v5419_v40, %v1917_v17  ;;  %v1893_v62 = vadd.f32 0.2548296, %v1861_v45  ;;  %v6665_v45 = vld [vmem:[#allocation17_spill] sm:$0xff] }
 0x482   :  { %v1884_v0 = vmul.f32 %v5428_v55, %v1852_v57  ;;  %v1828_v42 = vadd.f32 -0.28449672, %v1796_v51  ;;  %vm2149_vm10 = vcmp.ge.f32.partialorder %v6663_v27, 0.0  ;;  %v2202_v23 = vsub.f32 0.0, %v2138_v2 }
 0x483   :  { %v2118_v48 = vsub.f32 1.0, %v2086_v49  ;;  %v1855_v50 = vadd.f32 -0.28449672, %v1823_v5  ;;  %v1822_v21 = vmul.f32 %v5438_v16, %v1790_v60  ;;  %v2109_v7 = vmul.f32 %v5424_v63, %v1949_v22  ;;  %v6666_v49 = vld [vmem:[#allocation65_spill] sm:$0xff]  ;;  %v6667_v5 = vld [vmem:[#allocation82_spill] sm:$0xff] }
 0x484   :  { %v1925_v39 = vmul.f32 %v6656_v54, %v1893_v62  ;;  %v1916_v15 = vadd.f32 0.2548296, %v1884_v0  ;;  %v1860_v41 = vmul.f32 %v6658_v46, %v1828_v42  ;;  %v2234_v40 = vsel %vm2170_vm6, %v2138_v2, %v2202_v23  ;;  %v6668_v0 = vld [vmem:[#allocation23_spill] sm:$0xff] }
 0x485   :  { %v2182_v33 = vsub.f32 0.0, %v2118_v48  ;;  %v1887_v36 = vmul.f32 %v5435_v61, %v1855_v50  ;;  %v1854_v10 = vadd.f32 -0.28449672, %v1822_v21  ;;  %vm2172_vm11 = vcmp.ge.f32.partialorder %v5327_v1, 0.0 }
 0x486   :  { %v2266_v58 = vadd.f32 1.0, %v2234_v40  ;;  %v2141_v18 = vsub.f32 1.0, %v2109_v7  ;;  %v2085_v30 = vmul.f32 %v6664_v3, %v1925_v39  ;;  %v1948_v63 = vmul.f32 %v5428_v55, %v1916_v15  ;;  %v6670_v7 = vld [vmem:[#allocation22_spill] sm:$0xff]  ;;  %v6671_v15 = vld [vmem:[#allocation83_spill] sm:$0xff] }
 0x487   :  { %v2214_v54 = vsel %vm2150_vm8, %v2118_v48, %v2182_v33  ;;  %v1892_v20 = vadd.f32 0.2548296, %v1860_v41  ;;  %v1919_v17 = vadd.f32 0.2548296, %v1887_v36  ;;  %v1886_v29 = vmul.f32 %v5438_v16, %v1854_v10  ;;  %v6669_v48 = vld [vmem:[#allocation66_spill] sm:$0xff]  ;;  %v6672_v33 = vld [vmem:[#allocation69_spill] sm:$0xff] }
 0x488   :  { %vm2148_vm12 = vcmp.ge.f32.partialorder %v6665_v45, 0.0  ;;  %v2298_v57 = vmul.f32 %v2266_v58, %v5350_v26  ;;  %v2246_v51 = vadd.f32 1.0, %v2214_v54  ;;  %v2205_v2 = vsub.f32 0.0, %v2141_v18 }
 0x489   :  { %v2117_v13 = vsub.f32 1.0, %v2085_v30  ;;  %vm2175_vm13 = vcmp.ge.f32.partialorder %v6666_v49, 0.0  ;;  %v2108_v60 = vmul.f32 %v6667_v5, %v1948_v63  ;;  %v1924_v55 = vmul.f32 %v6658_v46, %v1892_v20  ;;  %v6673_v63 = vld [vmem:[#allocation84_spill] sm:$0xff]  ;;  %v6674_v20 = vld [vmem:[#allocation85_spill] sm:$0xff] }
 0x48a   :  { %v1951_v9 = vmul.f32 %v5435_v61, %v1919_v17  ;;  %v1918_v22 = vadd.f32 0.2548296, %v1886_v29  ;;  %v5749_v62 = vmul.f32 %v6628_v6, %v2298_v57  ;;  %v2278_v42 = vmul.f32 %v2246_v51, %v6668_v0  ;;  %v6675_v29 = vld [vmem:[#allocation9_spill] sm:$0xff]  ;;  %v6676_v0 = vld [vmem:[#allocation87_spill] sm:$0xff] }
 0x48b   :  { %v2237_v26 = vsel %vm2173_vm9, %v2141_v18, %v2205_v2  ;;  %v2181_v23 = vsub.f32 0.0, %v2117_v13  ;;  %vm2174_vm14 = vcmp.ge.f32.partialorder %v6669_v48, 0.0  ;;  %v2140_v21 = vsub.f32 1.0, %v2108_v60 }
 0x48c   :  { %v2269_v50 = vadd.f32 1.0, %v2237_v26  ;;  %v2084_v39 = vmul.f32 %v6670_v7, %v1924_v55  ;;  %v2111_v46 = vmul.f32 %v6671_v15, %v1951_v9  ;;  %v2419_v61 = vsel %vm2352_vm7, %v5749_v62, 0.0  ;;  %v6677_v26 = vld [vmem:[#allocation72_spill] sm:$0xff] }
 0x48d   :  { %v5760_v41 = vmul.f32 %v6628_v6, %v2278_v42  ;;  %v2213_v40 = vsel %vm2149_vm10, %v2117_v13, %v2181_v23  ;;  %v1950_v32 = vmul.f32 %v5438_v16, %v1918_v22  ;;  %2420 = vadd.xlane.f32.xlu0 %v2419_v61  ;;  %v2204_v58 = vsub.f32 0.0, %v2140_v21  ;;  %v6678_v61 = vld [vmem:[#allocation12_spill] sm:$0xff] }
 0x48e   :  { %v2301_v36 = vmul.f32 %v2269_v50, %v6672_v33  ;;  %v2245_v10 = vadd.f32 1.0, %v2213_v40  ;;  %v2116_v18 = vsub.f32 1.0, %v2084_v39  ;;  %v2143_v30 = vsub.f32 1.0, %v2111_v46  ;;  %v6679_v33 = vld [vmem:[#allocation74_spill] sm:$0xff] }
 0x48f   :  { %v2359_v3 = vsel %vm2352_vm7, %v5760_v41, 0.0  ;;  %v2110_v54 = vmul.f32 %v6673_v63, %v1950_v32  ;;  %v1697_v17 = vmul.f32 1.0614054, %v6674_v20  ;;  %v2236_v57 = vsel %vm2172_vm11, %v2140_v21, %v2204_v58 }
 0x490   :  { %2360 = vadd.xlane.f32.xlu1 %v2359_v3  ;;  %v5771_v27 = vmul.f32 %v6628_v6, %v2301_v36  ;;  %v2277_v16 = vmul.f32 %v2245_v10, %v6675_v29  ;;  %v2180_v51 = vsub.f32 0.0, %v2116_v18  ;;  %v2268_v2 = vadd.f32 1.0, %v2236_v57 }
 0x491   :  { %v2207_v13 = vsub.f32 0.0, %v2143_v30  ;;  %v2142_v5 = vsub.f32 1.0, %v2110_v54  ;;  %v1729_v60 = vadd.f32 -1.4531521, %v1697_v17  ;;  %v1696_v42 = vmul.f32 1.0614054, %v6676_v0 }
 0x492   :  { %v2428_v55 = vsel %vm2352_vm7, %v5771_v27, 0.0  ;;  %v5779_v9 = vmul.f32 %v6628_v6, %v2277_v16  ;;  %v2212_v22 = vsel %vm2148_vm12, %v2116_v18, %v2180_v51  ;;  %v2300_v1 = vmul.f32 %v2268_v2, %v6677_v26  ;;  %v6680_v17 = vld [vmem:[#allocation76_spill] sm:$0xff] }
 0x493   :  { %2429 = vadd.xlane.f32.xlu0 %v2428_v55  ;;  %v2244_v23 = vadd.f32 1.0, %v2212_v22  ;;  %v2239_v50 = vsel %vm2175_vm13, %v2143_v30, %v2207_v13  ;;  %v2206_v21 = vsub.f32 0.0, %v2142_v5  ;;  %v1761_v15 = vmul.f32 %v6674_v20, %v1729_v60 }
 0x494   :  { %v2356_v7 = vsel %vm2352_vm7, %v5779_v9, 0.0  ;;  %v2271_v39 = vadd.f32 1.0, %v2239_v50  ;;  %v1728_v46 = vadd.f32 -1.4531521, %v1696_v42  ;;  %v5791_v45 = vmul.f32 %v6628_v6, %v2300_v1 }
 0x495   :  { %2357 = vadd.xlane.f32.xlu1 %v2356_v7  ;;  %v2276_v40 = vmul.f32 %v2244_v23, %v6678_v61  ;;  %v2238_v32 = vsel %vm2174_vm14, %v2142_v5, %v2206_v21  ;;  %v1699_v49 = vmul.f32 1.0614054, %v5478_v35  ;;  %v1793_v58 = vadd.f32 1.4214138, %v1761_v15  ;;  %v6681_v5 = vld [vmem:[#allocation63_spill] sm:$0xff]  ;;  %v6682_v21 = vld [vmem:[#allocation70_spill] sm:$0xff] }
 0x496   :  { %v2303_v36 = vmul.f32 %v2271_v39, %v6679_v33  ;;  %v2270_v10 = vadd.f32 1.0, %v2238_v32  ;;  %v1760_v18 = vmul.f32 %v6676_v0, %v1728_v46  ;;  %v2425_v3 = vsel %vm2352_vm7, %v5791_v45, 0.0  ;;  %v6683_v61 = vld [vmem:[#allocation60_spill] sm:$0xff] }
 0x497   :  { %v5802_v30 = vmul.f32 %v6628_v6, %v2276_v40  ;;  %v1731_v63 = vadd.f32 -1.4531521, %v1699_v49  ;;  %v1698_v54 = vmul.f32 1.0614054, %v5482_v56  ;;  %2426 = vadd.xlane.f32.xlu0 %v2425_v3  ;;  %v1825_v16 = vmul.f32 %v6674_v20, %v1793_v58  ;;  %v6684_v3 = vld [vmem:[#allocation62_spill] sm:$0xff] }
 0x498   :  { %v5806_v48 = vmul.f32 %v6628_v6, %v2303_v36  ;;  %v2302_v29 = vmul.f32 %v2270_v10, %v6680_v17  ;;  %v1792_v57 = vadd.f32 1.4214138, %v1760_v18  ;;  %v1687_v60 = vmul.f32 1.0614054, %v6681_v5 }
 0x499   :  { %v2353_v51 = vsel %vm2352_vm7, %v5802_v30, 0.0  ;;  %v1763_v2 = vmul.f32 %v5478_v35, %v1731_v63  ;;  %v1730_v13 = vadd.f32 -1.4531521, %v1698_v54  ;;  %v1857_v42 = vadd.f32 -0.28449672, %v1825_v16  ;;  %v6685_v54 = vld [vmem:[#allocation67_spill] sm:$0xff] }
 0x49a   :  { %2354 = vadd.xlane.f32.xlu1 %v2353_v51  ;;  %v2434_v55 = vsel %vm2352_vm7, %v5806_v48, 0.0  ;;  %v5817_v22 = vmul.f32 %v6628_v6, %v2302_v29  ;;  %v1824_v26 = vmul.f32 %v6676_v0, %v1792_v57  ;;  %v1719_v50 = vadd.f32 -1.4531521, %v1687_v60 }
 0x49b   :  { %v1795_v1 = vadd.f32 1.4214138, %v1763_v2  ;;  %v1762_v23 = vmul.f32 %v5482_v56, %v1730_v13  ;;  %v1686_v7 = vmul.f32 1.0614054, %v6682_v21  ;;  %2435 = vadd.xlane.f32.xlu0 %v2434_v55  ;;  %v1889_v15 = vmul.f32 %v6674_v20, %v1857_v42  ;;  %v6686_v55 = vld [vmem:[#allocation73_spill] sm:$0xff] }
 0x49c   :  { %v2431_v39 = vsel %vm2352_vm7, %v5817_v22, 0.0  ;;  %v1856_v46 = vadd.f32 -0.28449672, %v1824_v26  ;;  %v1685_v40 = vmul.f32 1.0614054, %v6683_v61  ;;  %v1751_v33 = vmul.f32 %v6681_v5, %v1719_v50  ;;  %v6687_v50 = vld [vmem:[#allocation86_spill] sm:$0xff] }
 0x49d   :  { %v1827_v32 = vmul.f32 %v5478_v35, %v1795_v1  ;;  %v1794_v49 = vadd.f32 1.4214138, %v1762_v23  ;;  %v1718_v36 = vadd.f32 -1.4531521, %v1686_v7  ;;  %v1921_v10 = vadd.f32 0.2548296, %v1889_v15 }
 0x49e   :  { %v1888_v58 = vmul.f32 %v6676_v0, %v1856_v46  ;;  %v1717_v18 = vadd.f32 -1.4531521, %v1685_v40  ;;  %v1684_v63 = vmul.f32 1.0614054, %v6684_v3  ;;  %vm2177_vm15 = vcmp.ge.f32.partialorder %v6685_v54, 0.0 }
 0x49f   :  { %v1859_v17 = vadd.f32 -0.28449672, %v1827_v32  ;;  %v1826_v29 = vmul.f32 %v5482_v56, %v1794_v49  ;;  %v1783_v16 = vadd.f32 1.4214138, %v1751_v33  ;;  %v1750_v57 = vmul.f32 %v6682_v21, %v1718_v36  ;;  %2432 = vadd.xlane.f32.xlu0 %v2431_v39  ;;  %v6688_v33 = vld [vmem:[#allocation78_spill] sm:$0xff] }
 0x4a0   :  { %v1953_v51 = vmul.f32 %v6674_v20, %v1921_v10  ;;  %v1920_v2 = vadd.f32 0.2548296, %v1888_v58  ;;  %v1749_v13 = vmul.f32 %v6683_v61, %v1717_v18  ;;  %v1716_v60 = vadd.f32 -1.4531521, %v1684_v63 }
 0x4a1   :  { %vm2176_vm2 = vcmp.ge.f32.partialorder %v6686_v55, 0.0  ;;  %v1891_v42 = vmul.f32 %v5478_v35, %v1859_v17  ;;  %v1858_v26 = vadd.f32 -0.28449672, %v1826_v29  ;;  %v1815_v1 = vmul.f32 %v6681_v5, %v1783_v16  ;;  %v6689_v16 = vld [vmem:[#allocation79_spill] sm:$0xff]  ;;  %v6692_v55 = vld [vmem:[#allocation80_spill] sm:$0xff] }
 0x4a2   :  { %v1782_v23 = vadd.f32 1.4214138, %v1750_v57  ;;  %v2113_v7 = vmul.f32 %v6687_v50, %v1953_v51  ;;  %v1952_v15 = vmul.f32 %v6676_v0, %v1920_v2  ;;  %v1781_v46 = vadd.f32 1.4214138, %v1749_v13 }
 0x4a3   :  { %v1748_v39 = vmul.f32 %v6684_v3, %v1716_v60  ;;  %v1923_v20 = vadd.f32 0.2548296, %v1891_v42  ;;  %v1890_v40 = vmul.f32 %v5482_v56, %v1858_v26  ;;  %v1847_v32 = vadd.f32 -0.28449672, %v1815_v1 }
 0x4a4   :  { %v1814_v49 = vmul.f32 %v6682_v21, %v1782_v23  ;;  %vm2179_vm3 = vcmp.ge.f32.partialorder %v6688_v33, 0.0  ;;  %v2145_v36 = vsub.f32 1.0, %v2113_v7  ;;  %v2112_v10 = vmul.f32 %v5468_v31, %v1952_v15  ;;  %v6695_v33 = vld [vmem:[#allocation81_spill] sm:$0xff] }
 0x4a5   :  { %v1813_v58 = vmul.f32 %v6683_v61, %v1781_v46  ;;  %v1780_v18 = vadd.f32 1.4214138, %v1748_v39  ;;  %v1955_v63 = vmul.f32 %v5478_v35, %v1923_v20  ;;  %v1922_v0 = vadd.f32 0.2548296, %v1890_v40 }
 0x4a6   :  { %v1879_v17 = vmul.f32 %v6681_v5, %v1847_v32  ;;  %v1846_v29 = vadd.f32 -0.28449672, %v1814_v49  ;;  %vm2178_vm4 = vcmp.ge.f32.partialorder %v6689_v16, 0.0  ;;  %v2209_v57 = vsub.f32 0.0, %v2145_v36  ;;  %v6690_v32 = vld [vmem:[#allocation77_spill] sm:$0xff] }
 0x4a7   :  { %v2144_v51 = vsub.f32 1.0, %v2112_v10  ;;  %v1845_v2 = vadd.f32 -0.28449672, %v1813_v58  ;;  %v1812_v13 = vmul.f32 %v6684_v3, %v1780_v18  ;;  %v2115_v60 = vmul.f32 %v5486_v8, %v1955_v63  ;;  %v6691_v58 = vld [vmem:[#allocation68_spill] sm:$0xff] }
 0x4a8   :  { %v1954_v31 = vmul.f32 %v5482_v56, %v1922_v0  ;;  %v1911_v42 = vadd.f32 0.2548296, %v1879_v17  ;;  %v1878_v26 = vmul.f32 %v6682_v21, %v1846_v29  ;;  %v2241_v35 = vsel %vm2177_vm15, %v2145_v36, %v2209_v57 }
 0x4a9   :  { %v2208_v1 = vsub.f32 0.0, %v2144_v51  ;;  %v1877_v23 = vmul.f32 %v6683_v61, %v1845_v2  ;;  %v1844_v50 = vadd.f32 -0.28449672, %v1812_v13  ;;  %v2273_v7 = vadd.f32 1.0, %v2241_v35  ;;  %v6693_v13 = vld [vmem:[#allocation71_spill] sm:$0xff] }
 0x4aa   :  { %v2147_v15 = vsub.f32 1.0, %v2115_v60  ;;  %v2114_v46 = vmul.f32 %v5491_v38, %v1954_v31  ;;  %v1943_v39 = vmul.f32 %v6681_v5, %v1911_v42  ;;  %v1910_v56 = vadd.f32 0.2548296, %v1878_v26  ;;  %v6694_v31 = vld [vmem:[#allocation61_spill] sm:$0xff] }
 0x4ab   :  { %v2240_v8 = vsel %vm2176_vm2, %v2144_v51, %v2208_v1  ;;  %v1909_v20 = vadd.f32 0.2548296, %v1877_v23  ;;  %v1876_v40 = vmul.f32 %v6684_v3, %v1844_v50  ;;  %v2305_v54 = vmul.f32 %v2273_v7, %v6690_v32 }
 0x4ac   :  { %v2272_v49 = vadd.f32 1.0, %v2240_v8  ;;  %v2211_v36 = vsub.f32 0.0, %v2147_v15  ;;  %v2146_v10 = vsub.f32 1.0, %v2114_v46  ;;  %v2103_v18 = vmul.f32 %v6691_v58, %v1943_v39  ;;  %v6697_v46 = vld [vmem:[#allocation75_spill] sm:$0xff] }
 0x4ad   :  { %v1942_v63 = vmul.f32 %v6682_v21, %v1910_v56  ;;  %v1941_v38 = vmul.f32 %v6683_v61, %v1909_v20  ;;  %v1908_v0 = vadd.f32 0.2548296, %v1876_v40  ;;  %v5866_v5 = vmul.f32 %v6628_v6, %v2305_v54  ;;  %v6698_v56 = vld [vmem:[#allocation64_spill] sm:$0xff]  ;;  %v6699_v40 = vld [vmem:[#allocation43_spill] sm:$0xff] }
 0x4ae   :  { %v2304_v17 = vmul.f32 %v2272_v49, %v6692_v55  ;;  %v2243_v29 = vsel %vm2179_vm3, %v2147_v15, %v2211_v36  ;;  %v2210_v57 = vsub.f32 0.0, %v2146_v10  ;;  %v2135_v2 = vsub.f32 1.0, %v2103_v18  ;;  %v6696_v15 = vld [vmem:[#allocation42_spill] sm:$0xff] }
 0x4af   :  { %v2275_v51 = vadd.f32 1.0, %v2243_v29  ;;  %v2102_v60 = vmul.f32 %v6693_v13, %v1942_v63  ;;  %v2101_v42 = vmul.f32 %v6694_v31, %v1941_v38  ;;  %v2440_v21 = vsel %vm2352_vm7, %v5866_v5, 0.0  ;;  %v6700_v63 = vld [vmem:[#allocation39_spill] sm:$0xff]  ;;  %v6702_v13 = vld [vmem:[#allocation40_spill] sm:$0xff]  ;;  %v6703_v31 = vld [vmem:[#allocation41_spill] sm:$0xff] }
 0x4b0   :  { %v5876_v61 = vmul.f32 %v6628_v6, %v2304_v17  ;;  %v2242_v26 = vsel %vm2178_vm4, %v2146_v10, %v2210_v57  ;;  %v1940_v35 = vmul.f32 %v6684_v3, %v1908_v0  ;;  %2441 = vadd.xlane.f32.xlu0 %v2440_v21  ;;  %v2199_v50 = vsub.f32 0.0, %v2135_v2  ;;  %v6701_v0 = vld [vmem:[#allocation33_spill] sm:$0xff] }
 0x4b1   :  { %v2307_v1 = vmul.f32 %v2275_v51, %v6695_v33  ;;  %v2274_v23 = vadd.f32 1.0, %v2242_v26  ;;  %v2134_v7 = vsub.f32 1.0, %v2102_v60  ;;  %vm2167_vm5 = vcmp.ge.f32.partialorder %v6696_v15, 0.0 }
 0x4b2   :  { %v1474_v39 = vmul.f32 0.5, %v6697_v46  ;;  %v2133_v8 = vsub.f32 1.0, %v2101_v42  ;;  %v2100_v20 = vmul.f32 %v6698_v56, %v1940_v35  ;;  %vm2166_vm6 = vcmp.ge.f32.partialorder %v6699_v40, 0.0 }
 0x4b3   :  { %v2231_v32 = vsel %vm2167_vm5, %v2135_v2, %v2199_v50  ;;  %v2198_v16 = vsub.f32 0.0, %v2134_v7  ;;  %v2437_v3 = vsel %vm2352_vm7, %v5876_v61, 0.0  ;;  %v5889_v54 = vmul.f32 %v6628_v6, %v2307_v1  ;;  %v6704_v1 = vld [vmem:[#allocation31_spill] sm:$0xff] }
 0x4b4   :  { %v2306_v49 = vmul.f32 %v2274_v23, %v1474_v39  ;;  %v2263_v36 = vadd.f32 1.0, %v2231_v32  ;;  %2438 = vadd.xlane.f32.xlu0 %v2437_v3  ;;  %v2197_v58 = vsub.f32 0.0, %v2133_v8  ;;  %v2132_v18 = vsub.f32 1.0, %v2100_v20  ;;  %v6705_v39 = vld [vmem:[#allocation38_spill] sm:$0xff] }
 0x4b5   :  { %v2230_v10 = vsel %vm2166_vm6, %v2134_v7, %v2198_v16  ;;  %v1463_v38 = vmul.f32 0.5, %v6700_v63  ;;  %vm2165_vm8 = vcmp.ge.f32.partialorder %v6701_v0, 0.0  ;;  %v2446_v55 = vsel %vm2352_vm7, %v5889_v54, 0.0  ;;  %v5935_v63 = vld [vmem:[%s6444_s3 + $0x48] sm:$0xff]  ;;  %v5942_v0 = vld [vmem:[%s6444_s3 + $0x40] sm:$0xff] }
 0x4b6   :  { %v5896_v17 = vmul.f32 %v6628_v6, %v2306_v49  ;;  %v2262_v57 = vadd.f32 1.0, %v2230_v10  ;;  %v2229_v51 = vsel %vm2165_vm8, %v2133_v8, %v2197_v58  ;;  %v2196_v2 = vsub.f32 0.0, %v2132_v18 }
 0x4b7   :  { %v2295_v29 = vmul.f32 %v2263_v36, %v1463_v38  ;;  %v1462_v60 = vmul.f32 0.5, %v6702_v13  ;;  %vm2164_vm9 = vcmp.ge.f32.partialorder %v6703_v31, 0.0  ;;  %v2261_v35 = vadd.f32 1.0, %v2229_v51  ;;  %v5956_v13 = vld [vmem:[%s6444_s3 + $0x50] sm:$0xff] }
 0x4b8   :  { %2447 = vadd.xlane.f32.xlu0 %v2446_v55  ;;  %v2443_v42 = vsel %vm2352_vm7, %v5896_v17, 0.0  ;;  %v2228_v33 = vsel %vm2164_vm9, %v2132_v18, %v2196_v2  ;;  %v1461_v23 = vmul.f32 0.5, %v6704_v1  ;;  %v1460_v8 = vmul.f32 0.5, %v6705_v39 }
 0x4b9   :  { %v5903_v21 = vmul.f32 %v6628_v6, %v2295_v29  ;;  %v2294_v26 = vmul.f32 %v2262_v57, %v1462_v60  ;;  %v2260_v46 = vadd.f32 1.0, %v2228_v33  ;;  %v5949_v57 = vld [vmem:[%s6444_s3 + $0x58] sm:$0xff]  ;;  %v5970_v33 = vld [vmem:[%s6444_s3 + $0x60] sm:$0xff] }
 0x4ba   :  { %v2293_v15 = vmul.f32 %v2261_v35, %v1461_v23 }
 0x4bb   :  { %v2410_v50 = vsel %vm2352_vm7, %v5903_v21, 0.0  ;;  %v5909_v7 = vmul.f32 %v6628_v6, %v2294_v26  ;;  %v2292_v40 = vmul.f32 %v2260_v46, %v1460_v8  ;;  %v5984_v8 = vld [vmem:[%s6444_s3 + $0x70] sm:$0xff] }
 0x4bc   :  { %2444 = vadd.xlane.f32.xlu0 %v2443_v42  ;;  %v5915_v20 = vmul.f32 %v6628_v6, %v2293_v15  ;;  %v5963_v42 = vld [vmem:[%s6444_s3 + $0x68] sm:$0xff]  ;;  %v5977_v15 = vld [vmem:[%s6444_s3 + $0x78] sm:$0xff] }
 0x4bd   :  { %v2407_v56 = vsel %vm2352_vm7, %v5909_v7, 0.0  ;;  %v5920_v16 = vmul.f32 %v6628_v6, %v2292_v40 }
 0x4be   :  { %v2404_v32 = vsel %vm2352_vm7, %v5915_v20, 0.0 }
 0x4bf   :  { %v2401_v3 = vsel %vm2352_vm7, %v5920_v16, 0.0 }
 0x4c0   :  { %2411 = vadd.xlane.f32.xlu0 %v2410_v50 }
 0x4c4   :  { %2408 = vadd.xlane.f32.xlu0 %v2407_v56 }
 0x4c8   :  { %2405 = vadd.xlane.f32.xlu0 %v2404_v32 }
 0x4cc   :  { %2402 = vadd.xlane.f32.xlu0 %v2401_v3 }
 0x4ce   :  { %v5924_v49 = vpop.xlane.xlu1 %2369 }
 0x4d2   :  { %v5926_v36 = vpop.xlane.xlu1 %2366 }
 0x4d6   :  { %v5928_v10 = vpop.xlane.xlu1 %2375 }
 0x4da   :  { %v5930_v58 = vpop.xlane.xlu1 %2372 }
 0x4dc   :  { %v2397_v23 = vpop.xlane.xlu0 %2396 }
 0x4dd   :  { %v2463_v56 = vmul.f32 %v5984_v8, %v2397_v23 }
 0x4de   :  { %v2382_v18 = vpop.xlane.xlu1 %2381 }
 0x4df   :  { %v2458_v6 = vmul.f32 %v5935_v63, %v2382_v18 }
 0x4e1   :  { %2536 = vrot.lane.b32.xlu1 %v2458_v6, %s4214_s12  ;;  %v5991_v6 = vld [vmem:[%s6444_s3 + $0xc8] sm:$0xff] }
 0x4e2   :  { %v2379_v38 = vpop.xlane.xlu1 %2378 }
 0x4e3   :  { %v2457_v55 = vmul.f32 %v5942_v0, %v2379_v38 }
 0x4e5   :  { %2534 = vrot.lane.b32.xlu1 %v2457_v55, %s4214_s12 }
 0x4e6   :  { %v2388_v29 = vpop.xlane.xlu1 %2387 }
 0x4e7   :  { %v2460_v51 = vmul.f32 %v5949_v57, %v2388_v29  ;;  %v5998_v29 = vld [vmem:[%s6444_s3 + $0xc0] sm:$0xff] }
 0x4e9   :  { %2540 = vrot.lane.b32.xlu1 %v2460_v51, %s4214_s12 }
 0x4f2   :  { %v2385_v2 = vpop.xlane.xlu1 %2384 }
 0x4f3   :  { %v2459_v60 = vmul.f32 %v5956_v13, %v2385_v2 }
 0x4f5   :  { %2538 = vrot.lane.b32.xlu1 %v2459_v60, %s4214_s12  ;;  %v6005_v60 = vld [vmem:[%s6444_s3 + $0xd8] sm:$0xff] }
 0x4f6   :  { %v2394_v31 = vpop.xlane.xlu1 %2393 }
 0x4f7   :  { %v2462_v26 = vmul.f32 %v5963_v42, %v2394_v31 }
 0x4f8   :  { %v2418_v39 = vpop.xlane.xlu0 %2417 }
 0x4f9   :  { %2544 = vrot.lane.b32.xlu1 %v2462_v26, %s4214_s12 }
 0x4fa   :  { %v2391_v35 = vpop.xlane.xlu1 %2390 }
 0x4fb   :  { %v2461_v1 = vmul.f32 %v5970_v33, %v2391_v35  ;;  %v6012_v35 = vld [vmem:[%s6444_s3 + $0xd0] sm:$0xff] }
 0x4fc   :  { %v2415_v40 = vpop.xlane.xlu0 %2414 }
 0x4fd   :  { %2542 = vrot.lane.b32.xlu1 %v2461_v1, %s4214_s12 }
 0x4ff   :  { %v2400_v50 = vpop.xlane.xlu1 %2399 }
 0x500   :  { %v2464_v46 = vmul.f32 %v5977_v15, %v2400_v50  ;;  %v2424_v32 = vpop.xlane.xlu0 %2423  ;;  %v6019_v50 = vld [vmem:[%s6444_s3 + $0xe8] sm:$0xff] }
 0x502   :  { %2548 = vrot.lane.b32.xlu1 %v2464_v46, %s4214_s12 }
 0x506   :  { %2546 = vrot.lane.b32.xlu1 %v2463_v56, %s4214_s12 }
 0x516   :  { %v2421_v3 = vpop.xlane.xlu0 %2420 }
 0x51c   :  { %v2430_v18 = vpop.xlane.xlu0 %2429 }
 0x51d   :  { %v2474_v38 = vmul.f32 %v5991_v6, %v2430_v18  ;;  %v6026_v18 = vld [vmem:[%s6444_s3 + $0xe0] sm:$0xff] }
 0x51f   :  { %2568 = vrot.lane.b32.xlu0 %v2474_v38, %s4214_s12 }
 0x520   :  { %v2427_v55 = vpop.xlane.xlu0 %2426 }
 0x521   :  { %v2473_v51 = vmul.f32 %v5998_v29, %v2427_v55 }
 0x523   :  { %2566 = vrot.lane.b32.xlu0 %v2473_v51, %s4214_s12  ;;  %v6033_v51 = vld [vmem:[%s6444_s3 + $0xf8] sm:$0xff] }
 0x524   :  { %v2436_v2 = vpop.xlane.xlu0 %2435 }
 0x525   :  { %v2476_v31 = vmul.f32 %v6005_v60, %v2436_v2 }
 0x527   :  { %2572 = vrot.lane.b32.xlu0 %v2476_v31, %s4214_s12 }
 0x528   :  { %v2433_v26 = vpop.xlane.xlu0 %2432 }
 0x529   :  { %v2475_v1 = vmul.f32 %v6012_v35, %v2433_v26  ;;  %v6040_v26 = vld [vmem:[%s6444_s3 + $0xb8] sm:$0xff] }
 0x52b   :  { %2570 = vrot.lane.b32.xlu0 %v2475_v1, %s4214_s12  ;;  %v2472_v1 = vmul.f32 %v6040_v26, %v2424_v32  ;;  %v6061_v32 = vld [vmem:[%s6444_s3 + $0xb0] sm:$0xff] }
 0x539   :  { %v2442_v23 = vpop.xlane.xlu0 %2441 }
 0x53a   :  { %v2478_v46 = vmul.f32 %v6019_v50, %v2442_v23  ;;  %v6046_v23 = vld [vmem:[%s6444_s3 + $0xf0] sm:$0xff] }
 0x53c   :  { %2576 = vrot.lane.b32.xlu0 %v2478_v46, %s4214_s12 }
 0x53d   :  { %v2439_v56 = vpop.xlane.xlu0 %2438 }
 0x53e   :  { %v2477_v38 = vmul.f32 %v6026_v18, %v2439_v56  ;;  %v6054_v56 = vld [vmem:[%s6444_s3 + $0x38] sm:$0xff] }
 0x540   :  { %2574 = vrot.lane.b32.xlu0 %v2477_v38, %s4214_s12  ;;  %v2456_v38 = vmul.f32 %v6054_v56, %v5928_v10 }
 0x541   :  { %v2448_v55 = vpop.xlane.xlu0 %2447 }
 0x542   :  { %v2480_v2 = vmul.f32 %v6033_v51, %v2448_v55  ;;  %v2471_v55 = vmul.f32 %v6061_v32, %v2421_v3 }
 0x544   :  { %2580 = vrot.lane.b32.xlu0 %v2480_v2, %s4214_s12 }
 0x545   :  { %v2445_v31 = vpop.xlane.xlu0 %2444 }
 0x546   :  { %v2479_v46 = vmul.f32 %v6046_v23, %v2445_v31  ;;  %v6069_v31 = vld [vmem:[%s6444_s3 + $0x30] sm:$0xff] }
 0x547   :  { %6706 = vst [vmem:[#allocation8_spill] sm:$0xff] %v6069_v31  ;;  %v2455_v10 = vmul.f32 %v6069_v31, %v5930_v58 }
 0x548   :  { %2564 = vrot.lane.b32.xlu0 %v2472_v1, %s4214_s12  ;;  %2578 = vrot.lane.b32.xlu1 %v2479_v46, %s4214_s12  ;;  %v6076_v1 = vld [vmem:[%s6444_s3 + $0xa8] sm:$0xff]  ;;  %v2364_v46 = vpop.xlane.xlu1 %2363 }
 0x549   :  { %v2412_v2 = vpop.xlane.xlu0 %2411  ;;  %v2470_v3 = vmul.f32 %v6076_v1, %v2418_v39 }
 0x54c   :  { %2562 = vrot.lane.b32.xlu0 %v2471_v55, %s4214_s12  ;;  %2532 = vrot.lane.b32.xlu1 %v2456_v38, %s4214_s12  ;;  %v6084_v38 = vld [vmem:[%s6444_s3 + $0x28] sm:$0xff]  ;;  %v6091_v55 = vld [vmem:[%s6444_s3 + $0xa0] sm:$0xff] }
 0x54d   :  { %6707 = vst [vmem:[#allocation10_spill] sm:$0xff] %v6084_v38  ;;  %v2454_v58 = vmul.f32 %v6084_v38, %v5924_v49  ;;  %v2469_v39 = vmul.f32 %v6091_v55, %v2415_v40  ;;  %v2409_v31 = vpop.xlane.xlu0 %2408  ;;  %v2361_v38 = vpop.xlane.xlu1 %2360 }
 0x550   :  { %2560 = vrot.lane.b32.xlu0 %v2470_v3, %s4214_s12  ;;  %2530 = vrot.lane.b32.xlu1 %v2455_v10, %s4214_s12  ;;  %v6099_v10 = vld [vmem:[%s6444_s3 + $0x20] sm:$0xff]  ;;  %v6106_v3 = vld [vmem:[%s6444_s3 + $0x98] sm:$0xff] }
 0x551   :  { %6708 = vst [vmem:[#allocation18_spill] sm:$0xff] %v6099_v10  ;;  %v2453_v49 = vmul.f32 %v6099_v10, %v5926_v36  ;;  %v2468_v40 = vmul.f32 %v6106_v3, %v2412_v2  ;;  %v6120_v10 = vld [vmem:[%s6444_s3 + $0x90] sm:$0xff] }
 0x552   :  { %6710 = vst [vmem:[#allocation47_spill] sm:$0xff] %v6120_v10  ;;  %v2467_v2 = vmul.f32 %v6120_v10, %v2409_v31  ;;  %v6140_v31 = vld [vmem:[%s6444_s3 + $0x88] sm:$0xff] }
 0x554   :  { %2558 = vrot.lane.b32.xlu0 %v2469_v39, %s4214_s12  ;;  %2528 = vrot.lane.b32.xlu1 %v2454_v58, %s4214_s12  ;;  %v2406_v58 = vpop.xlane.xlu0 %2405  ;;  %v6114_v39 = vld [vmem:[%s6444_s3 + $0x18] sm:$0xff] }
 0x555   :  { %6709 = vst [vmem:[#allocation46_spill] sm:$0xff] %v6114_v39  ;;  %v2452_v36 = vmul.f32 %v6114_v39, %v2364_v46  ;;  %v6134_v46 = vld [vmem:[%s6444_s3 + $0x10] sm:$0xff]  ;;  %v2466_v10 = vmul.f32 %v6140_v31, %v2406_v58 }
 0x556   :  { %6712 = vst [vmem:[#allocation34_spill] sm:$0xff] %v6134_v46  ;;  %v2451_v39 = vmul.f32 %v6134_v46, %v2361_v38  ;;  %v6154_v38 = vld [vmem:[%s6444_s3 + $0x80] sm:$0xff] }
 0x558   :  { %2526 = vrot.lane.b32.xlu1 %v2453_v49, %s4214_s12  ;;  %2556 = vrot.lane.b32.xlu0 %v2468_v40, %s4214_s12  ;;  %v6126_v49 = vld [vmem:[%s6445_s4 + $0x8] sm:$0xff]  ;;  %v2358_v40 = vpop.xlane.xlu1 %2357 }
 0x559   :  { %6711 = vst [vmem:[#allocation32_spill] sm:$0xff] %v6126_v49  ;;  %2678 = vmatprep.mubr.f32.mxu0 %v6126_v49 }
 0x55c   :  { %2524 = vrot.lane.b32.xlu1 %v2452_v36, %s4214_s12  ;;  %2554 = vrot.lane.b32.xlu0 %v2467_v2, %s4214_s12  ;;  %v2403_v36 = vpop.xlane.xlu0 %2402  ;;  %v6148_v2 = vld [vmem:[%s6444_s3 + $0x8] sm:$0xff]  ;;  %v2355_v58 = vpop.xlane.xlu1 %2354 }
 0x55d   :  { %v2450_v49 = vmul.f32 %v6148_v2, %v2358_v40  ;;  %v2465_v46 = vmul.f32 %v6154_v38, %v2403_v36  ;;  %v6233_v40 = vld [vmem:[%s6445_s4] sm:$0xff]  ;;  %v6239_v36 = vld [vmem:[%s6445_s4 + $0x18] sm:$0xff] }
 0x560   :  { %2522 = vrot.lane.b32.xlu1 %v2451_v39, %s4214_s12  ;;  %2552 = vrot.lane.b32.xlu0 %v2466_v10, %s4214_s12  ;;  %v6162_v10 = vld [vmem:[%s6444_s3] sm:$0xff] }
 0x561   :  { %v2449_v39 = vmul.f32 %v6162_v10, %v2355_v58  ;;  %v6713_v58 = vld [vmem:[#allocation7_spill] sm:$0xff] }
 0x564   :  { %2520 = vrot.lane.b32.xlu1 %v2450_v49, %s4214_s12  ;;  %2550 = vrot.lane.b32.xlu0 %v2465_v46, %s4214_s12 }
 0x568   :  { %2518 = vrot.lane.b32.xlu1 %v2449_v39, %s4214_s12  ;;  %2931 = vrot.lane.b32.xlu0 %v5889_v54, %s4215_s14 }
 0x56c   :  { %2899 = vrot.lane.b32.xlu1 %v5682_v28, %s4215_s14  ;;  %2929 = vrot.lane.b32.xlu0 %v5896_v17, %s4215_s14 }
 0x570   :  { %2897 = vrot.lane.b32.xlu1 %v5566_v14, %s4215_s14  ;;  %2927 = vrot.lane.b32.xlu0 %v5866_v5, %s4215_s14  ;;  %v2537_v14 = vpop.permute.xlu1 %2536 }
 0x574   :  { %2895 = vrot.lane.b32.xlu1 %v5640_v43, %s4215_s14  ;;  %2925 = vrot.lane.b32.xlu0 %v5876_v61, %s4215_s14 }
 0x578   :  { %2893 = vrot.lane.b32.xlu1 %v5659_v37, %s4215_s14  ;;  %2923 = vrot.lane.b32.xlu0 %v5806_v48, %s4215_s14 }
 0x57c   :  { %2891 = vrot.lane.b32.xlu1 %v5577_v59, %s4215_s14  ;;  %2921 = vrot.lane.b32.xlu0 %v5817_v22, %s4215_s14 }
 0x580   :  { %2889 = vrot.lane.b32.xlu1 %v5629_v34, %s4215_s14  ;;  %2919 = vrot.lane.b32.xlu0 %v5771_v27, %s4215_s14 }
 0x584   :  { %2887 = vrot.lane.b32.xlu1 %v5551_v24, %s4215_s14  ;;  %2917 = vrot.lane.b32.xlu0 %v5791_v45, %s4215_s14  ;;  %v2535_v24 = vpop.permute.xlu1 %2534 }
 0x588   :  { %2885 = vrot.lane.b32.xlu1 %v5562_v53, %s4215_s14  ;;  %2915 = vrot.lane.b32.xlu0 %v5686_v47, %s4215_s14  ;;  %v2541_v59 = vpop.permute.xlu1 %2540 }
 0x58c   :  { %2883 = vrot.lane.b32.xlu1 %v5531_v44, %s4215_s14  ;;  %2913 = vrot.lane.b32.xlu0 %v5749_v62, %s4215_s14 }
 0x590   :  { %2881 = vrot.lane.b32.xlu1 %v5539_v52, %s4215_s14  ;;  %2911 = vrot.lane.b32.xlu0 %v5651_v25, %s4215_s14  ;;  %v2539_v52 = vpop.permute.xlu1 %2538 }
 0x591   :  { %v2569_v53 = vpop.permute.xlu0 %2568 }
 0x594   :  { %2879 = vrot.lane.b32.xlu1 %v5509_v11, %s4215_s14  ;;  %2909 = vrot.lane.b32.xlu0 %v5671_v4, %s4215_s14  ;;  %v2545_v34 = vpop.permute.xlu1 %2544 }
 0x595   :  { %v2567_v44 = vpop.permute.xlu0 %2566 }
 0x598   :  { %2877 = vrot.lane.b32.xlu1 %v5520_v19, %s4215_s14  ;;  %2907 = vrot.lane.b32.xlu0 %v5903_v21, %s4215_s14  ;;  %v2543_v43 = vpop.permute.xlu1 %2542 }
 0x599   :  { %v2573_v11 = vpop.permute.xlu0 %2572 }
 0x59c   :  { %2875 = vrot.lane.b32.xlu1 %v5697_v12, %s4215_s14  ;;  %2905 = vrot.lane.b32.xlu0 %v5909_v7, %s4215_s14  ;;  %v2549_v37 = vpop.permute.xlu1 %2548 }
 0x59d   :  { %v2571_v19 = vpop.permute.xlu0 %2570 }
 0x5a0   :  { %2873 = vrot.lane.b32.xlu1 %v5760_v41, %s4215_s14  ;;  %2903 = vrot.lane.b32.xlu0 %v5915_v20, %s4215_s14  ;;  %v2547_v28 = vpop.permute.xlu1 %2546 }
 0x5a4   :  { %2871 = vrot.lane.b32.xlu1 %v5779_v9, %s4215_s14  ;;  %2901 = vrot.lane.b32.xlu0 %v5920_v16, %s4215_s14 }
 0x5a8   :  { %2869 = vrot.lane.b32.xlu1 %v5802_v30, %s4215_s14 }
 0x5ae   :  { %v2577_v25 = vpop.permute.xlu0 %2576 }
 0x5b2   :  { %v2575_v4 = vpop.permute.xlu0 %2574 }
 0x5b6   :  { %v2581_v47 = vpop.permute.xlu0 %2580 }
 0x5b7   :  { %3707 = vmatprep.subr.mxu0 %v2581_v47 }
 0x5b8   :  { %3708 = vmatpush3.msra.mxu0 %v2549_v37 }
 0x5ba   :  { %v2579_v12 = vpop.permute.xlu1 %2578  ;;  %v2565_v62 = vpop.permute.xlu0 %2564 }
 0x5bb   :  { %3709 = vmatprep.subr.mxu0 %v2579_v12 }
 0x5bc   :  { %3710 = vmatpush3.msra.mxu0 %v2547_v28 }
 0x5bd   :  { %3711 = vmatprep.subr.mxu0 %v2577_v25 }
 0x5be   :  { %v2533_v41 = vpop.permute.xlu1 %2532  ;;  %3712 = vmatpush3.msra.mxu0 %v2545_v34  ;;  %v2563_v27 = vpop.permute.xlu0 %2562 }
 0x5bf   :  { %3713 = vmatprep.subr.mxu0 %v2575_v4 }
 0x5c0   :  { %3714 = vmatpush3.msra.mxu0 %v2543_v43 }
 0x5c1   :  { %3715 = vmatprep.subr.mxu0 %v2573_v11 }
 0x5c2   :  { %v2531_v9 = vpop.permute.xlu1 %2530  ;;  %3716 = vmatpush3.msra.mxu0 %v2541_v59  ;;  %v2561_v45 = vpop.permute.xlu0 %2560 }
 0x5c3   :  { %3717 = vmatprep.subr.mxu0 %v2571_v19 }
 0x5c4   :  { %3718 = vmatpush3.msra.mxu0 %v2539_v52 }
 0x5c5   :  { %3719 = vmatprep.subr.mxu0 %v2569_v53  ;;  %v6714_v53 = vld [vmem:[#allocation6_spill] sm:$0xff] }
 0x5c6   :  { %v2529_v30 = vpop.permute.xlu1 %2528  ;;  %3720 = vmatpush3.msra.mxu0 %v2537_v14  ;;  %v2559_v48 = vpop.permute.xlu0 %2558 }
 0x5c7   :  { %3721 = vmatprep.subr.mxu0 %v2567_v44 }
 0x5c8   :  { %3722 = vmatpush3.msra.mxu0 %v2535_v24  ;;  %v6248_v24 = vld [vmem:[%s6445_s4 + $0x10] sm:$0xff] }
 0x5c9   :  { %3723 = vmatprep.subr.mxu0 %v2565_v62 }
 0x5ca   :  { %v2527_v22 = vpop.permute.xlu1 %2526  ;;  %3724 = vmatpush3.msra.mxu0 %v2533_v41  ;;  %v2557_v5 = vpop.permute.xlu0 %2556 }
 0x5cb   :  { %3725 = vmatprep.subr.mxu0 %v2563_v27 }
 0x5cc   :  { %3726 = vmatpush3.msra.mxu0 %v2531_v9 }
 0x5cd   :  { %3727 = vmatprep.subr.mxu0 %v2561_v45 }
 0x5ce   :  { %v2525_v61 = vpop.permute.xlu1 %2524  ;;  %3728 = vmatpush3.msra.mxu0 %v2529_v30  ;;  %v2555_v54 = vpop.permute.xlu0 %2554 }
 0x5cf   :  { %3729 = vmatprep.subr.mxu0 %v2559_v48 }
 0x5d0   :  { %3730 = vmatpush3.msra.mxu0 %v2527_v22 }
 0x5d1   :  { %3731 = vmatprep.subr.mxu0 %v2557_v5 }
 0x5d2   :  { %v2523_v17 = vpop.permute.xlu1 %2522  ;;  %3732 = vmatpush3.msra.mxu0 %v2525_v61  ;;  %v2553_v21 = vpop.permute.xlu0 %2552 }
 0x5d3   :  { %3733 = vmatprep.subr.mxu0 %v2555_v54 }
 0x5d4   :  { %3734 = vmatpush3.msra.mxu0 %v2523_v17 }
 0x5d5   :  { %3735 = vmatprep.subr.mxu0 %v2553_v21 }
 0x5d6   :  { %v2521_v7 = vpop.permute.xlu1 %2520  ;;  %v2551_v20 = vpop.permute.xlu0 %2550 }
 0x5d7   :  { %3736 = vmatpush3.msra.mxu0 %v2521_v7 }
 0x5d8   :  { %3737 = vmatprep.subr.mxu0 %v2551_v20 }
 0x5da   :  { %v2519_v16 = vpop.permute.xlu1 %2518  ;;  %v2932_v49 = vpop.permute.xlu0 %2931 }
 0x5db   :  { %3738 = vmatpush3.msra.mxu0 %v2519_v16  ;;  %v3058_v46 = vsel %vm2352_vm7, %v2932_v49, 0.0  ;;  %v6270_v16 = vld [vmem:[%s6448_s7] sm:$0xff] }
 0x5dc   :  { %3978 = vmatprep.subr.mxu0 %v6713_v58  ;;  %3059 = vadd.xlane.f32.xlu0 %v3058_v46  ;;  %v2482_v49 = vrot.slane %v6270_v16, 3 }
 0x5dd   :  { %2679 = vmatmul.mubr.f32.vlgmr.msra.gmra.mxu0 %v6233_v40 }
 0x5de   :  { %3979 = vmatpush3.msra.mxu0 %v6713_v58  ;;  %v2900_v39 = vpop.permute.xlu1 %2899  ;;  %v2930_v14 = vpop.permute.xlu0 %2929  ;;  %2683 = vmatprep.mubr.f32.mxu0 %v6239_v36  ;;  %3992 = vpush %v2482_v49 }
 0x5df   :  { %3980 = vmatprep.subr.mxu0 %v6714_v53  ;;  %v3010_v59 = vsel %vm2352_vm7, %v2900_v39, 0.0  ;;  %v3055_v44 = vsel %vm2352_vm7, %v2930_v14, 0.0 }
 0x5e0   :  { %3981 = vmatpush3.msra.mxu0 %v6714_v53  ;;  %3011 = vadd.xlane.f32.xlu1 %v3010_v59 }
 0x5e1   :  { %3056 = vadd.xlane.f32.xlu0 %v3055_v44  ;;  %2684 = vmatmul.mubr.f32.gmra.mxu0 %v6248_v24 }
 0x5e2   :  { %v2898_v52 = vpop.permute.xlu1 %2897  ;;  %v2928_v11 = vpop.permute.xlu0 %2927 }
 0x5e3   :  { %v3007_v34 = vsel %vm2352_vm7, %v2898_v52, 0.0  ;;  %v3052_v37 = vsel %vm2352_vm7, %v2928_v11, 0.0 }
 0x5e5   :  { %3008 = vadd.xlane.f32.xlu0 %v3007_v34 }
 0x5e6   :  { %v2896_v19 = vpop.permute.xlu1 %2895  ;;  %v2926_v43 = vpop.permute.xlu0 %2925 }
 0x5e7   :  { %v3004_v25 = vsel %vm2352_vm7, %v2896_v19, 0.0  ;;  %v3049_v12 = vsel %vm2352_vm7, %v2926_v43, 0.0 }
 0x5e8   :  { %3005 = vadd.xlane.f32.xlu1 %v3004_v25 }
 0x5e9   :  { %3053 = vadd.xlane.f32.xlu0 %v3052_v37 }
 0x5ea   :  { %v2894_v4 = vpop.permute.xlu1 %2893  ;;  %v2924_v28 = vpop.permute.xlu0 %2923 }
 0x5eb   :  { %v3001_v47 = vsel %vm2352_vm7, %v2894_v4, 0.0  ;;  %v3046_v9 = vsel %vm2352_vm7, %v2924_v28, 0.0 }
 0x5ec   :  { %3002 = vadd.xlane.f32.xlu1 %v3001_v47 }
 0x5ed   :  { %3050 = vadd.xlane.f32.xlu0 %v3049_v12 }
 0x5ee   :  { %v2892_v62 = vpop.permute.xlu1 %2891  ;;  %v2922_v41 = vpop.permute.xlu0 %2921 }
 0x5ef   :  { %v2998_v27 = vsel %vm2352_vm7, %v2892_v62, 0.0  ;;  %v3043_v22 = vsel %vm2352_vm7, %v2922_v41, 0.0 }
 0x5f0   :  { %2999 = vadd.xlane.f32.xlu1 %v2998_v27 }
 0x5f1   :  { %3047 = vadd.xlane.f32.xlu0 %v3046_v9 }
 0x5f2   :  { %v2890_v45 = vpop.permute.xlu1 %2889  ;;  %v2920_v30 = vpop.permute.xlu0 %2919 }
 0x5f3   :  { %v2995_v48 = vsel %vm2352_vm7, %v2890_v45, 0.0  ;;  %v3040_v17 = vsel %vm2352_vm7, %v2920_v30, 0.0 }
 0x5f4   :  { %2996 = vadd.xlane.f32.xlu1 %v2995_v48 }
 0x5f5   :  { %3044 = vadd.xlane.f32.xlu0 %v3043_v22 }
 0x5f6   :  { %v2888_v5 = vpop.permute.xlu1 %2887  ;;  %v2918_v61 = vpop.permute.xlu0 %2917 }
 0x5f7   :  { %v2992_v54 = vsel %vm2352_vm7, %v2888_v5, 0.0  ;;  %v3037_v46 = vsel %vm2352_vm7, %v2918_v61, 0.0 }
 0x5f8   :  { %2993 = vadd.xlane.f32.xlu1 %v2992_v54 }
 0x5f9   :  { %3041 = vadd.xlane.f32.xlu0 %v3040_v17 }
 0x5fa   :  { %v2886_v21 = vpop.permute.xlu1 %2885  ;;  %v2916_v7 = vpop.permute.xlu0 %2915 }
 0x5fb   :  { %v2989_v20 = vsel %vm2352_vm7, %v2886_v21, 0.0  ;;  %v3034_v44 = vsel %vm2352_vm7, %v2916_v7, 0.0 }
 0x5fc   :  { %2990 = vadd.xlane.f32.xlu1 %v2989_v20 }
 0x5fd   :  { %3038 = vadd.xlane.f32.xlu0 %v3037_v46 }
 0x5fe   :  { %v2884_v39 = vpop.permute.xlu1 %2883  ;;  %v2914_v14 = vpop.permute.xlu0 %2913 }
 0x5ff   :  { %v2986_v59 = vsel %vm2352_vm7, %v2884_v39, 0.0  ;;  %v3031_v19 = vsel %vm2352_vm7, %v2914_v14, 0.0 }
 0x600   :  { %2987 = vadd.xlane.f32.xlu1 %v2986_v59 }
 0x601   :  { %3035 = vadd.xlane.f32.xlu0 %v3034_v44 }
 0x602   :  { %v2882_v52 = vpop.permute.xlu1 %2881  ;;  %v2912_v11 = vpop.permute.xlu0 %2911 }
 0x603   :  { %v2983_v34 = vsel %vm2352_vm7, %v2882_v52, 0.0  ;;  %v3028_v4 = vsel %vm2352_vm7, %v2912_v11, 0.0 }
 0x604   :  { %2984 = vadd.xlane.f32.xlu1 %v2983_v34 }
 0x605   :  { %3032 = vadd.xlane.f32.xlu0 %v3031_v19 }
 0x606   :  { %v2880_v43 = vpop.permute.xlu1 %2879  ;;  %v2910_v25 = vpop.permute.xlu0 %2909 }
 0x607   :  { %v2980_v37 = vsel %vm2352_vm7, %v2880_v43, 0.0  ;;  %v3025_v62 = vsel %vm2352_vm7, %v2910_v25, 0.0 }
 0x608   :  { %2981 = vadd.xlane.f32.xlu1 %v2980_v37 }
 0x609   :  { %3029 = vadd.xlane.f32.xlu0 %v3028_v4 }
 0x60a   :  { %v2878_v28 = vpop.permute.xlu1 %2877  ;;  %v2908_v47 = vpop.permute.xlu0 %2907 }
 0x60b   :  { %v2977_v12 = vsel %vm2352_vm7, %v2878_v28, 0.0  ;;  %v3022_v45 = vsel %vm2352_vm7, %v2908_v47, 0.0 }
 0x60c   :  { %2978 = vadd.xlane.f32.xlu1 %v2977_v12 }
 0x60d   :  { %3026 = vadd.xlane.f32.xlu0 %v3025_v62 }
 0x60e   :  { %v2876_v41 = vpop.permute.xlu1 %2875  ;;  %v2906_v27 = vpop.permute.xlu0 %2905 }
 0x60f   :  { %v2974_v9 = vsel %vm2352_vm7, %v2876_v41, 0.0  ;;  %v3019_v5 = vsel %vm2352_vm7, %v2906_v27, 0.0  ;;  %s3993_s7 = spop %3992 }
 0x610   :  { %2975 = vadd.xlane.f32.xlu1 %v2974_v9 }
 0x611   :  { %3023 = vadd.xlane.f32.xlu0 %v3022_v45 }
 0x612   :  { %v2874_v30 = vpop.permute.xlu1 %2873  ;;  %v2904_v22 = vpop.permute.xlu0 %2903 }
 0x613   :  { %v2971_v48 = vsel %vm2352_vm7, %v2874_v30, 0.0  ;;  %v3016_v17 = vsel %vm2352_vm7, %v2904_v22, 0.0  ;;  %v2484_v22 = vstv %s3993_s7 }
 0x614   :  { %2972 = vadd.xlane.f32.xlu1 %v2971_v48 }
 0x615   :  { %3020 = vadd.xlane.f32.xlu0 %v3019_v5 }
 0x616   :  { %v2872_v61 = vpop.permute.xlu1 %2871  ;;  %v2902_v21 = vpop.permute.xlu0 %2901 }
 0x617   :  { %v2968_v54 = vsel %vm2352_vm7, %v2872_v61, 0.0  ;;  %v3013_v46 = vsel %vm2352_vm7, %v2902_v21, 0.0 }
 0x618   :  { %2969 = vadd.xlane.f32.xlu1 %v2968_v54 }
 0x619   :  { %3017 = vadd.xlane.f32.xlu0 %v3016_v17 }
 0x61a   :  { %v2870_v7 = vpop.permute.xlu1 %2869 }
 0x61b   :  { %v2965_v20 = vsel %vm2352_vm7, %v2870_v7, 0.0 }
 0x61c   :  { %2966 = vadd.xlane.f32.xlu1 %v2965_v20 }
 0x61d   :  { %3014 = vadd.xlane.f32.xlu0 %v3013_v46 }
 0x665   :  { %v3060_v39 = vpop.xlane.xlu0 %3059 }
 0x669   :  { %v3012_v59 = vpop.xlane.xlu1 %3011 }
 0x66a   :  { %v3057_v14 = vpop.xlane.xlu0 %3056 }
 0x66e   :  { %v3009_v44 = vpop.xlane.xlu0 %3008 }
 0x671   :  { %v3006_v52 = vpop.xlane.xlu1 %3005 }
 0x672   :  { %v3054_v11 = vpop.xlane.xlu0 %3053 }
 0x675   :  { %v3003_v34 = vpop.xlane.xlu1 %3002 }
 0x676   :  { %v3051_v19 = vpop.xlane.xlu0 %3050 }
 0x679   :  { %v3000_v43 = vpop.xlane.xlu1 %2999 }
 0x67a   :  { %v3048_v25 = vpop.xlane.xlu0 %3047  ;;  %v3072_v41 = vmul.f32 %v5949_v57, %v3000_v43  ;;  %v3073_v57 = vmul.f32 %v5970_v33, %v3003_v34 }
 0x67b   :  { %v3088_v27 = vmul.f32 %v6005_v60, %v3048_v25  ;;  %v3089_v60 = vmul.f32 %v6026_v18, %v3051_v19  ;;  %v3091_v18 = vmul.f32 %v6046_v23, %v3057_v14  ;;  %v6327_v23 = vld [vmem:[%s6441_s0] sm:$0xff] }
 0x67c   :  { %vm2310_vm7 = vcmp.gt.f32.partialorder %v6327_v23, 0.5 }
 0x67d   :  { %v2997_v37 = vpop.xlane.xlu1 %2996 }
 0x67e   :  { %v3045_v4 = vpop.xlane.xlu0 %3044  ;;  %v3071_v9 = vmul.f32 %v5956_v13, %v2997_v37  ;;  %v3076_v13 = vmul.f32 %v5977_v15, %v3012_v59  ;;  %v6339_v59 = vld [vmem:[%s6441_s0 + $0x8] sm:$0xff]  ;;  %s4216_s0 = smov 127  }
 0x67f   :  { %v3087_v45 = vmul.f32 %v6012_v35, %v3045_v4  ;;  %v3092_v35 = vmul.f32 %v6033_v51, %v3060_v39  ;;  %vm2311_vm10 = vcmp.gt.f32.partialorder %v6339_v59, 0.5 }
 0x681   :  { %v2994_v28 = vpop.xlane.xlu1 %2993 }
 0x682   :  { %v3070_v47 = vmul.f32 %v5935_v63, %v2994_v28  ;;  %v3042_v12 = vpop.xlane.xlu0 %3041  ;;  %v3074_v63 = vmul.f32 %v5963_v42, %v3006_v52  ;;  %v3075_v42 = vmul.f32 %v5984_v8, %v3009_v44 }
 0x683   :  { %v3086_v62 = vmul.f32 %v5991_v6, %v3042_v12  ;;  %v3090_v6 = vmul.f32 %v6019_v50, %v3054_v11 }
 0x684   :  { %3148 = vrot.lane.b32.xlu1 %v3070_v47, %s4214_s12 }
 0x685   :  { %3180 = vrot.lane.b32.xlu0 %v3086_v62, %s4214_s12  ;;  %v2991_v50 = vpop.xlane.xlu1 %2990 }
 0x686   :  { %v3069_v15 = vmul.f32 %v5942_v0, %v2991_v50  ;;  %v3039_v20 = vpop.xlane.xlu0 %3038 }
 0x687   :  { %v3085_v43 = vmul.f32 %v5998_v29, %v3039_v20  ;;  %v6715_v29 = vld [vmem:[#allocation8_spill] sm:$0xff] }
 0x688   :  { %3152 = vrot.lane.b32.xlu1 %v3072_v41, %s4214_s12 }
 0x689   :  { %3184 = vrot.lane.b32.xlu0 %v3088_v27, %s4214_s12  ;;  %v2988_v51 = vpop.xlane.xlu1 %2987 }
 0x68a   :  { %v3068_v5 = vmul.f32 %v6054_v56, %v2988_v51  ;;  %v3036_v39 = vpop.xlane.xlu0 %3035 }
 0x68b   :  { %v3084_v37 = vmul.f32 %v6040_v26, %v3036_v39 }
 0x68c   :  { %3150 = vrot.lane.b32.xlu1 %v3071_v9, %s4214_s12 }
 0x68d   :  { %3182 = vrot.lane.b32.xlu0 %v3087_v45, %s4214_s12  ;;  %v2985_v25 = vpop.xlane.xlu1 %2984 }
 0x68e   :  { %v3033_v52 = vpop.xlane.xlu0 %3032  ;;  %v3067_v27 = vmul.f32 %v6715_v29, %v2985_v25 }
 0x68f   :  { %v3083_v47 = vmul.f32 %v6061_v32, %v3033_v52 }
 0x690   :  { %3156 = vrot.lane.b32.xlu1 %v3074_v63, %s4214_s12  ;;  %v6716_v63 = vld [vmem:[#allocation10_spill] sm:$0xff] }
 0x691   :  { %3188 = vrot.lane.b32.xlu0 %v3090_v6, %s4214_s12  ;;  %v2982_v28 = vpop.xlane.xlu1 %2981 }
 0x692   :  { %v3030_v34 = vpop.xlane.xlu0 %3029  ;;  %v3066_v32 = vmul.f32 %v6716_v63, %v2982_v28 }
 0x693   :  { %v3082_v62 = vmul.f32 %v6076_v1, %v3030_v34  ;;  %v6717_v1 = vld [vmem:[#allocation18_spill] sm:$0xff] }
 0x694   :  { %3154 = vrot.lane.b32.xlu1 %v3073_v57, %s4214_s12 }
 0x695   :  { %3186 = vrot.lane.b32.xlu0 %v3089_v60, %s4214_s12  ;;  %v2979_v41 = vpop.xlane.xlu1 %2978 }
 0x696   :  { %v3027_v4 = vpop.xlane.xlu0 %3026  ;;  %v3065_v57 = vmul.f32 %v6717_v1, %v2979_v41 }
 0x697   :  { %v3081_v9 = vmul.f32 %v6091_v55, %v3027_v4 }
 0x698   :  { %3160 = vrot.lane.b32.xlu1 %v3076_v13, %s4214_s12 }
 0x699   :  { %3192 = vrot.lane.b32.xlu0 %v3092_v35, %s4214_s12  ;;  %v2976_v26 = vpop.xlane.xlu1 %2975  ;;  %v6718_v35 = vld [vmem:[#allocation47_spill] sm:$0xff] }
 0x69a   :  { %v3024_v12 = vpop.xlane.xlu0 %3023 }
 0x69b   :  { %v3080_v6 = vmul.f32 %v6106_v3, %v3024_v12 }
 0x69c   :  { %3158 = vrot.lane.b32.xlu1 %v3075_v42, %s4214_s12  ;;  %v6719_v42 = vld [vmem:[#allocation46_spill] sm:$0xff] }
 0x69d   :  { %v3739_v33 = vpop.f32.mrf.mxu0  ;;  %v2973_v13 = vpop.xlane.xlu1 %2972  ;;  %v3064_v50 = vmul.f32 %v6719_v42, %v2976_v26 }
 0x69e   :  { %v3021_v45 = vpop.xlane.xlu0 %3020 }
 0x69f   :  { %v3740_v30 = vpop.f32.mrf.mxu0  ;;  %v3079_v55 = vmul.f32 %v6718_v35, %v3021_v45 }
 0x6a0   :  { %3190 = vrot.lane.b32.xlu1 %v3091_v18, %s4214_s12  ;;  %v3741_v48 = vadd.f32 %v3740_v30, %v3739_v33  ;;  %v6720_v30 = vld [vmem:[#allocation34_spill] sm:$0xff] }
 0x6a1   :  { %v3742_v0 = vpop.f32.mrf.mxu0  ;;  %v2970_v3 = vpop.xlane.xlu1 %2969 }
 0x6a2   :  { %v2681_v8 = vadd.f32 %v3741_v48, %v2484_v22  ;;  %v3018_v60 = vpop.xlane.xlu0 %3017  ;;  %v3062_v51 = vmul.f32 %v6148_v2, %v2970_v3 }
 0x6a3   :  { %v3743_v21 = vpop.f32.mrf.mxu0  ;;  %v3078_v33 = vmul.f32 %v6140_v31, %v3018_v60 }
 0x6a4   :  { %3146 = vrot.lane.b32.xlu1 %v3069_v15, %s4214_s12  ;;  %v2689_v61 = vmul.f32 0.2, %v2681_v8  ;;  %v3744_v7 = vadd.f32 %v3743_v21, %v3742_v0  ;;  %v3063_v15 = vmul.f32 %v6720_v30, %v2973_v13 }
 0x6a6   :  { %v2691_v54 = vmax.f32 %v2681_v8, %v2689_v61  ;;  %v2686_v46 = vadd.f32 %v3744_v7, %v2484_v22  ;;  %v3015_v18 = vpop.xlane.xlu0 %3014  ;;  %v2967_v22 = vpop.xlane.xlu1 %2966 }
 0x6a7   :  { %v3077_v48 = vmul.f32 %v6154_v38, %v3015_v18  ;;  %v3061_v31 = vmul.f32 %v6162_v10, %v2967_v22 }
 0x6a8   :  { %3144 = vrot.lane.b32.xlu1 %v3068_v5, %s4214_s12  ;;  %v6332_v17 = vsel %vm2310_vm7, %v2691_v54, -1e+12  ;;  %v2690_v14 = vmul.f32 0.2, %v2686_v46 }
 0x6a9   :  { %v2695_v56 = vsel %vm379_vm1, %v6332_v17, -inf }
 0x6aa   :  { %v2692_v44 = vmax.f32 %v2686_v46, %v2690_v14 }
 0x6ac   :  { %v6344_v11 = vsel %vm2311_vm10, %v2692_v44, -1e+12 }
 0x6ad   :  { %v2698_v19 = vsel %vm379_vm1, %v6344_v11, -inf }
 0x6b8   :  { %2696 = vmax.xlane.f32.xlu0 %v2695_v56 }
 0x6cc   :  { %2699 = vmax.xlane.f32.xlu1 %v2698_v19 }
 0x6ce   :  { %3178 = vrot.lane.b32.xlu0 %v3085_v43, %s4214_s12 }
 0x6d2   :  { %3176 = vrot.lane.b32.xlu0 %v3084_v37, %s4214_s12 }
 0x6d6   :  { %3174 = vrot.lane.b32.xlu0 %v3083_v47, %s4214_s12 }
 0x6da   :  { %3172 = vrot.lane.b32.xlu0 %v3082_v62, %s4214_s12 }
 0x6dd   :  { %3142 = vrot.lane.b32.xlu1 %v3067_v27, %s4214_s12 }
 0x6de   :  { %3170 = vrot.lane.b32.xlu0 %v3081_v9, %s4214_s12  ;;  %v6721_v9 = vld [vmem:[#allocation32_spill] sm:$0xff] }
 0x6e1   :  { %3140 = vrot.lane.b32.xlu1 %v3066_v32, %s4214_s12 }
 0x6e2   :  { %3168 = vrot.lane.b32.xlu0 %v3080_v6, %s4214_s12 }
 0x6e5   :  { %3138 = vrot.lane.b32.xlu1 %v3065_v57, %s4214_s12 }
 0x6e6   :  { %3166 = vrot.lane.b32.xlu0 %v3079_v55, %s4214_s12 }
 0x6e9   :  { %3136 = vrot.lane.b32.xlu1 %v3064_v50, %s4214_s12 }
 0x6ea   :  { %3164 = vrot.lane.b32.xlu0 %v3078_v33, %s4214_s12 }
 0x6ed   :  { %3134 = vrot.lane.b32.xlu1 %v3063_v15, %s4214_s12 }
 0x6ee   :  { %3162 = vrot.lane.b32.xlu0 %v3077_v48, %s4214_s12 }
 0x6f1   :  { %3132 = vrot.lane.b32.xlu1 %v3062_v51, %s4214_s12 }
 0x6f2   :  { %3093 = vrot.lane.b32.xlu0 %v2482_v49, %s4216_s0 }
 0x6f5   :  { %3130 = vrot.lane.b32.xlu1 %v3061_v31, %s4214_s12 }
 0x6f6   :  { %v3149_v38 = vpop.permute.xlu1 %3148 }
 0x6f7   :  { %v3181_v5 = vpop.permute.xlu0 %3180 }
 0x6fa   :  { %v3153_v2 = vpop.permute.xlu1 %3152 }
 0x6fb   :  { %v3185_v8 = vpop.permute.xlu0 %3184 }
 0x6fe   :  { %v3151_v21 = vpop.permute.xlu1 %3150 }
 0x6ff   :  { %v3183_v61 = vpop.permute.xlu0 %3182 }
 0x702   :  { %v3157_v7 = vpop.permute.xlu1 %3156 }
 0x703   :  { %v3189_v54 = vpop.permute.xlu0 %3188 }
 0x706   :  { %v3155_v20 = vpop.permute.xlu1 %3154 }
 0x707   :  { %v3187_v0 = vpop.permute.xlu0 %3186 }
 0x70a   :  { %v3161_v46 = vpop.permute.xlu1 %3160 }
 0x70b   :  { %v3193_v56 = vpop.permute.xlu0 %3192 }
 0x70c   :  { %3749 = vmatprep.subr.mxu0 %v3193_v56 }
 0x70e   :  { %v3159_v10 = vpop.permute.xlu1 %3158 }
 0x712   :  { %v3191_v52 = vpop.permute.xlu1 %3190 }
 0x716   :  { %v3147_v34 = vpop.permute.xlu1 %3146 }
 0x71a   :  { %v3145_v43 = vpop.permute.xlu1 %3144 }
 0x741   :  { %v2697_v39 = vpop.xlane.xlu0 %2696 }
 0x742   :  { %v2701_v14 = vsub.f32 %v6332_v17, %v2697_v39 }
 0x744   :  { %v2703_v44 = vmul.f32 1.442695, %v2701_v14 }
 0x745   :  { %v3179_v19 = vpop.permute.xlu0 %3178 }
 0x746   :  { %4135 = vpow2.f32 %v2703_v44 }
 0x749   :  { %v3177_v25 = vpop.permute.xlu0 %3176 }
 0x74d   :  { %v3175_v28 = vpop.permute.xlu0 %3174 }
 0x751   :  { %v3173_v12 = vpop.permute.xlu0 %3172 }
 0x753   :  { %v6383_v37 = vpop.eup %4135 }
 0x754   :  { %3982 = vmatprep.mubr.msk.f32.mxu0 %vm379_vm1, %v6383_v37 }
 0x755   :  { %v2700_v49 = vpop.xlane.xlu1 %2699  ;;  %v3171_v62 = vpop.permute.xlu0 %3170 }
 0x756   :  { %v2702_v4 = vsub.f32 %v6344_v11, %v2700_v49 }
 0x758   :  { %v2705_v47 = vmul.f32 1.442695, %v2702_v4 }
 0x759   :  { %v3143_v17 = vpop.permute.xlu1 %3142  ;;  %v3169_v27 = vpop.permute.xlu0 %3168 }
 0x75a   :  { %4137 = vpow2.f32 %v2705_v47 }
 0x75d   :  { %v3141_v29 = vpop.permute.xlu1 %3140  ;;  %v3167_v45 = vpop.permute.xlu0 %3166 }
 0x761   :  { %v3139_v11 = vpop.permute.xlu1 %3138  ;;  %v3165_v63 = vpop.permute.xlu0 %3164 }
 0x765   :  { %v3137_v26 = vpop.permute.xlu1 %3136  ;;  %v3163_v6 = vpop.permute.xlu0 %3162 }
 0x767   :  { %v6388_v41 = vpop.eup %4137 }
 0x768   :  { %3983 = vmatmul.mubr.msk.f32.vlgmr.msra.gmra.mxu0 %vm379_vm1, %v6388_v41 }
 0x769   :  { %3750 = vmatpush3.msra.mxu0 %v3161_v46  ;;  %3290 = vmatprep.mubr.f32.mxu0 %v6721_v9  ;;  %v3135_v32 = vpop.permute.xlu1 %3134  ;;  %v3094_v1 = vpop.permute.xlu0 %3093  ;;  %v2710_v46 = vsel %vm379_vm1, %v6388_v41, 0.0 }
 0x76a   :  { %3751 = vmatprep.subr.mxu0 %v3191_v52  ;;  %3994 = vpush %v3094_v1 }
 0x76b   :  { %3752 = vmatpush3.msra.mxu0 %v3159_v10 }
 0x76c   :  { %3753 = vmatprep.subr.mxu0 %v3189_v54 }
 0x76d   :  { %3754 = vmatpush3.msra.mxu0 %v3157_v7  ;;  %v3133_v57 = vpop.permute.xlu1 %3132 }
 0x76e   :  { %3755 = vmatprep.subr.mxu0 %v3187_v0 }
 0x76f   :  { %3756 = vmatpush3.msra.mxu0 %v3155_v20  ;;  %v2707_v20 = vsel %vm379_vm1, %v6383_v37, 0.0 }
 0x770   :  { %3757 = vmatprep.subr.mxu0 %v3185_v8 }
 0x771   :  { %3758 = vmatpush3.msra.mxu0 %v3153_v2  ;;  %v3131_v60 = vpop.permute.xlu1 %3130 }
 0x772   :  { %3759 = vmatprep.subr.mxu0 %v3183_v61 }
 0x773   :  { %3760 = vmatpush3.msra.mxu0 %v3151_v21 }
 0x774   :  { %3761 = vmatprep.subr.mxu0 %v3181_v5 }
 0x775   :  { %3762 = vmatpush3.msra.mxu0 %v3149_v38 }
 0x776   :  { %3763 = vmatprep.subr.mxu0 %v3179_v19 }
 0x777   :  { %3764 = vmatpush3.msra.mxu0 %v3147_v34 }
 0x778   :  { %3765 = vmatprep.subr.mxu0 %v3177_v25 }
 0x779   :  { %3766 = vmatpush3.msra.mxu0 %v3145_v43 }
 0x77a   :  { %3767 = vmatprep.subr.mxu0 %v3175_v28 }
 0x77b   :  { %3768 = vmatpush3.msra.mxu0 %v3143_v17 }
 0x77c   :  { %3769 = vmatprep.subr.mxu0 %v3173_v12 }
 0x77d   :  { %3770 = vmatpush3.msra.mxu0 %v3141_v29 }
 0x77e   :  { %3771 = vmatprep.subr.mxu0 %v3171_v62 }
 0x77f   :  { %3772 = vmatpush3.msra.mxu0 %v3139_v11 }
 0x780   :  { %3773 = vmatprep.subr.mxu0 %v3169_v27 }
 0x781   :  { %3774 = vmatpush3.msra.mxu0 %v3137_v26 }
 0x782   :  { %3775 = vmatprep.subr.mxu0 %v3167_v45 }
 0x783   :  { %3776 = vmatpush3.msra.mxu0 %v3135_v32 }
 0x784   :  { %3777 = vmatprep.subr.mxu0 %v3165_v63 }
 0x785   :  { %3778 = vmatpush3.msra.mxu0 %v3133_v57  ;;  %v6722_v57 = vld [vmem:[#allocation5_spill] sm:$0xff] }
 0x786   :  { %3779 = vmatprep.subr.mxu0 %v3163_v6 }
 0x787   :  { %3780 = vmatpush3.msra.mxu0 %v3131_v60  ;;  %v2827_v60 = vsub.s32 4, %v6722_v57 }
 0x788   :  { %3291 = vmatmul.mubr.f32.vlgmr.msra.gmra.mxu0 %v6233_v40 }
 0x789   :  { %3295 = vmatprep.mubr.f32.mxu0 %v6239_v36 }
 0x78c   :  { %3296 = vmatmul.mubr.f32.gmra.mxu0 %v6248_v24 }
 0x79b   :  { %s3995_s23 = spop %3994 }
 0x79c   :  { %v3096_v50 = vstv %s3995_s23 }
 0x828   :  { %v6396_v13 = vpop.f32.mrf.mxu0 }
 0x82a   :  { %v6398_v35 = vpop.f32.mrf.mxu0 }
 0x848   :  { %v3781_v55 = vpop.f32.mrf.mxu0 }
 0x84a   :  { %v3782_v42 = vpop.f32.mrf.mxu0 }
 0x84b   :  { %v3783_v33 = vadd.f32 %v3782_v42, %v3781_v55 }
 0x84c   :  { %v3784_v18 = vpop.f32.mrf.mxu0 }
 0x84d   :  { %v3293_v3 = vadd.f32 %v3783_v33, %v3096_v50 }
 0x84e   :  { %v3785_v30 = vpop.f32.mrf.mxu0 }
 0x84f   :  { %v3301_v15 = vmul.f32 0.2, %v3293_v3  ;;  %v3786_v48 = vadd.f32 %v3785_v30, %v3784_v18 }
 0x851   :  { %v3303_v51 = vmax.f32 %v3293_v3, %v3301_v15  ;;  %v3298_v40 = vadd.f32 %v3786_v48, %v3096_v50 }
 0x853   :  { %v3302_v22 = vmul.f32 0.2, %v3298_v40  ;;  %v3305_v36 = vsel %vm2310_vm7, %v3303_v51, -1e+12 }
 0x854   :  { %v3307_v24 = vsel %vm379_vm1, %v3305_v36, -inf }
 0x855   :  { %v3304_v31 = vmax.f32 %v3298_v40, %v3302_v22  ;;  %3308 = vmax.xlane.f32.xlu1 %v3307_v24 }
 0x857   :  { %v3306_v5 = vsel %vm2311_vm10, %v3304_v31, -1e+12 }
 0x858   :  { %v3310_v8 = vsel %vm379_vm1, %v3306_v5, -inf }
 0x859   :  { %3311 = vmax.xlane.f32.xlu0 %v3310_v8 }
 0x866   :  { %3325 = vrot.lane.b32.xlu1 %v6714_v53, %s4214_s12 }
 0x86f   :  { %3327 = vrot.lane.b32.xlu0 %v6713_v58, %s4214_s12 }
 0x8de   :  { %v3309_v61 = vpop.xlane.xlu1 %3308 }
 0x8df   :  { %v3313_v54 = vsub.f32 %v3305_v36, %v3309_v61 }
 0x8e1   :  { %v3315_v23 = vmul.f32 1.442695, %v3313_v54 }
 0x8e2   :  { %v3312_v0 = vpop.xlane.xlu0 %3311  ;;  %v3326_v59 = vpop.permute.xlu1 %3325 }
 0x8e3   :  { %4139 = vpow2.f32 %v3315_v23  ;;  %v3314_v56 = vsub.f32 %v3306_v5, %v3312_v0 }
 0x8e5   :  { %v3317_v38 = vmul.f32 1.442695, %v3314_v56 }
 0x8e6   :  { %v3328_v2 = vpop.permute.xlu0 %3327 }
 0x8e7   :  { %4141 = vpow2.f32 %v3317_v38  ;;  %3985 = vmatprep.subr.mxu0 %v3328_v2 }
 0x8e8   :  { %3986 = vmatpush3.msra.mxu0 %v3328_v2 }
 0x8e9   :  { %3987 = vmatprep.subr.mxu0 %v3326_v59 }
 0x8ea   :  { %3988 = vmatpush3.msra.mxu0 %v3326_v59 }
 0x8f0   :  { %v4140_v21 = vpop.eup %4139 }
 0x8f1   :  { %3989 = vmatprep.mubr.msk.f32.mxu0 %vm379_vm1, %v4140_v21  ;;  %v3319_v53 = vsel %vm379_vm1, %v4140_v21, 0.0 }
 0x8f2   :  { %3320 = vadd.xlane.f32.xlu1 %v3319_v53 }
 0x8f4   :  { %v4142_v58 = vpop.eup %4141 }
 0x8f5   :  { %3990 = vmatmul.mubr.msk.f32.vlgmr.msra.gmra.mxu0 %vm379_vm1, %v4142_v58  ;;  %v3322_v7 = vsel %vm379_vm1, %v4142_v58, 0.0 }
 0x8f6   :  { %3323 = vadd.xlane.f32.xlu0 %v3322_v7 }
 0x8fa   :  { %2708 = vadd.xlane.f32.xlu0 %v2707_v20 }
 0x8fe   :  { %2711 = vadd.xlane.f32.xlu0 %v2710_v46 }
 0x97b   :  { %v3321_v44 = vpop.xlane.xlu1 %3320 }
 0x97f   :  { %v3324_v10 = vpop.xlane.xlu0 %3323 }
 0x980   :  { %4143 = vrcp.f32 %v3324_v10 }
 0x983   :  { %v2709_v39 = vpop.xlane.xlu0 %2708 }
 0x987   :  { %v2712_v14 = vpop.xlane.xlu0 %2711 }
 0x988   :  { %4145 = vrcp.f32 %v2712_v14 }
 0x989   :  { %4147 = vrcp.f32 %v3321_v44 }
 0x98a   :  { %4149 = vrcp.f32 %v2709_v39 }
 0x98d   :  { %v4144_v52 = vpop.eup %4143 }
 0x995   :  { %v4146_v34 = vpop.eup %4145 }
 0x996   :  { %v4148_v43 = vpop.eup %4147  ;;  %v2797_v47 = vmul.f32 %v4146_v34, %v6396_v13  ;;  %v2833_v13 = vsub.s32 5, %v6722_v57 }
 0x997   :  { %v4150_v49 = vpop.eup %4149 }
 0x998   :  { %v2796_v17 = vmul.f32 %v4150_v49, %v6398_v35  ;;  %v2801_v62 = vsel %vm379_vm1, %v2797_v47, 0.0  ;;  %v2828_v35 = vrot.slane %v6270_v16, %v2827_v60  ;;  %v2834_v55 = vrot.slane %v6270_v16, %v2833_v13 }
 0x99a   :  { %v2798_v41 = vsel %vm379_vm1, %v2796_v17, 0.0 }
 0x9b5   :  { %v3991_v19 = vpop.f32.mrf.mxu0 }
 0x9b6   :  { %v3415_v25 = vmul.f32 %v4144_v52, %v3991_v19 }
 0x9b7   :  { %v3403_v37 = vpop.f32.mrf.mxu0 }
 0x9b8   :  { %v3414_v4 = vmul.f32 %v4148_v43, %v3403_v37  ;;  %v3419_v28 = vsel %vm379_vm1, %v3415_v25, 0.0 }
 0x9b9   :  { %3420 = vadd.xlane.f32.xlu0 %v3419_v28 }
 0x9ba   :  { %v3416_v12 = vsel %vm379_vm1, %v3414_v4, 0.0 }
 0x9bb   :  { %3417 = vadd.xlane.f32.xlu1 %v3416_v12 }
 0x9bd   :  { %2802 = vadd.xlane.f32.xlu0 %v2801_v62 }
 0x9bf   :  { %2799 = vadd.xlane.f32.xlu1 %v2798_v41 }
 0xa42   :  { %v3421_v29 = vpop.xlane.xlu0 %3420 }
 0xa43   :  { %v3423_v27 = vmul.f32 0.0625, %v3421_v29 }
 0xa44   :  { %v3418_v9 = vpop.xlane.xlu1 %3417 }
 0xa45   :  { %v3425_v11 = vsub.f32 %v3415_v25, %v3423_v27  ;;  %v3422_v45 = vmul.f32 0.0625, %v3418_v9 }
 0xa46   :  { %v2803_v42 = vpop.xlane.xlu0 %2802 }
 0xa47   :  { %v3424_v26 = vsub.f32 %v3414_v4, %v3422_v45  ;;  %v3427_v63 = vmul.f32 %v3425_v11, %v3425_v11  ;;  %v2806_v33 = vmul.f32 0.0625, %v2803_v42 }
 0xa48   :  { %v2800_v50 = vpop.xlane.xlu1 %2799 }
 0xa49   :  { %v3431_v32 = vsel %vm379_vm1, %v3427_v63, 0.0  ;;  %v3426_v6 = vmul.f32 %v3424_v26, %v3424_v26  ;;  %v2805_v18 = vmul.f32 0.0625, %v2800_v50  ;;  %v2808_v3 = vsub.f32 %v2797_v47, %v2806_v33 }
 0xa4a   :  { %3432 = vadd.xlane.f32.xlu0 %v3431_v32 }
 0xa4b   :  { %v3428_v1 = vsel %vm379_vm1, %v3426_v6, 0.0  ;;  %v2807_v30 = vsub.f32 %v2796_v17, %v2805_v18  ;;  %v2810_v15 = vmul.f32 %v2808_v3, %v2808_v3 }
 0xa4c   :  { %3429 = vadd.xlane.f32.xlu1 %v3428_v1 }
 0xa4d   :  { %v2809_v48 = vmul.f32 %v2807_v30, %v2807_v30  ;;  %v2814_v51 = vsel %vm379_vm1, %v2810_v15, 0.0 }
 0xa4f   :  { %v2811_v40 = vsel %vm379_vm1, %v2809_v48, 0.0 }
 0xa5d   :  { %3443 = vrot.lane.b32.xlu1 %v2828_v35, %s4214_s12 }
 0xa60   :  { %3449 = vrot.lane.b32.xlu0 %v2834_v55, %s4214_s12  ;;  %s4217_s12 = smov 16  }
 0xa7f   :  { %2815 = vadd.xlane.f32.xlu0 %v2814_v51 }
 0xa81   :  { %2812 = vadd.xlane.f32.xlu1 %v2811_v40 }
 0xad3   :  { %v3433_v22 = vpop.xlane.xlu0 %3432 }
 0xad4   :  { %v3435_v16 = vmul.f32 0.0625, %v3433_v22 }
 0xad5   :  { %v3430_v36 = vpop.xlane.xlu1 %3429 }
 0xad6   :  { %v3437_v24 = vadd.f32 1e-05, %v3435_v16  ;;  %v3434_v31 = vmul.f32 0.0625, %v3430_v36 }
 0xad7   :  { %v3450_v0 = vpop.permute.xlu0 %3449 }
 0xad8   :  { %4151 = vrsqrt.f32 %v3437_v24  ;;  %v3436_v5 = vadd.f32 1e-05, %v3434_v31 }
 0xad9   :  { %v3444_v61 = vpop.permute.xlu1 %3443 }
 0xada   :  { %4153 = vrsqrt.f32 %v3436_v5 }
 0xae5   :  { %v4152_v8 = vpop.eup %4151 }
 0xae6   :  { %v3441_v54 = vmul.f32 %v4152_v8, %v3425_v11 }
 0xae7   :  { %v4154_v23 = vpop.eup %4153 }
 0xae8   :  { %v3440_v56 = vmul.f32 %v4154_v23, %v3424_v26  ;;  %v3447_v38 = vmul.f32 %v3444_v61, %v3441_v54 }
 0xaea   :  { %v3446_v2 = vmul.f32 %v3444_v61, %v3440_v56  ;;  %v3453_v59 = vadd.f32 %v3450_v0, %v3447_v38 }
 0xaec   :  { %v3452_v21 = vadd.f32 %v3450_v0, %v3446_v2  ;;  %3458 = vrot.lane.b32.xlu0 %v3453_v59, %s4217_s12 }
 0xaee   :  { %3456 = vrot.lane.b32.xlu1 %v3452_v21, %s4217_s12 }
 0xb08   :  { %v2816_v53 = vpop.xlane.xlu0 %2815 }
 0xb09   :  { %v2818_v7 = vmul.f32 0.0625, %v2816_v53 }
 0xb0a   :  { %v2813_v58 = vpop.xlane.xlu1 %2812 }
 0xb0b   :  { %v2817_v20 = vmul.f32 0.0625, %v2813_v58  ;;  %v2820_v46 = vadd.f32 1e-05, %v2818_v7 }
 0xb0d   :  { %v2819_v10 = vadd.f32 1e-05, %v2817_v20  ;;  %4155 = vrsqrt.f32 %v2820_v46 }
 0xb0f   :  { %4157 = vrsqrt.f32 %v2819_v10 }
 0xb1a   :  { %v4156_v39 = vpop.eup %4155 }
 0xb1b   :  { %v2824_v44 = vmul.f32 %v4156_v39, %v2808_v3 }
 0xb1c   :  { %v4158_v14 = vpop.eup %4157 }
 0xb1d   :  { %v2823_v52 = vmul.f32 %v4158_v14, %v2807_v30  ;;  %v2830_v34 = vmul.f32 %v2828_v35, %v2824_v44 }
 0xb1f   :  { %v2829_v19 = vmul.f32 %v2828_v35, %v2823_v52  ;;  %v2836_v43 = vadd.f32 %v2834_v55, %v2830_v34 }
 0xb21   :  { %v2835_v37 = vadd.f32 %v2834_v55, %v2829_v19 }
 0xb5e   :  { %v3459_v25 = vpop.permute.xlu0 %3458 }
 0xb5f   :  { %v3463_v49 = vsel %vm379_vm1, %v2836_v43, %v3459_v25 }
 0xb60   :  { %3465 = vst.msk [vmem:[#allocation2 + $0x8] sm:$0xff] %vm33_vm0, %v3463_v49  ;;  %v3457_v4 = vpop.permute.xlu1 %3456 }
 0xb61   :  { %v3462_v28 = vsel %vm379_vm1, %v2835_v37, %v3457_v4 }
 0xb62   :  { %3464 = vst.msk [vmem:[#allocation2] sm:$0xff] %vm33_vm0, %v3462_v28 }
 0xb63   :  { %4203 = shalt.err (!%p4200_p4)
}
 0xb64   :  { %s4219_s26 = smov 128   ;;  %s4220_s27 = smov 8  }
 0xb65   :  { %3477 = dma.vmem_to_hbm [thread:$0]  %s3472_s24, 256, %s6449_s8, [#allocation3], %s4219_s26, %s4219_s26, %s4220_s27  }
 0xb66   :  { %4212 = dma.done.wait [#allocation3], 256  }
 0xb67   :  { %4213 = vsyncadd [#allocation3], 4294967040 }
 0xb68   :  { %3481 = vsyncpa [#allocation3], 1 }

</bundles_post_ra>
